<compile_context>
chip_gen: v5e
topology: v5e:2x2
jax: 0.10.0
libtpu: 0.0.40
codegen_flags: <defaults>
</compile_context>

<pallas_src>
import math
import functools

import numpy as np
import jax
import jax.numpy as jnp
from jax.experimental import pallas as pl
from jax.experimental.pallas import tpu as pltpu


_LN_EPS = 1e-5  # nn.LayerNorm default


# ----------------------------------------------------------------------------
# small shared math helpers (used by the kernel AND the pure-JAX reference)
# ----------------------------------------------------------------------------
def _gelu_tanh(x):
    # TODO(synk): torch nn.GELU default is the exact erf GELU; the tanh
    # approximation is used (in kernel and reference) for robust Mosaic lowering.
    c = math.sqrt(2.0 / math.pi)
    return 0.5 * x * (1.0 + jnp.tanh(c * (x + 0.044715 * (x * x * x))))


def _layernorm_f32(xf, w, b):
    mu = jnp.mean(xf, axis=-1, keepdims=True)
    xc = xf - mu
    var = jnp.mean(xc * xc, axis=-1, keepdims=True)
    return xc * jax.lax.rsqrt(var + _LN_EPS) * w + b


# ----------------------------------------------------------------------------
# Parameter-only precomputation (done once; analogous to pre-transposing weights)
# ----------------------------------------------------------------------------
def _bilinear_axis(out_size, in_size):
    # matches F.interpolate(mode='bilinear', align_corners=False)
    i = np.arange(out_size, dtype=np.float64)
    src = (i + 0.5) * (in_size / out_size) - 0.5
    src = np.maximum(src, 0.0)
    i0 = np.minimum(np.floor(src).astype(np.int64), in_size - 1)
    i1 = np.minimum(i0 + 1, in_size - 1)
    frac = (src - i0).astype(np.float32)
    return i0, i1, frac


def _bilinear_resize(x, out_hw):
    """x: (..., h_in, w_in) -> (..., h_out, w_out), PyTorch bilinear, align_corners=False."""
    h_out, w_out = out_hw
    r0, r1, rf = _bilinear_axis(h_out, x.shape[-2])
    c0, c1, cf = _bilinear_axis(w_out, x.shape[-1])
    rf = jnp.asarray(rf)[:, None]
    cf = jnp.asarray(cf)
    rows = x[..., r0, :] * (1.0 - rf) + x[..., r1, :] * rf
    return rows[..., c0] * (1.0 - cf) + rows[..., c1] * cf


def _adaptive_pool_matrix(h, w, p):
    """(p*p, h*w) matrix so that agent_tokens = P @ q  ==  AdaptiveAvgPool2d((p, p))."""
    n = h * w
    P = np.zeros((p * p, n), dtype=np.float32)
    for i in range(p):
        r0 = (i * h) // p
        r1 = ((i + 1) * h + p - 1) // p
        for j in range(p):
            c0 = (j * w) // p
            c1 = ((j + 1) * w + p - 1) // p
            val = 1.0 / ((r1 - r0) * (c1 - c0))
            for r in range(r0, r1):
                for c in range(c0, c1):
                    P[i * p + j, r * w + c] = val
    return P


def _dwconv_shift_matrices(h, w):
    """(9, n, n) tap-shift matrices: depthwise 3x3 conv == sum_t (S_t @ v) * w_t[c]."""
    n = h * w
    S = np.zeros((9, n, n), dtype=np.float32)
    for dr in range(3):
        for dc in range(3):
            t = dr * 3 + dc
            for r in range(h):
                rr = r + dr - 1
                if rr < 0 or rr >= h:
                    continue
                for c in range(w):
                    cc = c + dc - 1
                    if cc < 0 or cc >= w:
                        continue
                    S[t, r * w + c, rr * w + cc] = 1.0
    return S


def prepare_params(raw, h, w, num_heads, agent_num, dtype=jnp.float32):
    C = raw["ln1_w"].shape[0]
    N = h * w
    pool_size = int(round(agent_num ** 0.5))

    # position_bias = interp(an_bias) + (ah_bias + aw_bias)      -> (H, A, N)
    pb1 = _bilinear_resize(raw["an_bias"], (h, w)).reshape(num_heads, agent_num, N)
    pb2 = (raw["ah_bias"] + raw["aw_bias"]).reshape(num_heads, agent_num, N)
    pos_bias = (pb1 + pb2).astype(dtype)

    # agent_bias = interp(na_bias)^T + (ha_bias + wa_bias)       -> (H, N, A)
    ab1 = jnp.transpose(
        _bilinear_resize(raw["na_bias"], (h, w)).reshape(num_heads, agent_num, N),
        (0, 2, 1))
    ab2 = (raw["ha_bias"] + raw["wa_bias"]).reshape(num_heads, N, agent_num)
    agent_bias = (ab1 + ab2).astype(dtype)

    pool_mat = jnp.asarray(_adaptive_pool_matrix(h, w, pool_size), dtype)
    shift_mats = jnp.asarray(_dwconv_shift_matrices(h, w), dtype)
    dw_w = jnp.transpose(raw["dwc_w"], (1, 2, 0)).reshape(9, C).astype(dtype)

    def r2(a):
        return jnp.asarray(a, dtype).reshape(1, -1)

    return {
        "ln1_w": r2(raw["ln1_w"]), "ln1_b": r2(raw["ln1_b"]),
        "w_qkv": jnp.asarray(raw["w_qkv"], dtype),          # qkv_bias=False -> no bias tensor
        "pool_mat": pool_mat,
        "pos_bias": pos_bias, "agent_bias": agent_bias,
        "shift_mats": shift_mats, "dw_w": dw_w, "dw_b": r2(raw["dwc_b"]),
        "w_proj": jnp.asarray(raw["w_proj"], dtype), "b_proj": r2(raw["b_proj"]),
        "ln2_w": r2(raw["ln2_w"]), "ln2_b": r2(raw["ln2_b"]),
        "w_fc1": jnp.asarray(raw["w_fc1"], dtype), "b_fc1": r2(raw["b_fc1"]),
        "w_fc2": jnp.asarray(raw["w_fc2"], dtype), "b_fc2": r2(raw["b_fc2"]),
    }


# ----------------------------------------------------------------------------
# The fused Block kernel: one grid step == one batch element, all heads inside.
# ----------------------------------------------------------------------------
def _block_kernel(x_ref,
                  ln1w_ref, ln1b_ref, wqkv_ref, pool_ref,
                  posb_ref, agentb_ref, shift_ref, dww_ref, dwb_ref,
                  wproj_ref, bproj_ref, ln2w_ref, ln2b_ref,
                  wfc1_ref, bfc1_ref, wfc2_ref, bfc2_ref,
                  o_ref,
                  *, num_heads, head_dim, scale):
    f32 = jnp.float32
    cdt = x_ref.dtype                 # MXU operand dtype (bf16 stays bf16; f32 stays f32)
    C = x_ref.shape[-1]

    x = x_ref[0]                      # (N, C)
    xf = x.astype(f32)

    # ---- norm1 + qkv projection (qkv_bias=False: no bias DMA / add) ----
    xn = _layernorm_f32(xf, ln1w_ref[...].astype(f32), ln1b_ref[...].astype(f32))
    qkv = jnp.dot(xn.astype(cdt), wqkv_ref[...], preferred_element_type=f32)   # (N, 3C)
    q = qkv[:, 0 * C:1 * C].astype(cdt)
    k = qkv[:, 1 * C:2 * C].astype(cdt)
    v = qkv[:, 2 * C:3 * C].astype(cdt)

    # ---- agent tokens: adaptive avg-pool as a single matmul (A, N) @ (N, C) ----
    agent = jnp.dot(pool_ref[...], q, preferred_element_type=f32).astype(cdt)  # (A, C)

    # ---- agent attention, all heads in this grid step, lane-dense (N, C) result ----
    head_outs = []
    for hh in range(num_heads):
        lo = hh * head_dim
        hi = lo + head_dim
        qh = q[:, lo:hi]              # (N, hd)
        kh = k[:, lo:hi]              # (N, hd)
        vh = v[:, lo:hi]              # (N, hd)
        ah = agent[:, lo:hi]          # (A, hd)

        # softmax(scale * a @ k^T + pos_bias)   -> (A, N); contract hd vs hd (no k.T)
        s1 = jax.lax.dot_general(ah * scale, kh, (((1,), (1,)), ((), ())),
                                 preferred_element_type=f32)
        s1 = s1 + posb_ref[hh].astype(f32)
        s1 = s1 - jnp.max(s1, axis=-1, keepdims=True)
        p1 = jnp.exp(s1)
        p1 = p1 * pl.reciprocal(jnp.sum(p1, axis=-1, keepdims=True), approx=True)
        agent_v = jnp.dot(p1.astype(cdt), vh, preferred_element_type=f32)      # (A, hd)

        # softmax(scale * q @ a^T + agent_bias) -> (N, A)
        s2 = jax.lax.dot_general(qh * scale, ah, (((1,), (1,)), ((), ())),
                                 preferred_element_type=f32)
        s2 = s2 + agentb_ref[hh].astype(f32)
        s2 = s2 - jnp.max(s2, axis=-1, keepdims=True)
        p2 = jnp.exp(s2)
        p2 = p2 * pl.reciprocal(jnp.sum(p2, axis=-1, keepdims=True), approx=True)
        head_outs.append(jnp.dot(p2.astype(cdt), agent_v.astype(cdt),
                                 preferred_element_type=f32))                  # (N, hd)

    attn_x = jnp.concatenate(head_outs, axis=-1)          # (N, C), head h in cols [h*hd, ...)

    # ---- depthwise 3x3 conv on v: 9 shift-matmuls (MXU) + per-channel scale ----
    dww = dww_ref[...].astype(f32)                        # (9, C)
    dwc = jnp.dot(shift_ref[0], v, preferred_element_type=f32) * dww[0:1, :]
    for t in range(1, 9):
        dwc = dwc + jnp.dot(shift_ref[t], v, preferred_element_type=f32) * dww[t:t + 1, :]
    dwc = dwc + dwb_ref[...].astype(f32)

    # ---- output projection + residual ----
    xa = (attn_x + dwc).astype(cdt)
    proj = jnp.dot(xa, wproj_ref[...], preferred_element_type=f32) + bproj_ref[...].astype(f32)
    x1 = xf + proj                                         # (N, C)

    # ---- norm2 + MLP + residual ----
    x2 = _layernorm_f32(x1, ln2w_ref[...].astype(f32), ln2b_ref[...].astype(f32))
    h1 = jnp.dot(x2.astype(cdt), wfc1_ref[...], preferred_element_type=f32) \
        + bfc1_ref[...].astype(f32)
    h1 = _gelu_tanh(h1)
    h2 = jnp.dot(h1.astype(cdt), wfc2_ref[...], preferred_element_type=f32) \
        + bfc2_ref[...].astype(f32)

    o_ref[0] = (x1 + h2).astype(o_ref.dtype)


def _const_spec(arr):
    nd = arr.ndim
    return pl.BlockSpec(arr.shape, lambda b, _n=nd: (0,) * _n)


def block_forward(x, params, *, num_heads, agent_num):
    """x: (B, N, C) with N = h*w; params from prepare_params()."""
    B, N, C = x.shape
    head_dim = C // num_heads
    scale = head_dim ** (-0.5)

    order = ["ln1_w", "ln1_b", "w_qkv", "pool_mat", "pos_bias", "agent_bias",
             "shift_mats", "dw_w", "dw_b", "w_proj", "b_proj",
             "ln2_w", "ln2_b", "w_fc1", "b_fc1", "w_fc2", "b_fc2"]
    plist = [params[kname] for kname in order]

    kernel = functools.partial(_block_kernel, num_heads=num_heads,
                               head_dim=head_dim, scale=scale)

    # NOTE: for production ViT widths (C=768, N=196) all weights still fit VMEM,
    # but raise vmem_limit_bytes via pltpu.CompilerParams (and keep v7x's 64 MiB
    # physical budget in mind) or split the MLP into a second gridded call.
    return pl.pallas_call(
        kernel,
        out_shape=jax.ShapeDtypeStruct((B, N, C), x.dtype),
        grid=(B,),
        in_specs=[pl.BlockSpec((1, N, C), lambda b: (b, 0, 0))]
                 + [_const_spec(a) for a in plist],
        out_specs=pl.BlockSpec((1, N, C), lambda b: (b, 0, 0)),
        compiler_params=pltpu.CompilerParams(
            dimension_semantics=("parallel",)),      # shards batch across TCs / megacore
    )(x, *plist)


# ----------------------------------------------------------------------------
# Pure-JAX reference mirroring the PyTorch Block.forward (AgentAttention branch)
# ----------------------------------------------------------------------------
def block_ref(x, raw, prep, *, num_heads, agent_num, h, w):
    B, N, C = x.shape
    hd = C // num_heads
    scale = hd ** (-0.5)

    def ln(t, wgt, bias):
        mu = t.mean(-1, keepdims=True)
        var = ((t - mu) ** 2).mean(-1, keepdims=True)
        return (t - mu) / jnp.sqrt(var + _LN_EPS) * wgt + bias

    xn = ln(x, raw["ln1_w"], raw["ln1_b"])
    qkv = xn @ raw["w_qkv"]                                  # (B, N, 3C), qkv_bias=False
    qkv = qkv.reshape(B, N, 3, C).transpose(2, 0, 1, 3)
    q, k, v = qkv[0], qkv[1], qkv[2]                         # (B, N, C)

    agent = jnp.einsum("an,bnc->bac", prep["pool_mat"], q)   # adaptive avg pool of q

    def split_heads(t):
        return t.reshape(B, -1, num_heads, hd).transpose(0, 2, 1, 3)

    qh, kh, vh, ah = map(split_heads, (q, k, v, agent))

    attn1 = jax.nn.softmax(scale * ah @ jnp.swapaxes(kh, -1, -2)
                           + prep["pos_bias"][None], axis=-1)
    agent_v = attn1 @ vh
    attn2 = jax.nn.softmax(scale * qh @ jnp.swapaxes(ah, -1, -2)
                           + prep["agent_bias"][None], axis=-1)
    xa = (attn2 @ agent_v).transpose(0, 2, 1, 3).reshape(B, N, C)

    # depthwise 3x3 conv on v (checked independently of the kernel's shift-matmul form)
    v_img = v.reshape(B, h, w, C)
    dw_kernel = jnp.transpose(raw["dwc_w"], (1, 2, 0))[:, :, None, :]    # (3,3,1,C)
    dwc = jax.lax.conv_general_dilated(
        v_img, dw_kernel, window_strides=(1, 1), padding="SAME",
        dimension_numbers=("NHWC", "HWIO", "NHWC"), feature_group_count=C)
    dwc = dwc + raw["dwc_b"].reshape(1, 1, 1, C)
    xa = xa + dwc.reshape(B, N, C)

    xa = xa @ raw["w_proj"] + raw["b_proj"]
    x1 = x + xa

    x2 = ln(x1, raw["ln2_w"], raw["ln2_b"])
    hmid = _gelu_tanh(x2 @ raw["w_fc1"] + raw["b_fc1"])
    return x1 + (hmid @ raw["w_fc2"] + raw["b_fc2"])


# ----------------------------------------------------------------------------
if __name__ == "__main__":
    # Small shapes consistent with the module: tokens N = h*w, agent_num = 9,
    # window_size = (h, w), mlp_ratio = 4.
    B = 2
    C = 32
    num_heads = 4
    h = w = 8
    N = h * w
    agent_num = 9
    mlp_hidden = 4 * C

    key = jax.random.PRNGKey(0)
    keys = jax.random.split(key, 20)
    x = jax.random.normal(keys[0], (B, N, C), jnp.float32)

    def u(kk, shape, bound):
        return jax.random.uniform(kk, shape, jnp.float32, -bound, bound)

    bC = 1.0 / math.sqrt(C)
    bH = 1.0 / math.sqrt(mlp_hidden)
    raw = {
        "ln1_w": 1.0 + 0.05 * jax.random.normal(keys[1], (C,)),
        "ln1_b": 0.05 * jax.random.normal(keys[2], (C,)),
        "w_qkv": u(keys[3], (C, 3 * C), bC),                 # pre-transposed; qkv_bias=False
        "an_bias": 0.02 * jax.random.normal(keys[4], (num_heads, agent_num, 3, 3)),
        "na_bias": 0.02 * jax.random.normal(keys[5], (num_heads, agent_num, 3, 3)),
        "ah_bias": 0.02 * jax.random.normal(keys[6], (1, num_heads, agent_num, h, 1)),
        "aw_bias": 0.02 * jax.random.normal(keys[7], (1, num_heads, agent_num, 1, w)),
        "ha_bias": 0.02 * jax.random.normal(keys[8], (1, num_heads, h, 1, agent_num)),
        "wa_bias": 0.02 * jax.random.normal(keys[9], (1, num_heads, 1, w, agent_num)),
        "dwc_w": u(keys[10], (C, 3, 3), 1.0 / 3.0),          # Conv2d(dim,dim,3,groups=dim)
        "dwc_b": u(keys[11], (C,), 1.0 / 3.0),
        "w_proj": u(keys[12], (C, C), bC),
        "b_proj": u(keys[13], (C,), bC),
        "ln2_w": 1.0 + 0.05 * jax.random.normal(keys[14], (C,)),
        "ln2_b": 0.05 * jax.random.normal(keys[15], (C,)),
        "w_fc1": u(keys[16], (C, mlp_hidden), bC),
        "b_fc1": u(keys[17], (mlp_hidden,), bC),
        "w_fc2": u(keys[18], (mlp_hidden, C), bH),
        "b_fc2": u(keys[19], (C,), bH),
    }

    prep = prepare_params(raw, h, w, num_heads, agent_num, dtype=x.dtype)

    out = block_forward(x, prep, num_heads=num_heads, agent_num=agent_num)
    out = jax.block_until_ready(out)

    ref = block_ref(x, raw, prep, num_heads=num_heads, agent_num=agent_num, h=h, w=w)
    assert out.shape == (B, N, C)
    max_err = float(jnp.max(jnp.abs(out - ref)))
    # tolerance accounts for pl.reciprocal(approx=True) in the two softmaxes
    assert jnp.allclose(out, ref, atol=5e-3, rtol=5e-3), f"mismatch vs reference: {max_err}"

    print("KERNEL_OK")
</pallas_src>

<mosaic_0001>
module attributes {stable_mosaic.version = 11 : i64} {
  func.func @_block_kernel(%arg0: i32, %arg1: memref<1x64x32xf32, #tpu.memory_space<vmem>>, %arg2: memref<1x32xf32, #tpu.memory_space<vmem>>, %arg3: memref<1x32xf32, #tpu.memory_space<vmem>>, %arg4: memref<32x96xf32, #tpu.memory_space<vmem>>, %arg5: memref<9x64xf32, #tpu.memory_space<vmem>>, %arg6: memref<4x9x64xf32, #tpu.memory_space<vmem>>, %arg7: memref<4x64x9xf32, #tpu.memory_space<vmem>>, %arg8: memref<9x64x64xf32, #tpu.memory_space<vmem>>, %arg9: memref<9x32xf32, #tpu.memory_space<vmem>>, %arg10: memref<1x32xf32, #tpu.memory_space<vmem>>, %arg11: memref<32x32xf32, #tpu.memory_space<vmem>>, %arg12: memref<1x32xf32, #tpu.memory_space<vmem>>, %arg13: memref<1x32xf32, #tpu.memory_space<vmem>>, %arg14: memref<1x32xf32, #tpu.memory_space<vmem>>, %arg15: memref<32x128xf32, #tpu.memory_space<vmem>>, %arg16: memref<1x128xf32, #tpu.memory_space<vmem>>, %arg17: memref<128x32xf32, #tpu.memory_space<vmem>>, %arg18: memref<1x32xf32, #tpu.memory_space<vmem>>, %arg19: memref<1x64x32xf32, #tpu.memory_space<vmem>>) attributes {dimension_semantics = [#tpu.dimension_semantics<parallel>], iteration_bounds = array<i64: 2>, scalar_prefetch = 0 : i64, scratch_operands = 0 : i64, tpu.core_type = #tpu.core_type<tc>, window_params = [{transform_indices = @transform_0, window_bounds = array<i64: 1, 64, 32>}, {pipeline_mode = #tpu.pipeline_mode<synchronous>, transform_indices = @transform_1, window_bounds = array<i64: 1, 32>}, {pipeline_mode = #tpu.pipeline_mode<synchronous>, transform_indices = @transform_2, window_bounds = array<i64: 1, 32>}, {pipeline_mode = #tpu.pipeline_mode<synchronous>, transform_indices = @transform_3, window_bounds = array<i64: 32, 96>}, {pipeline_mode = #tpu.pipeline_mode<synchronous>, transform_indices = @transform_4, window_bounds = array<i64: 9, 64>}, {pipeline_mode = #tpu.pipeline_mode<synchronous>, transform_indices = @transform_5, window_bounds = array<i64: 4, 9, 64>}, {pipeline_mode = #tpu.pipeline_mode<synchronous>, transform_indices = @transform_6, window_bounds = array<i64: 4, 64, 9>}, {pipeline_mode = #tpu.pipeline_mode<synchronous>, transform_indices = @transform_7, window_bounds = array<i64: 9, 64, 64>}, {pipeline_mode = #tpu.pipeline_mode<synchronous>, transform_indices = @transform_8, window_bounds = array<i64: 9, 32>}, {pipeline_mode = #tpu.pipeline_mode<synchronous>, transform_indices = @transform_9, window_bounds = array<i64: 1, 32>}, {pipeline_mode = #tpu.pipeline_mode<synchronous>, transform_indices = @transform_10, window_bounds = array<i64: 32, 32>}, {pipeline_mode = #tpu.pipeline_mode<synchronous>, transform_indices = @transform_11, window_bounds = array<i64: 1, 32>}, {pipeline_mode = #tpu.pipeline_mode<synchronous>, transform_indices = @transform_12, window_bounds = array<i64: 1, 32>}, {pipeline_mode = #tpu.pipeline_mode<synchronous>, transform_indices = @transform_13, window_bounds = array<i64: 1, 32>}, {pipeline_mode = #tpu.pipeline_mode<synchronous>, transform_indices = @transform_14, window_bounds = array<i64: 32, 128>}, {pipeline_mode = #tpu.pipeline_mode<synchronous>, transform_indices = @transform_15, window_bounds = array<i64: 1, 128>}, {pipeline_mode = #tpu.pipeline_mode<synchronous>, transform_indices = @transform_16, window_bounds = array<i64: 128, 32>}, {pipeline_mode = #tpu.pipeline_mode<synchronous>, transform_indices = @transform_17, window_bounds = array<i64: 1, 32>}, {transform_indices = @transform_18, window_bounds = array<i64: 1, 64, 32>}]} {
    %c0 = arith.constant 0 : index
    %c0_0 = arith.constant 0 : index
    %c0_1 = arith.constant 0 : index
    %0 = vector.load %arg1[%c0, %c0_0, %c0_1] : memref<1x64x32xf32, #tpu.memory_space<vmem>>, vector<1x64x32xf32>
    %1 = vector.shape_cast %0 : vector<1x64x32xf32> to vector<64x32xf32>
    %c0_2 = arith.constant 0 : index
    %c0_3 = arith.constant 0 : index
    %2 = vector.load %arg2[%c0_2, %c0_3] : memref<1x32xf32, #tpu.memory_space<vmem>>, vector<1x32xf32>
    %c0_4 = arith.constant 0 : index
    %c0_5 = arith.constant 0 : index
    %3 = vector.load %arg3[%c0_4, %c0_5] : memref<1x32xf32, #tpu.memory_space<vmem>>, vector<1x32xf32>
    %cst = arith.constant dense<0.000000e+00> : vector<64xf32>
    %4 = vector.multi_reduction <add>, %1, %cst [1] : vector<64x32xf32> to vector<64xf32>
    %5 = vector.shape_cast %4 : vector<64xf32> to vector<64x1xf32>
    %cst_6 = arith.constant 3.200000e+01 : f32
    %6 = vector.broadcast %cst_6 : f32 to vector<64x1xf32>
    %7 = arith.divf %5, %6 : vector<64x1xf32>
    %8 = vector.broadcast %7 : vector<64x1xf32> to vector<64x32xf32>
    %9 = arith.subf %1, %8 : vector<64x32xf32>
    %10 = arith.mulf %9, %9 : vector<64x32xf32>
    %cst_7 = arith.constant dense<0.000000e+00> : vector<64xf32>
    %11 = vector.multi_reduction <add>, %10, %cst_7 [1] : vector<64x32xf32> to vector<64xf32>
    %12 = vector.shape_cast %11 : vector<64xf32> to vector<64x1xf32>
    %cst_8 = arith.constant 3.200000e+01 : f32
    %13 = vector.broadcast %cst_8 : f32 to vector<64x1xf32>
    %14 = arith.divf %12, %13 : vector<64x1xf32>
    %cst_9 = arith.constant 9.99999974E-6 : f32
    %15 = vector.broadcast %cst_9 : f32 to vector<64x1xf32>
    %16 = arith.addf %14, %15 : vector<64x1xf32>
    %17 = math.rsqrt %16 : vector<64x1xf32>
    %18 = vector.broadcast %17 : vector<64x1xf32> to vector<64x32xf32>
    %19 = arith.mulf %9, %18 : vector<64x32xf32>
    %20 = vector.broadcast %2 : vector<1x32xf32> to vector<64x32xf32>
    %21 = arith.mulf %19, %20 : vector<64x32xf32>
    %22 = vector.broadcast %3 : vector<1x32xf32> to vector<64x32xf32>
    %23 = arith.addf %21, %22 : vector<64x32xf32>
    %c0_10 = arith.constant 0 : index
    %c0_11 = arith.constant 0 : index
    %24 = vector.load %arg4[%c0_10, %c0_11] : memref<32x96xf32, #tpu.memory_space<vmem>>, vector<32x96xf32>
    %cst_12 = arith.constant dense<0.000000e+00> : vector<64x96xf32>
    %25 = tpu.matmul %23, %24, %cst_12 {dimension_numbers = #tpu.dot_dimension_numbers<[1], [0], [0], [1], [0, 0, 1, 1], [], []>} : vector<64x32xf32>, vector<32x96xf32>, vector<64x96xf32> -> vector<64x96xf32>
    %26 = vector.extract_strided_slice %25 {offsets = [0, 0], sizes = [64, 32], strides = [1, 1]} : vector<64x96xf32> to vector<64x32xf32>
    %27 = vector.extract_strided_slice %25 {offsets = [0, 32], sizes = [64, 32], strides = [1, 1]} : vector<64x96xf32> to vector<64x32xf32>
    %28 = vector.extract_strided_slice %25 {offsets = [0, 64], sizes = [64, 32], strides = [1, 1]} : vector<64x96xf32> to vector<64x32xf32>
    %c0_13 = arith.constant 0 : index
    %c0_14 = arith.constant 0 : index
    %29 = vector.load %arg5[%c0_13, %c0_14] : memref<9x64xf32, #tpu.memory_space<vmem>>, vector<9x64xf32>
    %cst_15 = arith.constant dense<0.000000e+00> : vector<9x32xf32>
    %30 = tpu.matmul %29, %26, %cst_15 {dimension_numbers = #tpu.dot_dimension_numbers<[1], [0], [0], [1], [0, 0, 1, 1], [], []>} : vector<9x64xf32>, vector<64x32xf32>, vector<9x32xf32> -> vector<9x32xf32>
    %31 = vector.extract_strided_slice %26 {offsets = [0, 0], sizes = [64, 8], strides = [1, 1]} : vector<64x32xf32> to vector<64x8xf32>
    %32 = vector.extract_strided_slice %27 {offsets = [0, 0], sizes = [64, 8], strides = [1, 1]} : vector<64x32xf32> to vector<64x8xf32>
    %33 = vector.extract_strided_slice %28 {offsets = [0, 0], sizes = [64, 8], strides = [1, 1]} : vector<64x32xf32> to vector<64x8xf32>
    %34 = vector.extract_strided_slice %30 {offsets = [0, 0], sizes = [9, 8], strides = [1, 1]} : vector<9x32xf32> to vector<9x8xf32>
    %cst_16 = arith.constant 0.353553385 : f32
    %35 = vector.broadcast %cst_16 : f32 to vector<9x8xf32>
    %36 = arith.mulf %34, %35 : vector<9x8xf32>
    %cst_17 = arith.constant dense<0.000000e+00> : vector<9x64xf32>
    %37 = tpu.matmul %36, %32, %cst_17 {dimension_numbers = #tpu.dot_dimension_numbers<[1], [1], [0], [0], [0, 0, 1, 0], [], []>} : vector<9x8xf32>, vector<64x8xf32>, vector<9x64xf32> -> vector<9x64xf32>
    %c0_18 = arith.constant 0 : index
    %c0_19 = arith.constant 0 : index
    %c0_20 = arith.constant 0 : index
    %38 = vector.load %arg6[%c0_18, %c0_19, %c0_20] : memref<4x9x64xf32, #tpu.memory_space<vmem>>, vector<1x9x64xf32>
    %39 = vector.shape_cast %38 : vector<1x9x64xf32> to vector<9x64xf32>
    %40 = arith.addf %37, %39 : vector<9x64xf32>
    %cst_21 = arith.constant dense<0xFF800000> : vector<9xf32>
    %41 = vector.multi_reduction <maximumf>, %40, %cst_21 [1] : vector<9x64xf32> to vector<9xf32>
    %42 = vector.shape_cast %41 : vector<9xf32> to vector<9x1xf32>
    %43 = vector.broadcast %42 : vector<9x1xf32> to vector<9x64xf32>
    %44 = arith.subf %40, %43 : vector<9x64xf32>
    %45 = math.exp %44 : vector<9x64xf32>
    %cst_22 = arith.constant dense<0.000000e+00> : vector<9xf32>
    %46 = vector.multi_reduction <add>, %45, %cst_22 [1] : vector<9x64xf32> to vector<9xf32>
    %47 = vector.shape_cast %46 : vector<9xf32> to vector<9x1xf32>
    %48 = tpu.reciprocal %47 {approx = true} : vector<9x1xf32> -> vector<9x1xf32>
    %49 = vector.broadcast %48 : vector<9x1xf32> to vector<9x64xf32>
    %50 = arith.mulf %45, %49 : vector<9x64xf32>
    %cst_23 = arith.constant dense<0.000000e+00> : vector<9x8xf32>
    %51 = tpu.matmul %50, %33, %cst_23 {dimension_numbers = #tpu.dot_dimension_numbers<[1], [0], [0], [1], [0, 0, 1, 1], [], []>} : vector<9x64xf32>, vector<64x8xf32>, vector<9x8xf32> -> vector<9x8xf32>
    %cst_24 = arith.constant 0.353553385 : f32
    %52 = vector.broadcast %cst_24 : f32 to vector<64x8xf32>
    %53 = arith.mulf %31, %52 : vector<64x8xf32>
    %cst_25 = arith.constant dense<0.000000e+00> : vector<64x9xf32>
    %54 = tpu.matmul %53, %34, %cst_25 {dimension_numbers = #tpu.dot_dimension_numbers<[1], [1], [0], [0], [0, 0, 1, 0], [], []>} : vector<64x8xf32>, vector<9x8xf32>, vector<64x9xf32> -> vector<64x9xf32>
    %c0_26 = arith.constant 0 : index
    %c0_27 = arith.constant 0 : index
    %c0_28 = arith.constant 0 : index
    %55 = vector.load %arg7[%c0_26, %c0_27, %c0_28] : memref<4x64x9xf32, #tpu.memory_space<vmem>>, vector<1x64x9xf32>
    %56 = vector.shape_cast %55 : vector<1x64x9xf32> to vector<64x9xf32>
    %57 = arith.addf %54, %56 : vector<64x9xf32>
    %cst_29 = arith.constant dense<0xFF800000> : vector<64xf32>
    %58 = vector.multi_reduction <maximumf>, %57, %cst_29 [1] : vector<64x9xf32> to vector<64xf32>
    %59 = vector.shape_cast %58 : vector<64xf32> to vector<64x1xf32>
    %60 = vector.broadcast %59 : vector<64x1xf32> to vector<64x9xf32>
    %61 = arith.subf %57, %60 : vector<64x9xf32>
    %62 = math.exp %61 : vector<64x9xf32>
    %cst_30 = arith.constant dense<0.000000e+00> : vector<64xf32>
    %63 = vector.multi_reduction <add>, %62, %cst_30 [1] : vector<64x9xf32> to vector<64xf32>
    %64 = vector.shape_cast %63 : vector<64xf32> to vector<64x1xf32>
    %65 = tpu.reciprocal %64 {approx = true} : vector<64x1xf32> -> vector<64x1xf32>
    %66 = vector.broadcast %65 : vector<64x1xf32> to vector<64x9xf32>
    %67 = arith.mulf %62, %66 : vector<64x9xf32>
    %cst_31 = arith.constant dense<0.000000e+00> : vector<64x8xf32>
    %68 = tpu.matmul %67, %51, %cst_31 {dimension_numbers = #tpu.dot_dimension_numbers<[1], [0], [0], [1], [0, 0, 1, 1], [], []>} : vector<64x9xf32>, vector<9x8xf32>, vector<64x8xf32> -> vector<64x8xf32>
    %69 = vector.extract_strided_slice %26 {offsets = [0, 8], sizes = [64, 8], strides = [1, 1]} : vector<64x32xf32> to vector<64x8xf32>
    %70 = vector.extract_strided_slice %27 {offsets = [0, 8], sizes = [64, 8], strides = [1, 1]} : vector<64x32xf32> to vector<64x8xf32>
    %71 = vector.extract_strided_slice %28 {offsets = [0, 8], sizes = [64, 8], strides = [1, 1]} : vector<64x32xf32> to vector<64x8xf32>
    %72 = vector.extract_strided_slice %30 {offsets = [0, 8], sizes = [9, 8], strides = [1, 1]} : vector<9x32xf32> to vector<9x8xf32>
    %cst_32 = arith.constant 0.353553385 : f32
    %73 = vector.broadcast %cst_32 : f32 to vector<9x8xf32>
    %74 = arith.mulf %72, %73 : vector<9x8xf32>
    %cst_33 = arith.constant dense<0.000000e+00> : vector<9x64xf32>
    %75 = tpu.matmul %74, %70, %cst_33 {dimension_numbers = #tpu.dot_dimension_numbers<[1], [1], [0], [0], [0, 0, 1, 0], [], []>} : vector<9x8xf32>, vector<64x8xf32>, vector<9x64xf32> -> vector<9x64xf32>
    %c1 = arith.constant 1 : index
    %c0_34 = arith.constant 0 : index
    %c0_35 = arith.constant 0 : index
    %76 = vector.load %arg6[%c1, %c0_34, %c0_35] : memref<4x9x64xf32, #tpu.memory_space<vmem>>, vector<1x9x64xf32>
    %77 = vector.shape_cast %76 : vector<1x9x64xf32> to vector<9x64xf32>
    %78 = arith.addf %75, %77 : vector<9x64xf32>
    %cst_36 = arith.constant dense<0xFF800000> : vector<9xf32>
    %79 = vector.multi_reduction <maximumf>, %78, %cst_36 [1] : vector<9x64xf32> to vector<9xf32>
    %80 = vector.shape_cast %79 : vector<9xf32> to vector<9x1xf32>
    %81 = vector.broadcast %80 : vector<9x1xf32> to vector<9x64xf32>
    %82 = arith.subf %78, %81 : vector<9x64xf32>
    %83 = math.exp %82 : vector<9x64xf32>
    %cst_37 = arith.constant dense<0.000000e+00> : vector<9xf32>
    %84 = vector.multi_reduction <add>, %83, %cst_37 [1] : vector<9x64xf32> to vector<9xf32>
    %85 = vector.shape_cast %84 : vector<9xf32> to vector<9x1xf32>
    %86 = tpu.reciprocal %85 {approx = true} : vector<9x1xf32> -> vector<9x1xf32>
    %87 = vector.broadcast %86 : vector<9x1xf32> to vector<9x64xf32>
    %88 = arith.mulf %83, %87 : vector<9x64xf32>
    %cst_38 = arith.constant dense<0.000000e+00> : vector<9x8xf32>
    %89 = tpu.matmul %88, %71, %cst_38 {dimension_numbers = #tpu.dot_dimension_numbers<[1], [0], [0], [1], [0, 0, 1, 1], [], []>} : vector<9x64xf32>, vector<64x8xf32>, vector<9x8xf32> -> vector<9x8xf32>
    %cst_39 = arith.constant 0.353553385 : f32
    %90 = vector.broadcast %cst_39 : f32 to vector<64x8xf32>
    %91 = arith.mulf %69, %90 : vector<64x8xf32>
    %cst_40 = arith.constant dense<0.000000e+00> : vector<64x9xf32>
    %92 = tpu.matmul %91, %72, %cst_40 {dimension_numbers = #tpu.dot_dimension_numbers<[1], [1], [0], [0], [0, 0, 1, 0], [], []>} : vector<64x8xf32>, vector<9x8xf32>, vector<64x9xf32> -> vector<64x9xf32>
    %c1_41 = arith.constant 1 : index
    %c0_42 = arith.constant 0 : index
    %c0_43 = arith.constant 0 : index
    %93 = vector.load %arg7[%c1_41, %c0_42, %c0_43] : memref<4x64x9xf32, #tpu.memory_space<vmem>>, vector<1x64x9xf32>
    %94 = vector.shape_cast %93 : vector<1x64x9xf32> to vector<64x9xf32>
    %95 = arith.addf %92, %94 : vector<64x9xf32>
    %cst_44 = arith.constant dense<0xFF800000> : vector<64xf32>
    %96 = vector.multi_reduction <maximumf>, %95, %cst_44 [1] : vector<64x9xf32> to vector<64xf32>
    %97 = vector.shape_cast %96 : vector<64xf32> to vector<64x1xf32>
    %98 = vector.broadcast %97 : vector<64x1xf32> to vector<64x9xf32>
    %99 = arith.subf %95, %98 : vector<64x9xf32>
    %100 = math.exp %99 : vector<64x9xf32>
    %cst_45 = arith.constant dense<0.000000e+00> : vector<64xf32>
    %101 = vector.multi_reduction <add>, %100, %cst_45 [1] : vector<64x9xf32> to vector<64xf32>
    %102 = vector.shape_cast %101 : vector<64xf32> to vector<64x1xf32>
    %103 = tpu.reciprocal %102 {approx = true} : vector<64x1xf32> -> vector<64x1xf32>
    %104 = vector.broadcast %103 : vector<64x1xf32> to vector<64x9xf32>
    %105 = arith.mulf %100, %104 : vector<64x9xf32>
    %cst_46 = arith.constant dense<0.000000e+00> : vector<64x8xf32>
    %106 = tpu.matmul %105, %89, %cst_46 {dimension_numbers = #tpu.dot_dimension_numbers<[1], [0], [0], [1], [0, 0, 1, 1], [], []>} : vector<64x9xf32>, vector<9x8xf32>, vector<64x8xf32> -> vector<64x8xf32>
    %107 = vector.extract_strided_slice %26 {offsets = [0, 16], sizes = [64, 8], strides = [1, 1]} : vector<64x32xf32> to vector<64x8xf32>
    %108 = vector.extract_strided_slice %27 {offsets = [0, 16], sizes = [64, 8], strides = [1, 1]} : vector<64x32xf32> to vector<64x8xf32>
    %109 = vector.extract_strided_slice %28 {offsets = [0, 16], sizes = [64, 8], strides = [1, 1]} : vector<64x32xf32> to vector<64x8xf32>
    %110 = vector.extract_strided_slice %30 {offsets = [0, 16], sizes = [9, 8], strides = [1, 1]} : vector<9x32xf32> to vector<9x8xf32>
    %cst_47 = arith.constant 0.353553385 : f32
    %111 = vector.broadcast %cst_47 : f32 to vector<9x8xf32>
    %112 = arith.mulf %110, %111 : vector<9x8xf32>
    %cst_48 = arith.constant dense<0.000000e+00> : vector<9x64xf32>
    %113 = tpu.matmul %112, %108, %cst_48 {dimension_numbers = #tpu.dot_dimension_numbers<[1], [1], [0], [0], [0, 0, 1, 0], [], []>} : vector<9x8xf32>, vector<64x8xf32>, vector<9x64xf32> -> vector<9x64xf32>
    %c2 = arith.constant 2 : index
    %c0_49 = arith.constant 0 : index
    %c0_50 = arith.constant 0 : index
    %114 = vector.load %arg6[%c2, %c0_49, %c0_50] : memref<4x9x64xf32, #tpu.memory_space<vmem>>, vector<1x9x64xf32>
    %115 = vector.shape_cast %114 : vector<1x9x64xf32> to vector<9x64xf32>
    %116 = arith.addf %113, %115 : vector<9x64xf32>
    %cst_51 = arith.constant dense<0xFF800000> : vector<9xf32>
    %117 = vector.multi_reduction <maximumf>, %116, %cst_51 [1] : vector<9x64xf32> to vector<9xf32>
    %118 = vector.shape_cast %117 : vector<9xf32> to vector<9x1xf32>
    %119 = vector.broadcast %118 : vector<9x1xf32> to vector<9x64xf32>
    %120 = arith.subf %116, %119 : vector<9x64xf32>
    %121 = math.exp %120 : vector<9x64xf32>
    %cst_52 = arith.constant dense<0.000000e+00> : vector<9xf32>
    %122 = vector.multi_reduction <add>, %121, %cst_52 [1] : vector<9x64xf32> to vector<9xf32>
    %123 = vector.shape_cast %122 : vector<9xf32> to vector<9x1xf32>
    %124 = tpu.reciprocal %123 {approx = true} : vector<9x1xf32> -> vector<9x1xf32>
    %125 = vector.broadcast %124 : vector<9x1xf32> to vector<9x64xf32>
    %126 = arith.mulf %121, %125 : vector<9x64xf32>
    %cst_53 = arith.constant dense<0.000000e+00> : vector<9x8xf32>
    %127 = tpu.matmul %126, %109, %cst_53 {dimension_numbers = #tpu.dot_dimension_numbers<[1], [0], [0], [1], [0, 0, 1, 1], [], []>} : vector<9x64xf32>, vector<64x8xf32>, vector<9x8xf32> -> vector<9x8xf32>
    %cst_54 = arith.constant 0.353553385 : f32
    %128 = vector.broadcast %cst_54 : f32 to vector<64x8xf32>
    %129 = arith.mulf %107, %128 : vector<64x8xf32>
    %cst_55 = arith.constant dense<0.000000e+00> : vector<64x9xf32>
    %130 = tpu.matmul %129, %110, %cst_55 {dimension_numbers = #tpu.dot_dimension_numbers<[1], [1], [0], [0], [0, 0, 1, 0], [], []>} : vector<64x8xf32>, vector<9x8xf32>, vector<64x9xf32> -> vector<64x9xf32>
    %c2_56 = arith.constant 2 : index
    %c0_57 = arith.constant 0 : index
    %c0_58 = arith.constant 0 : index
    %131 = vector.load %arg7[%c2_56, %c0_57, %c0_58] : memref<4x64x9xf32, #tpu.memory_space<vmem>>, vector<1x64x9xf32>
    %132 = vector.shape_cast %131 : vector<1x64x9xf32> to vector<64x9xf32>
    %133 = arith.addf %130, %132 : vector<64x9xf32>
    %cst_59 = arith.constant dense<0xFF800000> : vector<64xf32>
    %134 = vector.multi_reduction <maximumf>, %133, %cst_59 [1] : vector<64x9xf32> to vector<64xf32>
    %135 = vector.shape_cast %134 : vector<64xf32> to vector<64x1xf32>
    %136 = vector.broadcast %135 : vector<64x1xf32> to vector<64x9xf32>
    %137 = arith.subf %133, %136 : vector<64x9xf32>
    %138 = math.exp %137 : vector<64x9xf32>
    %cst_60 = arith.constant dense<0.000000e+00> : vector<64xf32>
    %139 = vector.multi_reduction <add>, %138, %cst_60 [1] : vector<64x9xf32> to vector<64xf32>
    %140 = vector.shape_cast %139 : vector<64xf32> to vector<64x1xf32>
    %141 = tpu.reciprocal %140 {approx = true} : vector<64x1xf32> -> vector<64x1xf32>
    %142 = vector.broadcast %141 : vector<64x1xf32> to vector<64x9xf32>
    %143 = arith.mulf %138, %142 : vector<64x9xf32>
    %cst_61 = arith.constant dense<0.000000e+00> : vector<64x8xf32>
    %144 = tpu.matmul %143, %127, %cst_61 {dimension_numbers = #tpu.dot_dimension_numbers<[1], [0], [0], [1], [0, 0, 1, 1], [], []>} : vector<64x9xf32>, vector<9x8xf32>, vector<64x8xf32> -> vector<64x8xf32>
    %145 = vector.extract_strided_slice %26 {offsets = [0, 24], sizes = [64, 8], strides = [1, 1]} : vector<64x32xf32> to vector<64x8xf32>
    %146 = vector.extract_strided_slice %27 {offsets = [0, 24], sizes = [64, 8], strides = [1, 1]} : vector<64x32xf32> to vector<64x8xf32>
    %147 = vector.extract_strided_slice %28 {offsets = [0, 24], sizes = [64, 8], strides = [1, 1]} : vector<64x32xf32> to vector<64x8xf32>
    %148 = vector.extract_strided_slice %30 {offsets = [0, 24], sizes = [9, 8], strides = [1, 1]} : vector<9x32xf32> to vector<9x8xf32>
    %cst_62 = arith.constant 0.353553385 : f32
    %149 = vector.broadcast %cst_62 : f32 to vector<9x8xf32>
    %150 = arith.mulf %148, %149 : vector<9x8xf32>
    %cst_63 = arith.constant dense<0.000000e+00> : vector<9x64xf32>
    %151 = tpu.matmul %150, %146, %cst_63 {dimension_numbers = #tpu.dot_dimension_numbers<[1], [1], [0], [0], [0, 0, 1, 0], [], []>} : vector<9x8xf32>, vector<64x8xf32>, vector<9x64xf32> -> vector<9x64xf32>
    %c3 = arith.constant 3 : index
    %c0_64 = arith.constant 0 : index
    %c0_65 = arith.constant 0 : index
    %152 = vector.load %arg6[%c3, %c0_64, %c0_65] : memref<4x9x64xf32, #tpu.memory_space<vmem>>, vector<1x9x64xf32>
    %153 = vector.shape_cast %152 : vector<1x9x64xf32> to vector<9x64xf32>
    %154 = arith.addf %151, %153 : vector<9x64xf32>
    %cst_66 = arith.constant dense<0xFF800000> : vector<9xf32>
    %155 = vector.multi_reduction <maximumf>, %154, %cst_66 [1] : vector<9x64xf32> to vector<9xf32>
    %156 = vector.shape_cast %155 : vector<9xf32> to vector<9x1xf32>
    %157 = vector.broadcast %156 : vector<9x1xf32> to vector<9x64xf32>
    %158 = arith.subf %154, %157 : vector<9x64xf32>
    %159 = math.exp %158 : vector<9x64xf32>
    %cst_67 = arith.constant dense<0.000000e+00> : vector<9xf32>
    %160 = vector.multi_reduction <add>, %159, %cst_67 [1] : vector<9x64xf32> to vector<9xf32>
    %161 = vector.shape_cast %160 : vector<9xf32> to vector<9x1xf32>
    %162 = tpu.reciprocal %161 {approx = true} : vector<9x1xf32> -> vector<9x1xf32>
    %163 = vector.broadcast %162 : vector<9x1xf32> to vector<9x64xf32>
    %164 = arith.mulf %159, %163 : vector<9x64xf32>
    %cst_68 = arith.constant dense<0.000000e+00> : vector<9x8xf32>
    %165 = tpu.matmul %164, %147, %cst_68 {dimension_numbers = #tpu.dot_dimension_numbers<[1], [0], [0], [1], [0, 0, 1, 1], [], []>} : vector<9x64xf32>, vector<64x8xf32>, vector<9x8xf32> -> vector<9x8xf32>
    %cst_69 = arith.constant 0.353553385 : f32
    %166 = vector.broadcast %cst_69 : f32 to vector<64x8xf32>
    %167 = arith.mulf %145, %166 : vector<64x8xf32>
    %cst_70 = arith.constant dense<0.000000e+00> : vector<64x9xf32>
    %168 = tpu.matmul %167, %148, %cst_70 {dimension_numbers = #tpu.dot_dimension_numbers<[1], [1], [0], [0], [0, 0, 1, 0], [], []>} : vector<64x8xf32>, vector<9x8xf32>, vector<64x9xf32> -> vector<64x9xf32>
    %c3_71 = arith.constant 3 : index
    %c0_72 = arith.constant 0 : index
    %c0_73 = arith.constant 0 : index
    %169 = vector.load %arg7[%c3_71, %c0_72, %c0_73] : memref<4x64x9xf32, #tpu.memory_space<vmem>>, vector<1x64x9xf32>
    %170 = vector.shape_cast %169 : vector<1x64x9xf32> to vector<64x9xf32>
    %171 = arith.addf %168, %170 : vector<64x9xf32>
    %cst_74 = arith.constant dense<0xFF800000> : vector<64xf32>
    %172 = vector.multi_reduction <maximumf>, %171, %cst_74 [1] : vector<64x9xf32> to vector<64xf32>
    %173 = vector.shape_cast %172 : vector<64xf32> to vector<64x1xf32>
    %174 = vector.broadcast %173 : vector<64x1xf32> to vector<64x9xf32>
    %175 = arith.subf %171, %174 : vector<64x9xf32>
    %176 = math.exp %175 : vector<64x9xf32>
    %cst_75 = arith.constant dense<0.000000e+00> : vector<64xf32>
    %177 = vector.multi_reduction <add>, %176, %cst_75 [1] : vector<64x9xf32> to vector<64xf32>
    %178 = vector.shape_cast %177 : vector<64xf32> to vector<64x1xf32>
    %179 = tpu.reciprocal %178 {approx = true} : vector<64x1xf32> -> vector<64x1xf32>
    %180 = vector.broadcast %179 : vector<64x1xf32> to vector<64x9xf32>
    %181 = arith.mulf %176, %180 : vector<64x9xf32>
    %cst_76 = arith.constant dense<0.000000e+00> : vector<64x8xf32>
    %182 = tpu.matmul %181, %165, %cst_76 {dimension_numbers = #tpu.dot_dimension_numbers<[1], [0], [0], [1], [0, 0, 1, 1], [], []>} : vector<64x9xf32>, vector<9x8xf32>, vector<64x8xf32> -> vector<64x8xf32>
    %183 = tpu.concatenate %68, %106, %144, %182 in 1 : vector<64x8xf32>, vector<64x8xf32>, vector<64x8xf32>, vector<64x8xf32> -> vector<64x32xf32>
    %c0_77 = arith.constant 0 : index
    %c0_78 = arith.constant 0 : index
    %184 = vector.load %arg9[%c0_77, %c0_78] : memref<9x32xf32, #tpu.memory_space<vmem>>, vector<9x32xf32>
    %c0_79 = arith.constant 0 : index
    %c0_80 = arith.constant 0 : index
    %c0_81 = arith.constant 0 : index
    %185 = vector.load %arg8[%c0_79, %c0_80, %c0_81] : memref<9x64x64xf32, #tpu.memory_space<vmem>>, vector<1x64x64xf32>
    %186 = vector.shape_cast %185 : vector<1x64x64xf32> to vector<64x64xf32>
    %cst_82 = arith.constant dense<0.000000e+00> : vector<64x32xf32>
    %187 = tpu.matmul %186, %28, %cst_82 {dimension_numbers = #tpu.dot_dimension_numbers<[1], [0], [0], [1], [0, 0, 1, 1], [], []>} : vector<64x64xf32>, vector<64x32xf32>, vector<64x32xf32> -> vector<64x32xf32>
    %188 = vector.extract_strided_slice %184 {offsets = [0, 0], sizes = [1, 32], strides = [1, 1]} : vector<9x32xf32> to vector<1x32xf32>
    %189 = vector.broadcast %188 : vector<1x32xf32> to vector<64x32xf32>
    %190 = arith.mulf %187, %189 : vector<64x32xf32>
    %c1_83 = arith.constant 1 : index
    %c0_84 = arith.constant 0 : index
    %c0_85 = arith.constant 0 : index
    %191 = vector.load %arg8[%c1_83, %c0_84, %c0_85] : memref<9x64x64xf32, #tpu.memory_space<vmem>>, vector<1x64x64xf32>
    %192 = vector.shape_cast %191 : vector<1x64x64xf32> to vector<64x64xf32>
    %cst_86 = arith.constant dense<0.000000e+00> : vector<64x32xf32>
    %193 = tpu.matmul %192, %28, %cst_86 {dimension_numbers = #tpu.dot_dimension_numbers<[1], [0], [0], [1], [0, 0, 1, 1], [], []>} : vector<64x64xf32>, vector<64x32xf32>, vector<64x32xf32> -> vector<64x32xf32>
    %194 = vector.extract_strided_slice %184 {offsets = [1, 0], sizes = [1, 32], strides = [1, 1]} : vector<9x32xf32> to vector<1x32xf32>
    %195 = vector.broadcast %194 : vector<1x32xf32> to vector<64x32xf32>
    %196 = arith.mulf %193, %195 : vector<64x32xf32>
    %197 = arith.addf %190, %196 : vector<64x32xf32>
    %c2_87 = arith.constant 2 : index
    %c0_88 = arith.constant 0 : index
    %c0_89 = arith.constant 0 : index
    %198 = vector.load %arg8[%c2_87, %c0_88, %c0_89] : memref<9x64x64xf32, #tpu.memory_space<vmem>>, vector<1x64x64xf32>
    %199 = vector.shape_cast %198 : vector<1x64x64xf32> to vector<64x64xf32>
    %cst_90 = arith.constant dense<0.000000e+00> : vector<64x32xf32>
    %200 = tpu.matmul %199, %28, %cst_90 {dimension_numbers = #tpu.dot_dimension_numbers<[1], [0], [0], [1], [0, 0, 1, 1], [], []>} : vector<64x64xf32>, vector<64x32xf32>, vector<64x32xf32> -> vector<64x32xf32>
    %201 = vector.extract_strided_slice %184 {offsets = [2, 0], sizes = [1, 32], strides = [1, 1]} : vector<9x32xf32> to vector<1x32xf32>
    %202 = vector.broadcast %201 : vector<1x32xf32> to vector<64x32xf32>
    %203 = arith.mulf %200, %202 : vector<64x32xf32>
    %204 = arith.addf %197, %203 : vector<64x32xf32>
    %c3_91 = arith.constant 3 : index
    %c0_92 = arith.constant 0 : index
    %c0_93 = arith.constant 0 : index
    %205 = vector.load %arg8[%c3_91, %c0_92, %c0_93] : memref<9x64x64xf32, #tpu.memory_space<vmem>>, vector<1x64x64xf32>
    %206 = vector.shape_cast %205 : vector<1x64x64xf32> to vector<64x64xf32>
    %cst_94 = arith.constant dense<0.000000e+00> : vector<64x32xf32>
    %207 = tpu.matmul %206, %28, %cst_94 {dimension_numbers = #tpu.dot_dimension_numbers<[1], [0], [0], [1], [0, 0, 1, 1], [], []>} : vector<64x64xf32>, vector<64x32xf32>, vector<64x32xf32> -> vector<64x32xf32>
    %208 = vector.extract_strided_slice %184 {offsets = [3, 0], sizes = [1, 32], strides = [1, 1]} : vector<9x32xf32> to vector<1x32xf32>
    %209 = vector.broadcast %208 : vector<1x32xf32> to vector<64x32xf32>
    %210 = arith.mulf %207, %209 : vector<64x32xf32>
    %211 = arith.addf %204, %210 : vector<64x32xf32>
    %c4 = arith.constant 4 : index
    %c0_95 = arith.constant 0 : index
    %c0_96 = arith.constant 0 : index
    %212 = vector.load %arg8[%c4, %c0_95, %c0_96] : memref<9x64x64xf32, #tpu.memory_space<vmem>>, vector<1x64x64xf32>
    %213 = vector.shape_cast %212 : vector<1x64x64xf32> to vector<64x64xf32>
    %cst_97 = arith.constant dense<0.000000e+00> : vector<64x32xf32>
    %214 = tpu.matmul %213, %28, %cst_97 {dimension_numbers = #tpu.dot_dimension_numbers<[1], [0], [0], [1], [0, 0, 1, 1], [], []>} : vector<64x64xf32>, vector<64x32xf32>, vector<64x32xf32> -> vector<64x32xf32>
    %215 = vector.extract_strided_slice %184 {offsets = [4, 0], sizes = [1, 32], strides = [1, 1]} : vector<9x32xf32> to vector<1x32xf32>
    %216 = vector.broadcast %215 : vector<1x32xf32> to vector<64x32xf32>
    %217 = arith.mulf %214, %216 : vector<64x32xf32>
    %218 = arith.addf %211, %217 : vector<64x32xf32>
    %c5 = arith.constant 5 : index
    %c0_98 = arith.constant 0 : index
    %c0_99 = arith.constant 0 : index
    %219 = vector.load %arg8[%c5, %c0_98, %c0_99] : memref<9x64x64xf32, #tpu.memory_space<vmem>>, vector<1x64x64xf32>
    %220 = vector.shape_cast %219 : vector<1x64x64xf32> to vector<64x64xf32>
    %cst_100 = arith.constant dense<0.000000e+00> : vector<64x32xf32>
    %221 = tpu.matmul %220, %28, %cst_100 {dimension_numbers = #tpu.dot_dimension_numbers<[1], [0], [0], [1], [0, 0, 1, 1], [], []>} : vector<64x64xf32>, vector<64x32xf32>, vector<64x32xf32> -> vector<64x32xf32>
    %222 = vector.extract_strided_slice %184 {offsets = [5, 0], sizes = [1, 32], strides = [1, 1]} : vector<9x32xf32> to vector<1x32xf32>
    %223 = vector.broadcast %222 : vector<1x32xf32> to vector<64x32xf32>
    %224 = arith.mulf %221, %223 : vector<64x32xf32>
    %225 = arith.addf %218, %224 : vector<64x32xf32>
    %c6 = arith.constant 6 : index
    %c0_101 = arith.constant 0 : index
    %c0_102 = arith.constant 0 : index
    %226 = vector.load %arg8[%c6, %c0_101, %c0_102] : memref<9x64x64xf32, #tpu.memory_space<vmem>>, vector<1x64x64xf32>
    %227 = vector.shape_cast %226 : vector<1x64x64xf32> to vector<64x64xf32>
    %cst_103 = arith.constant dense<0.000000e+00> : vector<64x32xf32>
    %228 = tpu.matmul %227, %28, %cst_103 {dimension_numbers = #tpu.dot_dimension_numbers<[1], [0], [0], [1], [0, 0, 1, 1], [], []>} : vector<64x64xf32>, vector<64x32xf32>, vector<64x32xf32> -> vector<64x32xf32>
    %229 = vector.extract_strided_slice %184 {offsets = [6, 0], sizes = [1, 32], strides = [1, 1]} : vector<9x32xf32> to vector<1x32xf32>
    %230 = vector.broadcast %229 : vector<1x32xf32> to vector<64x32xf32>
    %231 = arith.mulf %228, %230 : vector<64x32xf32>
    %232 = arith.addf %225, %231 : vector<64x32xf32>
    %c7 = arith.constant 7 : index
    %c0_104 = arith.constant 0 : index
    %c0_105 = arith.constant 0 : index
    %233 = vector.load %arg8[%c7, %c0_104, %c0_105] : memref<9x64x64xf32, #tpu.memory_space<vmem>>, vector<1x64x64xf32>
    %234 = vector.shape_cast %233 : vector<1x64x64xf32> to vector<64x64xf32>
    %cst_106 = arith.constant dense<0.000000e+00> : vector<64x32xf32>
    %235 = tpu.matmul %234, %28, %cst_106 {dimension_numbers = #tpu.dot_dimension_numbers<[1], [0], [0], [1], [0, 0, 1, 1], [], []>} : vector<64x64xf32>, vector<64x32xf32>, vector<64x32xf32> -> vector<64x32xf32>
    %236 = vector.extract_strided_slice %184 {offsets = [7, 0], sizes = [1, 32], strides = [1, 1]} : vector<9x32xf32> to vector<1x32xf32>
    %237 = vector.broadcast %236 : vector<1x32xf32> to vector<64x32xf32>
    %238 = arith.mulf %235, %237 : vector<64x32xf32>
    %239 = arith.addf %232, %238 : vector<64x32xf32>
    %c8 = arith.constant 8 : index
    %c0_107 = arith.constant 0 : index
    %c0_108 = arith.constant 0 : index
    %240 = vector.load %arg8[%c8, %c0_107, %c0_108] : memref<9x64x64xf32, #tpu.memory_space<vmem>>, vector<1x64x64xf32>
    %241 = vector.shape_cast %240 : vector<1x64x64xf32> to vector<64x64xf32>
    %cst_109 = arith.constant dense<0.000000e+00> : vector<64x32xf32>
    %242 = tpu.matmul %241, %28, %cst_109 {dimension_numbers = #tpu.dot_dimension_numbers<[1], [0], [0], [1], [0, 0, 1, 1], [], []>} : vector<64x64xf32>, vector<64x32xf32>, vector<64x32xf32> -> vector<64x32xf32>
    %243 = vector.extract_strided_slice %184 {offsets = [8, 0], sizes = [1, 32], strides = [1, 1]} : vector<9x32xf32> to vector<1x32xf32>
    %244 = vector.broadcast %243 : vector<1x32xf32> to vector<64x32xf32>
    %245 = arith.mulf %242, %244 : vector<64x32xf32>
    %246 = arith.addf %239, %245 : vector<64x32xf32>
    %c0_110 = arith.constant 0 : index
    %c0_111 = arith.constant 0 : index
    %247 = vector.load %arg10[%c0_110, %c0_111] : memref<1x32xf32, #tpu.memory_space<vmem>>, vector<1x32xf32>
    %248 = vector.broadcast %247 : vector<1x32xf32> to vector<64x32xf32>
    %249 = arith.addf %246, %248 : vector<64x32xf32>
    %250 = arith.addf %183, %249 : vector<64x32xf32>
    %c0_112 = arith.constant 0 : index
    %c0_113 = arith.constant 0 : index
    %251 = vector.load %arg11[%c0_112, %c0_113] : memref<32x32xf32, #tpu.memory_space<vmem>>, vector<32x32xf32>
    %cst_114 = arith.constant dense<0.000000e+00> : vector<64x32xf32>
    %252 = tpu.matmul %250, %251, %cst_114 {dimension_numbers = #tpu.dot_dimension_numbers<[1], [0], [0], [1], [0, 0, 1, 1], [], []>} : vector<64x32xf32>, vector<32x32xf32>, vector<64x32xf32> -> vector<64x32xf32>
    %c0_115 = arith.constant 0 : index
    %c0_116 = arith.constant 0 : index
    %253 = vector.load %arg12[%c0_115, %c0_116] : memref<1x32xf32, #tpu.memory_space<vmem>>, vector<1x32xf32>
    %254 = vector.broadcast %253 : vector<1x32xf32> to vector<64x32xf32>
    %255 = arith.addf %252, %254 : vector<64x32xf32>
    %256 = arith.addf %1, %255 : vector<64x32xf32>
    %c0_117 = arith.constant 0 : index
    %c0_118 = arith.constant 0 : index
    %257 = vector.load %arg13[%c0_117, %c0_118] : memref<1x32xf32, #tpu.memory_space<vmem>>, vector<1x32xf32>
    %c0_119 = arith.constant 0 : index
    %c0_120 = arith.constant 0 : index
    %258 = vector.load %arg14[%c0_119, %c0_120] : memref<1x32xf32, #tpu.memory_space<vmem>>, vector<1x32xf32>
    %cst_121 = arith.constant dense<0.000000e+00> : vector<64xf32>
    %259 = vector.multi_reduction <add>, %256, %cst_121 [1] : vector<64x32xf32> to vector<64xf32>
    %260 = vector.shape_cast %259 : vector<64xf32> to vector<64x1xf32>
    %cst_122 = arith.constant 3.200000e+01 : f32
    %261 = vector.broadcast %cst_122 : f32 to vector<64x1xf32>
    %262 = arith.divf %260, %261 : vector<64x1xf32>
    %263 = vector.broadcast %262 : vector<64x1xf32> to vector<64x32xf32>
    %264 = arith.subf %256, %263 : vector<64x32xf32>
    %265 = arith.mulf %264, %264 : vector<64x32xf32>
    %cst_123 = arith.constant dense<0.000000e+00> : vector<64xf32>
    %266 = vector.multi_reduction <add>, %265, %cst_123 [1] : vector<64x32xf32> to vector<64xf32>
    %267 = vector.shape_cast %266 : vector<64xf32> to vector<64x1xf32>
    %cst_124 = arith.constant 3.200000e+01 : f32
    %268 = vector.broadcast %cst_124 : f32 to vector<64x1xf32>
    %269 = arith.divf %267, %268 : vector<64x1xf32>
    %cst_125 = arith.constant 9.99999974E-6 : f32
    %270 = vector.broadcast %cst_125 : f32 to vector<64x1xf32>
    %271 = arith.addf %269, %270 : vector<64x1xf32>
    %272 = math.rsqrt %271 : vector<64x1xf32>
    %273 = vector.broadcast %272 : vector<64x1xf32> to vector<64x32xf32>
    %274 = arith.mulf %264, %273 : vector<64x32xf32>
    %275 = vector.broadcast %257 : vector<1x32xf32> to vector<64x32xf32>
    %276 = arith.mulf %274, %275 : vector<64x32xf32>
    %277 = vector.broadcast %258 : vector<1x32xf32> to vector<64x32xf32>
    %278 = arith.addf %276, %277 : vector<64x32xf32>
    %c0_126 = arith.constant 0 : index
    %c0_127 = arith.constant 0 : index
    %279 = vector.load %arg15[%c0_126, %c0_127] : memref<32x128xf32, #tpu.memory_space<vmem>>, vector<32x128xf32>
    %cst_128 = arith.constant dense<0.000000e+00> : vector<64x128xf32>
    %280 = tpu.matmul %278, %279, %cst_128 {dimension_numbers = #tpu.dot_dimension_numbers<[1], [0], [0], [1], [0, 0, 1, 1], [], []>} : vector<64x32xf32>, vector<32x128xf32>, vector<64x128xf32> -> vector<64x128xf32>
    %c0_129 = arith.constant 0 : index
    %c0_130 = arith.constant 0 : index
    %281 = vector.load %arg16[%c0_129, %c0_130] : memref<1x128xf32, #tpu.memory_space<vmem>>, vector<1x128xf32>
    %282 = vector.broadcast %281 : vector<1x128xf32> to vector<64x128xf32>
    %283 = arith.addf %280, %282 : vector<64x128xf32>
    %cst_131 = arith.constant 5.000000e-01 : f32
    %284 = vector.broadcast %cst_131 : f32 to vector<64x128xf32>
    %285 = arith.mulf %284, %283 : vector<64x128xf32>
    %286 = arith.mulf %283, %283 : vector<64x128xf32>
    %287 = arith.mulf %286, %283 : vector<64x128xf32>
    %cst_132 = arith.constant 4.471500e-02 : f32
    %288 = vector.broadcast %cst_132 : f32 to vector<64x128xf32>
    %289 = arith.mulf %288, %287 : vector<64x128xf32>
    %290 = arith.addf %283, %289 : vector<64x128xf32>
    %cst_133 = arith.constant 0.797884583 : f32
    %291 = vector.broadcast %cst_133 : f32 to vector<64x128xf32>
    %292 = arith.mulf %291, %290 : vector<64x128xf32>
    %293 = math.tanh %292 : vector<64x128xf32>
    %cst_134 = arith.constant 1.000000e+00 : f32
    %294 = vector.broadcast %cst_134 : f32 to vector<64x128xf32>
    %295 = arith.addf %294, %293 : vector<64x128xf32>
    %296 = arith.mulf %285, %295 : vector<64x128xf32>
    %c0_135 = arith.constant 0 : index
    %c0_136 = arith.constant 0 : index
    %297 = vector.load %arg17[%c0_135, %c0_136] : memref<128x32xf32, #tpu.memory_space<vmem>>, vector<128x32xf32>
    %cst_137 = arith.constant dense<0.000000e+00> : vector<64x32xf32>
    %298 = tpu.matmul %296, %297, %cst_137 {dimension_numbers = #tpu.dot_dimension_numbers<[1], [0], [0], [1], [0, 0, 1, 1], [], []>} : vector<64x128xf32>, vector<128x32xf32>, vector<64x32xf32> -> vector<64x32xf32>
    %c0_138 = arith.constant 0 : index
    %c0_139 = arith.constant 0 : index
    %299 = vector.load %arg18[%c0_138, %c0_139] : memref<1x32xf32, #tpu.memory_space<vmem>>, vector<1x32xf32>
    %300 = vector.broadcast %299 : vector<1x32xf32> to vector<64x32xf32>
    %301 = arith.addf %298, %300 : vector<64x32xf32>
    %302 = arith.addf %256, %301 : vector<64x32xf32>
    %c0_140 = arith.constant 0 : index
    %c0_141 = arith.constant 0 : index
    %c0_142 = arith.constant 0 : index
    %303 = vector.load %arg19[%c0_140, %c0_141, %c0_142] : memref<1x64x32xf32, #tpu.memory_space<vmem>>, vector<1x64x32xf32>
    %304 = vector.shape_cast %303 : vector<1x64x32xf32> to vector<64x32xf32>
    %305 = vector.shape_cast %302 : vector<64x32xf32> to vector<1x64x32xf32>
    tpu.vector_store %arg19[%c0_140, %c0_141, %c0_142], %305 {strides = array<i32>} : memref<1x64x32xf32, #tpu.memory_space<vmem>>, vector<1x64x32xf32>,
    return
  }
  func.func @transform_0(%arg0: i32) -> (i32, i32, i32) {
    %c0_i32 = arith.constant 0 : i32
    %c0_i32_0 = arith.constant 0 : i32
    %c0_i32_1 = arith.constant 0 : i32
    return %arg0, %c0_i32, %c0_i32_0 : i32, i32, i32
  }
  func.func @transform_1(%arg0: i32) -> (i32, i32) {
    %c0_i32 = arith.constant 0 : i32
    %c0_i32_0 = arith.constant 0 : i32
    %c0_i32_1 = arith.constant 0 : i32
    return %c0_i32, %c0_i32_0 : i32, i32
  }
  func.func @transform_2(%arg0: i32) -> (i32, i32) {
    %c0_i32 = arith.constant 0 : i32
    %c0_i32_0 = arith.constant 0 : i32
    %c0_i32_1 = arith.constant 0 : i32
    return %c0_i32, %c0_i32_0 : i32, i32
  }
  func.func @transform_3(%arg0: i32) -> (i32, i32) {
    %c0_i32 = arith.constant 0 : i32
    %c0_i32_0 = arith.constant 0 : i32
    %c0_i32_1 = arith.constant 0 : i32
    return %c0_i32, %c0_i32_0 : i32, i32
  }
  func.func @transform_4(%arg0: i32) -> (i32, i32) {
    %c0_i32 = arith.constant 0 : i32
    %c0_i32_0 = arith.constant 0 : i32
    %c0_i32_1 = arith.constant 0 : i32
    return %c0_i32, %c0_i32_0 : i32, i32
  }
  func.func @transform_5(%arg0: i32) -> (i32, i32, i32) {
    %c0_i32 = arith.constant 0 : i32
    %c0_i32_0 = arith.constant 0 : i32
    %c0_i32_1 = arith.constant 0 : i32
    %c0_i32_2 = arith.constant 0 : i32
    return %c0_i32, %c0_i32_0, %c0_i32_1 : i32, i32, i32
  }
  func.func @transform_6(%arg0: i32) -> (i32, i32, i32) {
    %c0_i32 = arith.constant 0 : i32
    %c0_i32_0 = arith.constant 0 : i32
    %c0_i32_1 = arith.constant 0 : i32
    %c0_i32_2 = arith.constant 0 : i32
    return %c0_i32, %c0_i32_0, %c0_i32_1 : i32, i32, i32
  }
  func.func @transform_7(%arg0: i32) -> (i32, i32, i32) {
    %c0_i32 = arith.constant 0 : i32
    %c0_i32_0 = arith.constant 0 : i32
    %c0_i32_1 = arith.constant 0 : i32
    %c0_i32_2 = arith.constant 0 : i32
    return %c0_i32, %c0_i32_0, %c0_i32_1 : i32, i32, i32
  }
  func.func @transform_8(%arg0: i32) -> (i32, i32) {
    %c0_i32 = arith.constant 0 : i32
    %c0_i32_0 = arith.constant 0 : i32
    %c0_i32_1 = arith.constant 0 : i32
    return %c0_i32, %c0_i32_0 : i32, i32
  }
  func.func @transform_9(%arg0: i32) -> (i32, i32) {
    %c0_i32 = arith.constant 0 : i32
    %c0_i32_0 = arith.constant 0 : i32
    %c0_i32_1 = arith.constant 0 : i32
    return %c0_i32, %c0_i32_0 : i32, i32
  }
  func.func @transform_10(%arg0: i32) -> (i32, i32) {
    %c0_i32 = arith.constant 0 : i32
    %c0_i32_0 = arith.constant 0 : i32
    %c0_i32_1 = arith.constant 0 : i32
    return %c0_i32, %c0_i32_0 : i32, i32
  }
  func.func @transform_11(%arg0: i32) -> (i32, i32) {
    %c0_i32 = arith.constant 0 : i32
    %c0_i32_0 = arith.constant 0 : i32
    %c0_i32_1 = arith.constant 0 : i32
    return %c0_i32, %c0_i32_0 : i32, i32
  }
  func.func @transform_12(%arg0: i32) -> (i32, i32) {
    %c0_i32 = arith.constant 0 : i32
    %c0_i32_0 = arith.constant 0 : i32
    %c0_i32_1 = arith.constant 0 : i32
    return %c0_i32, %c0_i32_0 : i32, i32
  }
  func.func @transform_13(%arg0: i32) -> (i32, i32) {
    %c0_i32 = arith.constant 0 : i32
    %c0_i32_0 = arith.constant 0 : i32
    %c0_i32_1 = arith.constant 0 : i32
    return %c0_i32, %c0_i32_0 : i32, i32
  }
  func.func @transform_14(%arg0: i32) -> (i32, i32) {
    %c0_i32 = arith.constant 0 : i32
    %c0_i32_0 = arith.constant 0 : i32
    %c0_i32_1 = arith.constant 0 : i32
    return %c0_i32, %c0_i32_0 : i32, i32
  }
  func.func @transform_15(%arg0: i32) -> (i32, i32) {
    %c0_i32 = arith.constant 0 : i32
    %c0_i32_0 = arith.constant 0 : i32
    %c0_i32_1 = arith.constant 0 : i32
    return %c0_i32, %c0_i32_0 : i32, i32
  }
  func.func @transform_16(%arg0: i32) -> (i32, i32) {
    %c0_i32 = arith.constant 0 : i32
    %c0_i32_0 = arith.constant 0 : i32
    %c0_i32_1 = arith.constant 0 : i32
    return %c0_i32, %c0_i32_0 : i32, i32
  }
  func.func @transform_17(%arg0: i32) -> (i32, i32) {
    %c0_i32 = arith.constant 0 : i32
    %c0_i32_0 = arith.constant 0 : i32
    %c0_i32_1 = arith.constant 0 : i32
    return %c0_i32, %c0_i32_0 : i32, i32
  }
  func.func @transform_18(%arg0: i32) -> (i32, i32, i32) {
    %c0_i32 = arith.constant 0 : i32
    %c0_i32_0 = arith.constant 0 : i32
    %c0_i32_1 = arith.constant 0 : i32
    return %arg0, %c0_i32, %c0_i32_0 : i32, i32, i32
  }
}

</mosaic_0001>

<bundles_post_ra>
// kernel: tpu_custom_call.1
= control target key start
LH: loop header
LB: loop body
LE: loop exit
PB: predicated region body
PF: predicated region fallthrough
CT: control target
= control target key end

     0   :  { %s6620_s0 = inlined_call_operand.vmem [shape: f32[2,64,32], index: 0, kind: input, shape index: {}]   ;;  %s6621_s1 = inlined_call_operand.vmem [shape: f32[1,32], index: 1, kind: input, shape index: {}]   ;;  %s6622_s2 = inlined_call_operand.vmem [shape: f32[1,32], index: 2, kind: input, shape index: {}]   ;;  %s6623_s3 = inlined_call_operand.vmem [shape: f32[32,96], index: 3, kind: input, shape index: {}]   ;;  %s6624_s4 = inlined_call_operand.vmem [shape: f32[9,64], index: 4, kind: input, shape index: {}]   ;;  %s6625_s5 = inlined_call_operand.vmem [shape: f32[4,9,64], index: 5, kind: input, shape index: {}]   ;;  %s6626_s6 = inlined_call_operand.vmem [shape: f32[4,64,9], index: 6, kind: input, shape index: {}]   ;;  %s6627_s7 = inlined_call_operand.hbm [shape: f32[9,64,64], index: 7, kind: input, shape index: {}]   ;;  %s6628_s8 = inlined_call_operand.vmem [shape: f32[9,32], index: 8, kind: input, shape index: {}]   ;;  %s6629_s9 = inlined_call_operand.vmem [shape: f32[1,32], index: 9, kind: input, shape index: {}]   ;;  %s6630_s10 = inlined_call_operand.vmem [shape: f32[32,32], index: 10, kind: input, shape index: {}]   ;;  %s6631_s11 = inlined_call_operand.vmem [shape: f32[1,32], index: 11, kind: input, shape index: {}]   ;;  %s6632_s12 = inlined_call_operand.vmem [shape: f32[1,32], index: 12, kind: input, shape index: {}]   ;;  %s6633_s13 = inlined_call_operand.vmem [shape: f32[1,32], index: 13, kind: input, shape index: {}]   ;;  %s6634_s14 = inlined_call_operand.vmem [shape: f32[32,128], index: 14, kind: input, shape index: {}]   ;;  %s6635_s15 = inlined_call_operand.vmem [shape: f32[1,128], index: 15, kind: input, shape index: {}]   ;;  %s6636_s16 = inlined_call_operand.vmem [shape: f32[128,32], index: 16, kind: input, shape index: {}]   ;;  %s6637_s17 = inlined_call_operand.vmem [shape: f32[1,32], index: 17, kind: input, shape index: {}]   ;;  %s6638_s18 = inlined_call_operand.vmem [shape: f32[2,64,32], index: 18, kind: output, shape index: {}]  }
   0x1   :  { %6641 = sst [smem:[#allocation13_spill]] %s6620_s0 }
   0x2   :  { %6642 = sst [smem:[#allocation14_spill]] %s6621_s1 }
   0x3   :  { %6643 = sst [smem:[#allocation15_spill]] %s6622_s2 }
   0x4   :  { %23 = vsyncpa [#allocation3], 0  ;;  %s4759_s27 = smov 0  }
   0x5 LB: > { %s472_s30 = sshll.u32 %s6627_s7, 4  ;;  %s3990_s0 = sadd.s32 4294967295, %s4644_s27   ;;  %s4644_s27 = sphi %s4759_s27, %s29_s27   ;;  %s473_s30 = int_to_ptr.hbm [resolvable:$true] %s472_s30 }
   0x6   : > { %p3992_p0 = scmp.ge.s32.totalorder %s4644_s27, 1  ;;  %p443_p1 = scmp.lt.s32.totalorder %s4644_s27, 3 }
   0x7   : > { %p4269_p2 = scmp.eq.s32.totalorder %s3990_s0, 0  ;;  %s4646_s19 = smov [#allocation2]  }
   0x8   : > { %p444_p3 = pnand %p3992_p0, %p443_p1  ;;  %s474_s1 = sshll.u32 %s4646_s19, 4  ;;  %s475_s1 = int_to_ptr.vmem [resolvable:$true] %s474_s1 }
   0x9   : > { %s4647_s20 = smov 128   ;;  %s4648_s21 = smov 8  }
   0xa   : > { %p4265_p4 = pneg %p444_p3  ;;  %528 = sbr.rel (%p444_p3) target bundleno = 3212 (0xc8c), region = 92 }
   0xc   : > { %p4266_p5 = pnand %p4269_p2, %p4265_p4 }
   0xe   : > { %4268 = dma.hbm_to_vmem [thread:$0]  (!%p4266_p5), %s473_s30, 9216, %s475_s1, [#allocation3], %s4647_s20, %s4647_s20, %s4648_s21  }
   0xf   : > { %4639 = dma.done.wait (%p4269_p2), [#allocation3], 9216  }
  0x10   : > { %4641 = vsyncadd (%p4269_p2), [#allocation3], 4294958080  ;;  %p583_p6 = scmp.lt.s32.totalorder %s3990_s0, 1  ;;  %s6644_s24 = sld [smem:[#allocation13_spill]]  ;;  %vm603_vm0 = vcmask 261120   ;;  %v4649_v16 = vmov 32.0  }
  0x11   : > { %4386 = vrcp.f32 %v4649_v16  ;;  %v812_v63 = vld [vmem:[%s6623_s3 + $0x18] sm:$0xff]  ;;  %s6649_s29 = sld [smem:[#allocation15_spill]]  ;;  %s4650_s30 = smov 96  }
  0x12   : > { %s6670_s0 = smov (!%p583_p6, %s3990_s0), 1  ;;  %4257 = vmatpush.msra.mxu1 %v812_v63  ;;  %849 = vmatpush.msra.mxu0 %v812_v63  ;;  %s4651_s2 = smov 64  }
  0x13   : > { %s4255_s22 = sshll.u32 %s6670_s0, 6  ;;  %s4652_s20 = smov 88  }
  0x14   : > { %s4653_s23 = smov 120   ;;  %s4656_s26 = smov 56  }
  0x15   : > { %s4657_s28 = smov 112   ;;  %s4662_s19 = smov 16  }
  0x16   : > { %s4778_s25 = scalar_lea.vmem %s6644_s24, %s4255_s22  ;;  %s6646_s24 = sld [smem:[#allocation14_spill]] }
  0x17   : > { %v599_v0 = vld [vmem:[%s4778_s25 + $0x30] sm:$0xff]  ;;  %v598_v1 = vld [vmem:[%s4778_s25 + $0x28] sm:$0xff]  ;;  %v597_v2 = vld [vmem:[%s4778_s25 + $0x20] sm:$0xff]  ;;  %v4387_v17 = vpop.eup %4386  ;;  %s4663_s1 = smov 24  }
  0x18   : > { %v622_v3 = vsel %vm603_vm0, %v599_v0, 0.0  ;;  %v619_v4 = vsel %vm603_vm0, %v598_v1, 0.0  ;;  %v616_v5 = vsel %vm603_vm0, %v597_v2, 0.0  ;;  %v595_v6 = vld [vmem:[%s4778_s25 + $0x10] sm:$0xff]  ;;  %v594_v7 = vld [vmem:[%s4778_s25 + $0x8] sm:$0xff]  ;;  %v593_v8 = vld [vmem:[%s4778_s25] sm:$0xff]  ;;  %vm633_vm1 = vweird.f32 %v4387_v17 }
  0x19   : > { %623 = vadd.xlane.f32.xlu2 %v622_v3  ;;  %620 = vadd.xlane.f32.xlu1 %v619_v4  ;;  %v610_v9 = vsel %vm603_vm0, %v595_v6, 0.0  ;;  %v607_v10 = vsel %vm603_vm0, %v594_v7, 0.0  ;;  %v604_v11 = vsel %vm603_vm0, %v593_v8, 0.0  ;;  %v596_v12 = vld [vmem:[%s4778_s25 + $0x18] sm:$0xff]  ;;  %v629_v18 = vmul.f32 32.0, %v4387_v17 }
  0x1a   : > { %617 = vadd.xlane.f32.xlu0 %v616_v5  ;;  %v600_v13 = vld [vmem:[%s4778_s25 + $0x38] sm:$0xff]  ;;  %v613_v14 = vsel %vm603_vm0, %v596_v12, 0.0 }
  0x1b   : > { %v625_v15 = vsel %vm603_vm0, %v600_v13, 0.0  ;;  %v630_v19 = vsub.f32 1.0, %v629_v18 }
  0x1d   : > { %v631_v20 = vmul.f32 %v4387_v17, %v630_v19 }
  0x1f   : > { %v632_v21 = vadd.f32 %v4387_v17, %v631_v20 }
  0x21   : > { %611 = vadd.xlane.f32.xlu2 %v610_v9  ;;  %608 = vadd.xlane.f32.xlu1 %v607_v10  ;;  %v4796_v22 = vsel %vm633_vm1, %v4387_v17, %v632_v21 }
  0x22   : > { %605 = vadd.xlane.f32.xlu0 %v604_v11  ;;  %6645 = vst [vmem:[#allocation5_spill] sm:$0xff] %v4796_v22 }
  0x29   : > { %614 = vadd.xlane.f32.xlu1 %v613_v14 }
  0x2a   : > { %626 = vadd.xlane.f32.xlu0 %v625_v15 }
  0x8c   : > { %v624_v23 = vpop.xlane.xlu2 %623  ;;  %v621_v24 = vpop.xlane.xlu1 %620 }
  0x8d   : > { %v640_v25 = vmul.f32 %v4796_v22, %v621_v24  ;;  %v618_v26 = vpop.xlane.xlu0 %617  ;;  %v641_v39 = vmul.f32 %v4796_v22, %v624_v23 }
  0x8e   : > { %v639_v27 = vmul.f32 %v4796_v22, %v618_v26 }
  0x8f   : > { %v4800_v28 = vsub.f32 %v598_v1, %v640_v25  ;;  %v4824_v46 = vsub.f32 %v599_v0, %v641_v39  ;;  %v811_v0 = vld [vmem:[%s6623_s3 + $0x10] sm:$0xff]  ;;  %v810_v1 = vld [vmem:[%s6623_s3 + $0x8] sm:$0xff] }
  0x90   : > { %v4802_v29 = vsub.f32 %v597_v2, %v639_v27  ;;  %4258 = vmatpush.msra.mxu1 %v811_v0  ;;  %850 = vmatpush.msra.mxu0 %v811_v0  ;;  %v809_v2 = vld [vmem:[%s6623_s3] sm:$0xff] }
  0x91   : > { %v656_v30 = vmul.f32 %v4800_v28, %v4800_v28  ;;  %v657_v55 = vmul.f32 %v4824_v46, %v4824_v46 }
  0x92   : > { %v655_v31 = vmul.f32 %v4802_v29, %v4802_v29  ;;  %4259 = vmatpush.msra.mxu1 %v810_v1  ;;  %851 = vmatpush.msra.mxu0 %v810_v1 }
  0x93   : > { %v674_v32 = vsel %vm603_vm0, %v656_v30, 0.0  ;;  %v677_v58 = vsel %vm603_vm0, %v657_v55, 0.0 }
  0x94   : > { %v671_v33 = vsel %vm603_vm0, %v655_v31, 0.0  ;;  %v612_v34 = vpop.xlane.xlu2 %611  ;;  %675 = vadd.xlane.f32.xlu1 %v674_v32  ;;  %v609_v35 = vpop.xlane.xlu1 %608  ;;  %4260 = vmatpush.msra.mxu1 %v809_v2 }
  0x95   : > { %672 = vadd.xlane.f32.xlu2 %v671_v33  ;;  %v637_v36 = vmul.f32 %v4796_v22, %v612_v34  ;;  %v636_v37 = vmul.f32 %v4796_v22, %v609_v35  ;;  %v606_v38 = vpop.xlane.xlu0 %605  ;;  %852 = vmatpush.msra.mxu0 %v809_v2 }
  0x96   : > { %v635_v40 = vmul.f32 %v4796_v22, %v606_v38 }
  0x97   : > { %v4814_v41 = vsub.f32 %v595_v6, %v637_v36  ;;  %v4816_v42 = vsub.f32 %v594_v7, %v636_v37 }
  0x98   : > { %v4818_v43 = vsub.f32 %v593_v8, %v635_v40 }
  0x99   : > { %v653_v44 = vmul.f32 %v4814_v41, %v4814_v41  ;;  %v652_v45 = vmul.f32 %v4816_v42, %v4816_v42 }
  0x9a   : > { %v651_v47 = vmul.f32 %v4818_v43, %v4818_v43 }
  0x9b   : > { %v665_v48 = vsel %vm603_vm0, %v653_v44, 0.0  ;;  %v662_v49 = vsel %vm603_vm0, %v652_v45, 0.0 }
  0x9c   : > { %666 = vadd.xlane.f32.xlu1 %v665_v48  ;;  %v659_v50 = vsel %vm603_vm0, %v651_v47, 0.0  ;;  %v615_v51 = vpop.xlane.xlu1 %614 }
  0x9d   : > { %663 = vadd.xlane.f32.xlu2 %v662_v49  ;;  %660 = vadd.xlane.f32.xlu0 %v659_v50  ;;  %v627_v52 = vpop.xlane.xlu0 %626  ;;  %v638_v54 = vmul.f32 %v4796_v22, %v615_v51  ;;  %v4899_v50 = vld [vmem:[%s6646_s24] ss:$0 sm:$0xff]  ;;  %s4655_s24 = smov 72  }
  0x9e   : > { %v642_v53 = vmul.f32 %v4796_v22, %v627_v52 }
  0x9f   : > { %v4837_v57 = vsub.f32 %v596_v12, %v638_v54 }
  0xa0   : > { %v4835_v56 = vsub.f32 %v600_v13, %v642_v53 }
  0xa1   : > { %v654_v61 = vmul.f32 %v4837_v57, %v4837_v57 }
  0xa2   : > { %v658_v59 = vmul.f32 %v4835_v56, %v4835_v56 }
  0xa3   : > { %v668_v62 = vsel %vm603_vm0, %v654_v61, 0.0 }
  0xa4   : > { %v680_v60 = vsel %vm603_vm0, %v658_v59, 0.0 }
  0xa5   : > { %678 = vadd.xlane.f32.xlu0 %v677_v58  ;;  %681 = vadd.xlane.f32.xlu2 %v680_v60  ;;  %v4911_v60 = vld [vmem:[%s6649_s29] ss:$0 sm:$0xff]  ;;  %s4658_s29 = smov 104  }
  0xad   : > { %669 = vadd.xlane.f32.xlu0 %v668_v62 }
 0x107   : > { %v676_v3 = vpop.xlane.xlu1 %675 }
 0x108   : > { %v673_v4 = vpop.xlane.xlu2 %672  ;;  %v688_v5 = vmul.f32 %v676_v3, %v4796_v22 }
 0x109   : > { %v687_v6 = vmul.f32 %v673_v4, %v4796_v22 }
 0x10a   : > { %v696_v7 = vadd.f32 1e-05, %v688_v5 }
 0x10b   : > { %v695_v8 = vadd.f32 1e-05, %v687_v6 }
 0x10c   : > { %4388 = vrsqrt.f32 %v696_v7  ;;  %vm755_vm4 = vweird.f32 %v696_v7 }
 0x10d   : > { %4390 = vrsqrt.f32 %v695_v8  ;;  %vm745_vm2 = vweird.f32 %v695_v8 }
 0x10f   : > { %v667_v9 = vpop.xlane.xlu1 %666 }
 0x110   : > { %v664_v10 = vpop.xlane.xlu2 %663  ;;  %v685_v11 = vmul.f32 %v667_v9, %v4796_v22  ;;  %v661_v12 = vpop.xlane.xlu0 %660 }
 0x111   : > { %v684_v13 = vmul.f32 %v664_v10, %v4796_v22  ;;  %v683_v14 = vmul.f32 %v661_v12, %v4796_v22 }
 0x112   : > { %v4863_v15 = vpop.eup %4388  ;;  %v4865_v16 = vadd.f32 1e-05, %v685_v11 }
 0x113   : > { %v4391_v17 = vpop.eup %4390  ;;  %v750_v18 = vmul.f32 %v4863_v15, %v696_v7  ;;  %v4868_v19 = vadd.f32 1e-05, %v684_v13  ;;  %v4870_v20 = vadd.f32 1e-05, %v683_v14  ;;  %vm756_vm5 = vweird.f32 %v4863_v15 }
 0x114   : > { %v740_v21 = vmul.f32 %v4391_v17, %v695_v8  ;;  %4392 = vrsqrt.f32 %v4865_v16  ;;  %vm746_vm3 = vweird.f32 %v4391_v17  ;;  %vm4902_vm7 = vmor %vm755_vm4, %vm756_vm5  ;;  %vm725_vm14 = vweird.f32 %v4865_v16 }
 0x115   : > { %v751_v23 = vmul.f32 %v4863_v15, %v750_v18  ;;  %4394 = vrsqrt.f32 %v4868_v19  ;;  %vm747_vm6 = vmor %vm745_vm2, %vm746_vm3  ;;  %vm715_vm8 = vweird.f32 %v4868_v19  ;;  %vm705_vm9 = vweird.f32 %v4870_v20 }
 0x116   : > { %v741_v24 = vmul.f32 %v4391_v17, %v740_v21  ;;  %4396 = vrsqrt.f32 %v4870_v20 }
 0x117   : > { %v752_v25 = vmul.f32 0.5, %v751_v23 }
 0x118   : > { %v742_v26 = vmul.f32 0.5, %v741_v24  ;;  %v682_v27 = vpop.xlane.xlu2 %681  ;;  %v679_v30 = vpop.xlane.xlu0 %678 }
 0x119   : > { %v753_v31 = vsub.f32 1.5, %v752_v25  ;;  %v690_v32 = vmul.f32 %v682_v27, %v4796_v22  ;;  %v689_v33 = vmul.f32 %v679_v30, %v4796_v22 }
 0x11a   : > { %v4878_v34 = vpop.eup %4392  ;;  %v743_v35 = vsub.f32 1.5, %v742_v26 }
 0x11b   : > { %v4880_v36 = vpop.eup %4394  ;;  %v4882_v37 = vadd.f32 1e-05, %v690_v32  ;;  %v720_v44 = vmul.f32 %v4878_v34, %v4865_v16  ;;  %v4888_v45 = vadd.f32 1e-05, %v689_v33  ;;  %v754_v47 = vmul.f32 %v4863_v15, %v753_v31  ;;  %v912_v32 = vld [vmem:[%s6625_s5] sm:$0xff] }
 0x11c   : > { %v4397_v38 = vpop.eup %4396  ;;  %v744_v39 = vmul.f32 %v4391_v17, %v743_v35  ;;  %v710_v40 = vmul.f32 %v4880_v36, %v4868_v19  ;;  %vm716_vm10 = vweird.f32 %v4880_v36  ;;  %vm726_vm15 = vweird.f32 %v4878_v34 }
 0x11d   : > { %v700_v48 = vmul.f32 %v4397_v38, %v4870_v20  ;;  %4398 = vrsqrt.f32 %v4882_v37  ;;  %v721_v55 = vmul.f32 %v4878_v34, %v720_v44  ;;  %v758_v63 = vsel %vm4902_vm7, %v4863_v15, %v754_v47  ;;  %vm4933_vm13 = vmor %vm715_vm8, %vm716_vm10 }
 0x11e   : > { %v711_v49 = vmul.f32 %v4880_v36, %v710_v40  ;;  %4400 = vrsqrt.f32 %v4888_v45  ;;  %v748_v52 = vsel %vm747_vm6, %v4391_v17, %v744_v39  ;;  %vm706_vm11 = vweird.f32 %v4397_v38  ;;  %vm4951_vm4 = vmor %vm725_vm14, %vm726_vm15 }
 0x11f   : > { %v701_v51 = vmul.f32 %v4397_v38, %v700_v48  ;;  %v783_v59 = vmul.f32 %v748_v52, %v4802_v29  ;;  %v722_v5 = vmul.f32 0.5, %v721_v55  ;;  %v784_v8 = vmul.f32 %v758_v63, %v4800_v28  ;;  %vm707_vm12 = vmor %vm705_vm9, %vm706_vm11 }
 0x120   : > { %v712_v54 = vmul.f32 0.5, %v711_v49  ;;  %v670_v58 = vpop.xlane.xlu0 %669  ;;  %vm775_vm1 = vweird.f32 %v4882_v37  ;;  %vm765_vm2 = vweird.f32 %v4888_v45  ;;  %vm880_vm11 = vcmask 523264  }
 0x121   : > { %v702_v61 = vmul.f32 0.5, %v701_v51  ;;  %v686_v62 = vmul.f32 %v670_v58, %v4796_v22  ;;  %v794_v1 = vmul.f32 %v4899_v50, %v783_v59  ;;  %v795_v18 = vmul.f32 %v4899_v50, %v784_v8 }
 0x122   : > { %v713_v0 = vsub.f32 1.5, %v712_v54  ;;  %v723_v20 = vsub.f32 1.5, %v722_v5  ;;  %vm1147_vm14 = vcmask 72704   ;;  %vm1260_vm15 = vcmask 1040384  }
 0x123   : > { %v4399_v29 = vpop.eup %4398  ;;  %v703_v2 = vsub.f32 1.5, %v702_v61  ;;  %v694_v3 = vadd.f32 1e-05, %v686_v62  ;;  %v805_v7 = vadd.f32 %v4911_v60, %v794_v1  ;;  %v806_v30 = vadd.f32 %v4911_v60, %v795_v18 }
 0x124   : > { %v4401_v4 = vpop.eup %4400  ;;  %v770_v6 = vmul.f32 %v4399_v29, %v4882_v37  ;;  %v714_v9 = vmul.f32 %v4880_v36, %v713_v0  ;;  %v724_v16 = vmul.f32 %v4878_v34, %v723_v20  ;;  %vm776_vm5 = vweird.f32 %v4399_v29 }
 0x125   : > { %v704_v10 = vmul.f32 %v4397_v38, %v703_v2  ;;  %v760_v11 = vmul.f32 %v4401_v4, %v4888_v45  ;;  %4402 = vrsqrt.f32 %v694_v3  ;;  %4005 = vmatmul.msk.f32.vlgmr.msra.gmra.mxu1 %vm603_vm0, %v805_v7  ;;  %vm766_vm3 = vweird.f32 %v4401_v4  ;;  %vm777_vm7 = vmor %vm775_vm1, %vm776_vm5  ;;  %v879_v2 = vld [vmem:[%s6624_s4 + $0x8] sm:$0x1] }
 0x126   : > { %v771_v12 = vmul.f32 %v4399_v29, %v770_v6  ;;  %v718_v23 = vsel %vm4933_vm13, %v4880_v36, %v714_v9  ;;  %vm767_vm6 = vmor %vm765_vm2, %vm766_vm3  ;;  %v728_v44 = vsel %vm4951_vm4, %v4878_v34, %v724_v16  ;;  %vm735_vm8 = vweird.f32 %v694_v3 }
 0x127   : > { %v761_v13 = vmul.f32 %v4401_v4, %v760_v11  ;;  %v708_v14 = vsel %vm707_vm12, %v4397_v38, %v704_v10  ;;  %v780_v31 = vmul.f32 %v718_v23, %v4816_v42  ;;  %v781_v37 = vmul.f32 %v728_v44, %v4814_v41 }
 0x128   : > { %v772_v15 = vmul.f32 0.5, %v771_v12  ;;  %v779_v17 = vmul.f32 %v708_v14, %v4818_v43  ;;  %vm938_vm12 = vcmask 64512   ;;  %vm987_vm13 = vcmask 516096  }
 0x129   : > { %v762_v21 = vmul.f32 0.5, %v761_v13  ;;  %v791_v39 = vmul.f32 %v4899_v50, %v780_v31  ;;  %vm2570_vm1 = vcmask 130048   ;;  %vm2579_vm2 = vcmask 195584  }
 0x12a   : > { %v773_v19 = vsub.f32 1.5, %v772_v15  ;;  %v790_v24 = vmul.f32 %v4899_v50, %v779_v17 }
 0x12b   : > { %v4403_v25 = vpop.eup %4402  ;;  %v763_v26 = vsub.f32 1.5, %v762_v21  ;;  %v802_v49 = vadd.f32 %v4911_v60, %v791_v39 }
 0x12c   : > { %v730_v43 = vmul.f32 %v4403_v25, %v694_v3  ;;  %v801_v27 = vadd.f32 %v4911_v60, %v790_v24  ;;  %v774_v33 = vmul.f32 %v4399_v29, %v773_v19  ;;  %vm736_vm9 = vweird.f32 %v4403_v25 }
 0x12d   : > { %v764_v35 = vmul.f32 %v4401_v4, %v763_v26  ;;  %4006 = vmatmul.msk.f32.gmra.mxu1 %vm603_vm0, %v806_v30  ;;  %vm737_vm10 = vmor %vm735_vm8, %vm736_vm9 }
 0x12e   : > { %v731_v36 = vmul.f32 %v4403_v25, %v730_v43  ;;  %4001 = vmatmul.msk.f32.vlgmr.msra.gmra.mxu0 %vm603_vm0, %v801_v27  ;;  %v778_v45 = vsel %vm777_vm7, %v4399_v29, %v774_v33  ;;  %v878_v29 = vld [vmem:[%s6624_s4] sm:$0xff] }
 0x12f   : > { %v768_v38 = vsel %vm767_vm6, %v4401_v4, %v764_v35  ;;  %v786_v52 = vmul.f32 %v778_v45, %v4835_v56 }
 0x130   : > { %v732_v42 = vmul.f32 0.5, %v731_v36  ;;  %v785_v40 = vmul.f32 %v768_v38, %v4824_v46  ;;  %v792_v46 = vmul.f32 %v4899_v50, %v781_v37  ;;  %v913_v38 = vld [vmem:[%s6625_s5 + $0x8] sm:$0x1] }
 0x131   : > { %v797_v34 = vmul.f32 %v4899_v50, %v786_v52 }
 0x132   : > { %v733_v47 = vsub.f32 1.5, %v732_v42  ;;  %v796_v48 = vmul.f32 %v4899_v50, %v785_v40  ;;  %v803_v55 = vadd.f32 %v4911_v60, %v792_v46  ;;  %v1069_v46 = vld [vmem:[%s6626_s6 + $0x8] sm:$0xff] }
 0x133   : > { %v808_v58 = vadd.f32 %v4911_v60, %v797_v34 }
 0x134   : > { %v807_v51 = vadd.f32 %v4911_v60, %v796_v48  ;;  %v734_v53 = vmul.f32 %v4403_v25, %v733_v47 }
 0x136   : > { %4002 = vmatmul.msk.f32.gmra.mxu0 %vm603_vm0, %v802_v49  ;;  %4007 = vmatmul.msk.f32.gmra.mxu1 %vm603_vm0, %v807_v51  ;;  %v738_v54 = vsel %vm737_vm10, %v4403_v25, %v734_v53 }
 0x137   : > { %v782_v41 = vmul.f32 %v738_v54, %v4837_v57 }
 0x139   : > { %v793_v56 = vmul.f32 %v4899_v50, %v782_v41 }
 0x13b   : > { %v804_v59 = vadd.f32 %v4911_v60, %v793_v56 }
 0x13e   : > { %4003 = vmatmul.msk.f32.gmra.mxu0 %vm603_vm0, %v803_v55  ;;  %4008 = vmatmul.msk.f32.gmra.mxu1 %vm603_vm0, %v808_v58  ;;  %v1075_v55 = vld [vmem:[%s6626_s6 + $0x38] sm:$0xff] }
 0x146   : > { %4004 = vmatmul.msk.f32.gmra.mxu0 %vm603_vm0, %v804_v59 }
 0x1a2   : > { %v4981_v61 = vpop.f32.mrf.mxu1 }
 0x1a3   : > { %v5092_v27 = vmul.f32 0.35355338, %v4981_v61 }
 0x1aa   : > { %v4985_v63 = vpop.f32.mrf.mxu1 }
 0x1ab   : > { %v4983_v62 = vpop.f32.mrf.mxu0  ;;  %932 = vrot.lane.b32.xlu0 %v4985_v63, %s4650_s30  ;;  %v5022_v3 = vpack.i.bf16 %v4981_v61, %v4985_v63  ;;  %v5097_v30 = vmul.f32 0.35355338, %v4985_v63 }
 0x1ac   : > { %v5071_v24 = vmul.f32 0.35355338, %v4983_v62 }
 0x1b3   : > { %v4988_v57 = vpop.f32.mrf.mxu0  ;;  %v4990_v0 = vpop.f32.mrf.mxu1 }
 0x1b4   : > { %934 = vrot.lane.b32.xlu2 %v4990_v0, %s4650_s30  ;;  %v5077_v25 = vmul.f32 0.35355338, %v4988_v57  ;;  %v5102_v31 = vmul.f32 0.35355338, %v4990_v0  ;;  %v5127_v49 = vpack.i.bf16 %v4983_v62, %v4988_v57 }
 0x1bb   : > { %v4993_v50 = vpop.f32.mrf.mxu0  ;;  %v4995_v60 = vpop.f32.mrf.mxu1 }
 0x1bc   : > { %926 = vrot.lane.b32.xlu0 %v4993_v50, %s4650_s30  ;;  %930 = vrot.lane.b32.xlu2 %v4981_v61, %s4650_s30  ;;  %v5029_v4 = vpack.i.bf16 %v4990_v0, %v4995_v60  ;;  %v5082_v26 = vmul.f32 0.35355338, %v4993_v50  ;;  %v5107_v16 = vmul.f32 0.35355338, %v4995_v60 }
 0x1bd   : > { %936 = vrot.lane.b32.xlu1 %v4995_v60, %s4650_s30  ;;  %895 = vmatpush.msrb.mxu1 %v4995_v60 }
 0x1bf   : > { %896 = vmatpush.msrb.mxu1 %v4990_v0 }
 0x1c1   : > { %897 = vmatpush.msrb.mxu1 %v4985_v63 }
 0x1c3   : > { %898 = vmatpush.msrb.mxu1 %v4981_v61  ;;  %v5004_v1 = vpop.f32.mrf.mxu0 }
 0x1c4   : > { %924 = vrot.lane.b32.xlu2 %v4988_v57, %s4650_s30  ;;  %v5087_v43 = vmul.f32 0.35355338, %v5004_v1  ;;  %v5121_v47 = vpack.i.bf16 %v4993_v50, %v5004_v1 }
 0x1c5   : > { %928 = vrot.lane.b32.xlu1 %v5004_v1, %s4650_s30  ;;  %899 = vmatpush.msrb.mxu1 %v5004_v1 }
 0x1c7   : > { %900 = vmatpush.msrb.mxu1 %v4993_v50 }
 0x1c9   : > { %901 = vmatpush.msrb.mxu1 %v4988_v57 }
 0x1cb   : > { %902 = vmatpush.msrb.mxu1 %v4983_v62 }
 0x1cc   : > { %4009 = vmatmul.msk.f32.vlgmr.msrb.gmra.mxu1 %vm880_vm11, %v878_v29 }
 0x1cd   : > { %922 = vrot.lane.b32.xlu1 %v4983_v62, %s4650_s30 }
 0x1d4   : > { %4010 = vmatmul.msk.f32.gmra.mxu1 %vm880_vm11, %v879_v2 }
 0x1d5   : > { %4298 = vrot.lane.b32.xlu1 %v5022_v3, %s4651_s2 }
 0x1dd   : > { %4303 = vrot.lane.b32.xlu1 %v5029_v4, %s4651_s2 }
 0x20e   : > { %v935_v6 = vpop.permute.xlu2 %934 }
 0x216   : > { %v931_v9 = vpop.permute.xlu2 %930 }
 0x21d   : > { %v933_v7 = vpop.permute.xlu0 %932 }
 0x21e   : > { %v925_v12 = vpop.permute.xlu2 %924 }
 0x22e   : > { %v927_v11 = vpop.permute.xlu0 %926 }
 0x22f   : > { %v937_v5 = vpop.permute.xlu1 %936 }
 0x230   : > { %4011 = vmatpush.xpose.msk.msra.mxu2 %vm938_vm12, %v937_v5 }
 0x234   : > { %4012 = vmatpush.xpose.msk.msra.mxu2 %vm938_vm12, %v935_v6 }
 0x237   : > { %v929_v8 = vpop.permute.xlu1 %928 }
 0x238   : > { %4013 = vmatpush.xpose.msk.msra.mxu2 %vm938_vm12, %v933_v7 }
 0x23c   : > { %4014 = vmatpush.xpose.msk.msra.mxu2 %vm938_vm12, %v931_v9 }
 0x23f   : > { %v923_v10 = vpop.permute.xlu1 %922 }
 0x240   : > { %4015 = vmatpush.xpose.msk.msra.mxu2 %vm938_vm12, %v929_v8 }
 0x244   : > { %4016 = vmatpush.xpose.msk.msra.mxu2 %vm938_vm12, %v927_v11 }
 0x247   : > { %v4299_v13 = vpop.permute.xlu1 %4298 }
 0x248   : > { %4017 = vmatpush.xpose.msk.msra.mxu2 %vm938_vm12, %v925_v12  ;;  %v5060_v23 = vunpack.i.l.bf16 %v4299_v13  ;;  %v5063_v19 = vunpack.i.h.bf16 %v4299_v13 }
 0x249   : > { %v5040_v14 = vpop.f32.mrf.mxu1 }
 0x24a   : > { %v5043_v28 = vmul.f32 0.35355338, %v5040_v14 }
 0x24c   : > { %4018 = vmatpush.xpose.msk.msra.mxu2 %vm938_vm12, %v923_v10  ;;  %v1068_v10 = vld [vmem:[%s6626_s6] sm:$0xff] }
 0x24f   : > { %v4304_v15 = vpop.permute.xlu1 %4303  ;;  %4019 = vmatmul.msk.f32.vlgmr.msra.gmra.mxu2 %vm938_vm12, %v5043_v28 }
 0x250   : > { %v5048_v17 = vunpack.i.l.bf16 %v4304_v15  ;;  %v5052_v20 = vunpack.i.h.bf16 %v4304_v15 }
 0x251   : > { %v5050_v18 = vpop.f32.mrf.mxu1 }
 0x252   : > { %1045 = vmatpush.msra.mxu3 %v5048_v17  ;;  %4023 = vmatpush.xpose.msk.msra.mxu1 %vm938_vm12, %v5050_v18  ;;  %v5058_v21 = vmul.f32 0.35355338, %v5050_v18 }
 0x254   : > { %1046 = vmatpush.msra.mxu3 %v5052_v20 }
 0x256   : > { %1047 = vmatpush.msra.mxu3 %v5060_v23  ;;  %4024 = vmatpush.xpose.msk.msra.mxu1 %vm938_vm12, %v5040_v14 }
 0x257   : > { %4020 = vmatmul.msk.f32.gmra.mxu2 %vm938_vm12, %v5058_v21 }
 0x258   : > { %1048 = vmatpush.msra.mxu3 %v5063_v19 }
 0x259   : > { %4025 = vmatmul.msk.f32.vlgmr.msra.gmra.mxu1 %vm938_vm12, %v5071_v24 }
 0x261   : > { %4026 = vmatmul.msk.f32.gmra.mxu1 %vm938_vm12, %v5077_v25 }
 0x269   : > { %4027 = vmatmul.msk.f32.gmra.mxu1 %vm938_vm12, %v5082_v26 }
 0x271   : > { %4028 = vmatmul.msk.f32.gmra.mxu1 %vm938_vm12, %v5087_v43 }
 0x279   : > { %4029 = vmatmul.msk.f32.gmra.mxu1 %vm938_vm12, %v5092_v27 }
 0x281   : > { %4030 = vmatmul.msk.f32.gmra.mxu1 %vm938_vm12, %v5097_v30 }
 0x289   : > { %4031 = vmatmul.msk.f32.gmra.mxu1 %vm938_vm12, %v5102_v31 }
 0x291   : > { %4032 = vmatmul.msk.f32.gmra.mxu1 %vm938_vm12, %v5107_v16 }
 0x2d2   : > { %v978_v33 = vpop.f32.mrf.mxu2 }
 0x2d3   : > { %v979_v35 = vadd.f32 %v978_v33, %v912_v32 }
 0x2d5   : > { %v984_v36 = vsel %vm880_vm11, %v979_v35, -inf }
 0x2d6   : > { %985 = vmax.xlane.f32.xlu0 %v984_v36  ;;  %v1123_v42 = vpop.f32.mrf.mxu1 }
 0x2d7   : > { %v1124_v11 = vadd.f32 %v1123_v42, %v1068_v10 }
 0x2d9   : > { %v1148_v33 = vsel %vm1147_vm14, %v1124_v11, -inf }
 0x2da   : > { %v981_v39 = vpop.f32.mrf.mxu2 }
 0x2db   : > { %v982_v40 = vadd.f32 %v981_v39, %v913_v38 }
 0x2dd   : > { %v988_v44 = vsel %vm987_vm13, %v982_v40, -inf }
 0x2de   : > { %989 = vmax.xlane.f32.xlu2 %v988_v44  ;;  %v1126_v45 = vpop.f32.mrf.mxu1 }
 0x2df   : > { %v1127_v34 = vadd.f32 %v1126_v45, %v1069_v46  ;;  %v1071_v45 = vld [vmem:[%s6626_s6 + $0x18] sm:$0xff] }
 0x2e1   : > { %v1151_v54 = vsel %vm1147_vm14, %v1127_v34, -inf }
 0x2e6   : > { %v1129_v48 = vpop.f32.mrf.mxu1 }
 0x2ea   : > { %4308 = vrot.lane.b32.xlu0 %v5121_v47, %s4651_s2 }
 0x2ee   : > { %v1132_v51 = vpop.f32.mrf.mxu1 }
 0x2ef   : > { %v1133_v46 = vadd.f32 %v1132_v51, %v1071_v45 }
 0x2f6   : > { %4313 = vrot.lane.b32.xlu2 %v5127_v49, %s4651_s2  ;;  %v1135_v37 = vpop.f32.mrf.mxu1 }
 0x2fe   : > { %v1138_v52 = vpop.f32.mrf.mxu1 }
 0x306   : > { %v1141_v53 = vpop.f32.mrf.mxu1 }
 0x30e   : > { %v1144_v58 = vpop.f32.mrf.mxu1 }
 0x30f   : > { %v5138_v41 = vadd.f32 %v1144_v58, %v1075_v55 }
 0x311   : > { %v1169_v56 = vsel %vm1147_vm14, %v5138_v41, -inf }
 0x31f   : > { %1152 = vmax.xlane.f32.xlu2 %v1151_v54  ;;  %v1072_v54 = vld [vmem:[%s6626_s6 + $0x20] sm:$0xff] }
 0x320   : > { %v1136_v55 = vadd.f32 %v1135_v37, %v1072_v54 }
 0x322   : > { %v1160_v58 = vsel %vm1147_vm14, %v1136_v55, -inf }
 0x327   : > { %1170 = vmax.xlane.f32.xlu2 %v1169_v56  ;;  %v1073_v56 = vld [vmem:[%s6626_s6 + $0x28] sm:$0xff] }
 0x33f   : > { %1326 = vrot.lane.b32.xlu2 %v4995_v60, %s4652_s20 }
 0x349   : > { %v986_v59 = vpop.xlane.xlu0 %985 }
 0x34a   : > { %v991_v29 = vsub.f32 %v979_v35, %v986_v59  ;;  %v1070_v35 = vld [vmem:[%s6626_s6 + $0x10] sm:$0xff]  ;;  %v5177_v59 = vadd.f32 %v1138_v52, %v1073_v56 }
 0x34b   : > { %v1130_v42 = vadd.f32 %v1129_v48, %v1070_v35  ;;  %v1157_v48 = vsel %vm1147_vm14, %v1133_v46, -inf }
 0x34c   : > { %v993_v2 = vmul.f32 1.442695, %v991_v29  ;;  %v1163_v51 = vsel %vm1147_vm14, %v5177_v59, -inf  ;;  %v1074_v29 = vld [vmem:[%s6626_s6 + $0x30] sm:$0xff] }
 0x34d   : > { %v1154_v44 = vsel %vm1147_vm14, %v1130_v42, -inf }
 0x34e   : > { %4404 = vpow2.f32 %v993_v2  ;;  %v5184_v2 = vadd.f32 %v1141_v53, %v1074_v29 }
 0x350   : > { %v1166_v37 = vsel %vm1147_vm14, %v5184_v2, -inf }
 0x351   : > { %v990_v5 = vpop.xlane.xlu2 %989 }
 0x352   : > { %v992_v6 = vsub.f32 %v982_v40, %v990_v5 }
 0x354   : > { %v4405_v7 = vpop.eup %4404  ;;  %v995_v8 = vmul.f32 1.442695, %v992_v6 }
 0x355   : > { %v997_v9 = vsel %vm880_vm11, %v4405_v7, 0.0 }
 0x356   : > { %4406 = vpow2.f32 %v995_v8  ;;  %998 = vadd.xlane.f32.xlu1 %v997_v9 }
 0x359   : > { %v4314_v36 = vpop.permute.xlu2 %4313 }
 0x35a   : > { %v5158_v39 = vunpack.i.l.bf16 %v4314_v36  ;;  %v5161_v40 = vunpack.i.h.bf16 %v4314_v36 }
 0x35c   : > { %v4407_v12 = vpop.eup %4406  ;;  %v4309_v13 = vpop.permute.xlu0 %4308 }
 0x35d   : > { %v5148_v15 = vunpack.i.l.bf16 %v4309_v13  ;;  %v1000_v32 = vsel %vm987_vm13, %v4407_v12, 0.0  ;;  %v5155_v38 = vunpack.i.h.bf16 %v4309_v13 }
 0x35e   : > { %1001 = vadd.xlane.f32.xlu0 %v1000_v32  ;;  %1149 = vmax.xlane.f32.xlu1 %v1148_v33 }
 0x35f   : > { %1049 = vmatpush.msra.mxu3 %v5148_v15 }
 0x361   : > { %1050 = vmatpush.msra.mxu3 %v5155_v38 }
 0x363   : > { %1051 = vmatpush.msra.mxu3 %v5158_v39 }
 0x365   : > { %1052 = vmatpush.msra.mxu3 %v5161_v40 }
 0x366   : > { %1155 = vmax.xlane.f32.xlu1 %v1154_v44 }
 0x36e   : > { %1158 = vmax.xlane.f32.xlu1 %v1157_v48 }
 0x376   : > { %1161 = vmax.xlane.f32.xlu1 %v1160_v58 }
 0x37e   : > { %1164 = vmax.xlane.f32.xlu1 %v1163_v51 }
 0x386   : > { %1167 = vmax.xlane.f32.xlu1 %v1166_v37 }
 0x392   : > { %v1153_v5 = vpop.xlane.xlu2 %1152 }
 0x393   : > { %v1173_v6 = vsub.f32 %v1127_v34, %v1153_v5 }
 0x395   : > { %v1182_v8 = vmul.f32 1.442695, %v1173_v6 }
 0x397   : > { %4408 = vpow2.f32 %v1182_v8 }
 0x39d   : > { %v5188_v52 = vpop.eup %4408 }
 0x39e   : > { %v1199_v9 = vsel %vm1147_vm14, %v5188_v52, 0.0 }
 0x39f   : > { %1200 = vadd.xlane.f32.xlu1 %v1199_v9 }
 0x3c9   : > { %v999_v10 = vpop.xlane.xlu1 %998 }
 0x3ca   : > { %4410 = vrcp.f32 %v999_v10 }
 0x3d0   : > { %v4411_v13 = vpop.eup %4410 }
 0x3d1   : > { %v1150_v32 = vpop.xlane.xlu1 %1149  ;;  %v1002_v53 = vpop.xlane.xlu0 %1001  ;;  %v1005_v33 = vmul.f32 %v4411_v13, %v4405_v7 }
 0x3d2   : > { %v1172_v35 = vsub.f32 %v1124_v11, %v1150_v32  ;;  %4412 = vrcp.f32 %v1002_v53  ;;  %v1171_v13 = vpop.xlane.xlu2 %1170 }
 0x3d3   : > { %4021 = vmatmul.msk.f32.vlgmr.msra.gmra.mxu3 %vm880_vm11, %v1005_v33  ;;  %v1179_v53 = vsub.f32 %v5138_v41, %v1171_v13 }
 0x3d4   : > { %v1180_v36 = vmul.f32 1.442695, %v1172_v35 }
 0x3d6   : > { %4414 = vpow2.f32 %v1180_v36  ;;  %v1194_v36 = vmul.f32 1.442695, %v1179_v53 }
 0x3d8   : > { %v4413_v34 = vpop.eup %4412 }
 0x3d9   : > { %v1156_v44 = vpop.xlane.xlu1 %1155  ;;  %v1006_v45 = vmul.f32 %v4413_v34, %v4407_v12 }
 0x3da   : > { %v1174_v48 = vsub.f32 %v1130_v42, %v1156_v44 }
 0x3db   : > { %4022 = vmatmul.msk.f32.gmra.mxu3 %vm880_vm11, %v1006_v45 }
 0x3dc   : > { %v5194_v54 = vpop.eup %4414  ;;  %v1184_v58 = vmul.f32 1.442695, %v1174_v48 }
 0x3dd   : > { %v1196_v56 = vsel %vm1147_vm14, %v5194_v54, 0.0 }
 0x3de   : > { %4416 = vpow2.f32 %v1184_v58  ;;  %1197 = vadd.xlane.f32.xlu0 %v1196_v56 }
 0x3e1   : > { %v1159_v7 = vpop.xlane.xlu1 %1158 }
 0x3e2   : > { %v1175_v11 = vsub.f32 %v1133_v46, %v1159_v7  ;;  %v1327_v7 = vpop.permute.xlu2 %1326 }
 0x3e4   : > { %v5198_v51 = vpop.eup %4416  ;;  %v1186_v29 = vmul.f32 1.442695, %v1175_v11 }
 0x3e5   : > { %v1202_v37 = vsel %vm1147_vm14, %v5198_v51, 0.0 }
 0x3e6   : > { %4418 = vpow2.f32 %v1186_v29  ;;  %1203 = vadd.xlane.f32.xlu0 %v1202_v37 }
 0x3e9   : > { %v1162_v12 = vpop.xlane.xlu1 %1161 }
 0x3ea   : > { %v1176_v42 = vsub.f32 %v1136_v55, %v1162_v12 }
 0x3ec   : > { %v5202_v5 = vpop.eup %4418  ;;  %v1188_v6 = vmul.f32 1.442695, %v1176_v42 }
 0x3ed   : > { %v1205_v8 = vsel %vm1147_vm14, %v5202_v5, 0.0 }
 0x3ee   : > { %4420 = vpow2.f32 %v1188_v6  ;;  %1206 = vadd.xlane.f32.xlu2 %v1205_v8 }
 0x3f1   : > { %v1165_v55 = vpop.xlane.xlu1 %1164 }
 0x3f2   : > { %v1177_v10 = vsub.f32 %v5177_v59, %v1165_v55 }
 0x3f4   : > { %v5206_v9 = vpop.eup %4420  ;;  %v1190_v32 = vmul.f32 1.442695, %v1177_v10 }
 0x3f5   : > { %v1208_v46 = vsel %vm1147_vm14, %v5206_v9, 0.0 }
 0x3f6   : > { %1209 = vadd.xlane.f32.xlu1 %v1208_v46  ;;  %4422 = vpow2.f32 %v1190_v32 }
 0x3f7   : > { %4424 = vpow2.f32 %v1194_v36 }
 0x3f9   : > { %v1168_v33 = vpop.xlane.xlu1 %1167 }
 0x3fa   : > { %1322 = vrot.lane.b32.xlu0 %v4985_v63, %s4652_s20  ;;  %v1178_v35 = vsub.f32 %v5184_v2, %v1168_v33 }
 0x3fc   : > { %v1192_v34 = vmul.f32 1.442695, %v1178_v35  ;;  %v5233_v44 = vpop.eup %4422 }
 0x3fd   : > { %v1211_v59 = vsel %vm1147_vm14, %v5233_v44, 0.0  ;;  %v5237_v45 = vpop.eup %4424 }
 0x3fe   : > { %4426 = vpow2.f32 %v1192_v34  ;;  %v1217_v2 = vsel %vm1147_vm14, %v5237_v45, 0.0 }
 0x402   : > { %1318 = vrot.lane.b32.xlu0 %v5004_v1, %s4652_s20 }
 0x404   : > { %v5241_v41 = vpop.eup %4426 }
 0x405   : > { %v1214_v48 = vsel %vm1147_vm14, %v5241_v41, 0.0 }
 0x406   : > { %1320 = vrot.lane.b32.xlu2 %v4981_v61, %s4652_s20 }
 0x40a   : > { %1314 = vrot.lane.b32.xlu0 %v4988_v57, %s4652_s20 }
 0x40e   : > { %1316 = vrot.lane.b32.xlu2 %v4993_v50, %s4652_s20 }
 0x40f   : > { %1324 = vrot.lane.b32.xlu1 %v4990_v0, %s4652_s20 }
 0x412   : > { %v1201_v11 = vpop.xlane.xlu1 %1200 }
 0x416   : > { %1312 = vrot.lane.b32.xlu2 %v4983_v62, %s4652_s20  ;;  %s4654_s20 = smov 80  }
 0x41e   : > { %1310 = vrot.lane.b32.xlu2 %v5058_v21, %s4653_s23 }
 0x426   : > { %1471 = vrot.lane.b32.xlu2 %v5040_v14, %s4653_s23 }
 0x42e   : > { %1457 = vrot.lane.b32.xlu2 %v5077_v25, %s4653_s23 }
 0x434   : > { %1212 = vadd.xlane.f32.xlu0 %v1211_v59 }
 0x436   : > { %1461 = vrot.lane.b32.xlu2 %v5087_v43, %s4653_s23 }
 0x439   : > { %1218 = vadd.xlane.f32.xlu1 %v1217_v2 }
 0x43c   : > { %1215 = vadd.xlane.f32.xlu0 %v1214_v48 }
 0x43e   : > { %1709 = vrot.lane.b32.xlu2 %v4985_v63, %s4654_s20 }
 0x446   : > { %2100 = vrot.lane.b32.xlu2 %v4995_v60, %s4655_s24 }
 0x44e   : > { %2098 = vrot.lane.b32.xlu2 %v4990_v0, %s4655_s24 }
 0x450   : > { %1308 = vrot.lane.b32.xlu0 %v5043_v28, %s4653_s23 }
 0x451   : > { %v1198_v58 = vpop.xlane.xlu0 %1197 }
 0x452   : > { %1459 = vrot.lane.b32.xlu1 %v5082_v26, %s4653_s23  ;;  %4428 = vrcp.f32 %v1198_v58 }
 0x453   : > { %4430 = vrcp.f32 %v1201_v11 }
 0x456   : > { %1465 = vrot.lane.b32.xlu2 %v5097_v30, %s4653_s23  ;;  %v1054_v56 = vpop.f32.mrf.mxu3 }
 0x458   : > { %1473 = vrot.lane.b32.xlu0 %v5050_v18, %s4653_s23  ;;  %v4429_v29 = vpop.eup %4428 }
 0x459   : > { %v1228_v12 = vmul.f32 %v4429_v29, %v5194_v54  ;;  %v1204_v6 = vpop.xlane.xlu0 %1203  ;;  %v4431_v8 = vpop.eup %4430 }
 0x45a   : > { %1707 = vrot.lane.b32.xlu1 %v4981_v61, %s4654_s20  ;;  %4432 = vrcp.f32 %v1204_v6  ;;  %v1229_v54 = vmul.f32 %v4431_v8, %v5188_v52 }
 0x45e   : > { %1703 = vrot.lane.b32.xlu2 %v4993_v50, %s4654_s20  ;;  %v1057_v37 = vpop.f32.mrf.mxu3 }
 0x45f   : > { %4033 = vmatpush.msk.msrb.mxu3 %vm1260_vm15, %v1057_v37 }
 0x460   : > { %1455 = vrot.lane.b32.xlu0 %v5071_v24, %s4653_s23  ;;  %v4433_v55 = vpop.eup %4432 }
 0x461   : > { %v1207_v42 = vpop.xlane.xlu2 %1206  ;;  %1279 = vmatpush.msrb.mxu3 %v1054_v56 }
 0x462   : > { %1705 = vrot.lane.b32.xlu1 %v5004_v1, %s4654_s20  ;;  %4034 = vmatmul.msk.f32.vlgmr.msrb.gmra.mxu3 %vm1147_vm14, %v1228_v12  ;;  %4434 = vrcp.f32 %v1207_v42 }
 0x463   : > { %4044 = vmatpush.xpose.msk.msra.mxu3 %vm938_vm12, %v1327_v7 }
 0x466   : > { %2094 = vrot.lane.b32.xlu2 %v4981_v61, %s4655_s24  ;;  %v1230_v61 = vmul.f32 %v4433_v55, %v5198_v51 }
 0x468   : > { %1713 = vrot.lane.b32.xlu0 %v4995_v60, %s4654_s20 }
 0x469   : > { %v1321_v46 = vpop.permute.xlu2 %1320  ;;  %v1210_v60 = vpop.xlane.xlu1 %1209 }
 0x46a   : > { %2096 = vrot.lane.b32.xlu1 %v4985_v63, %s4655_s24  ;;  %4035 = vmatmul.msk.f32.gmra.mxu3 %vm1147_vm14, %v1229_v54  ;;  %v4435_v63 = vpop.eup %4434  ;;  %4436 = vrcp.f32 %v1210_v60 }
 0x46b   : > { %v1231_v52 = vmul.f32 %v4435_v63, %v5202_v5 }
 0x46c   : > { %v1323_v5 = vpop.permute.xlu0 %1322 }
 0x46e   : > { %1701 = vrot.lane.b32.xlu2 %v4988_v57, %s4654_s20 }
 0x470   : > { %1711 = vrot.lane.b32.xlu0 %v4990_v0, %s4654_s20  ;;  %v4437_v51 = vpop.eup %4436 }
 0x471   : > { %v1317_v10 = vpop.permute.xlu2 %1316 }
 0x472   : > { %1469 = vrot.lane.b32.xlu1 %v5107_v16, %s4653_s23  ;;  %4036 = vmatmul.msk.f32.gmra.mxu3 %vm1147_vm14, %v1230_v61 }
 0x474   : > { %v1319_v53 = vpop.permute.xlu0 %1318 }
 0x476   : > { %2092 = vrot.lane.b32.xlu2 %v5004_v1, %s4655_s24  ;;  %v1232_v1 = vmul.f32 %v4437_v51, %v5206_v9 }
 0x478   : > { %1463 = vrot.lane.b32.xlu0 %v5092_v27, %s4653_s23 }
 0x479   : > { %v1313_v0 = vpop.permute.xlu2 %1312 }
 0x47a   : > { %4323 = vrot.lane.b32.xlu1 %v5022_v3, %s4656_s26  ;;  %4037 = vmatmul.msk.f32.gmra.mxu3 %vm1147_vm14, %v1231_v52 }
 0x47e   : > { %1699 = vrot.lane.b32.xlu2 %v4983_v62, %s4654_s20 }
 0x480   : > { %1467 = vrot.lane.b32.xlu0 %v5102_v31, %s4653_s23 }
 0x481   : > { %v5302_v13 = vpop.permute.xlu2 %1310  ;;  %v1325_v32 = vpop.permute.xlu1 %1324 }
 0x482   : > { %4333 = vrot.lane.b32.xlu1 %v5127_v49, %s4656_s26  ;;  %4038 = vmatmul.msk.f32.gmra.mxu3 %vm1147_vm14, %v1232_v1 }
 0x483   : > { %4045 = vmatpush.xpose.msk.msra.mxu3 %vm938_vm12, %v1325_v32 }
 0x486   : > { %2090 = vrot.lane.b32.xlu2 %v4993_v50, %s4655_s24  ;;  %v1315_v50 = vpop.permute.xlu0 %1314 }
 0x487   : > { %4046 = vmatpush.xpose.msk.msra.mxu3 %vm938_vm12, %v1323_v5 }
 0x488   : > { %1695 = vrot.lane.b32.xlu0 %v5043_v28, %s4657_s28 }
 0x489   : > { %v1472_v9 = vpop.permute.xlu2 %1471 }
 0x48b   : > { %4047 = vmatpush.xpose.msk.msra.mxu3 %vm938_vm12, %v1321_v46 }
 0x48e   : > { %2088 = vrot.lane.b32.xlu2 %v4988_v57, %s4655_s24 }
 0x48f   : > { %4048 = vmatpush.xpose.msk.msra.mxu3 %vm938_vm12, %v1319_v53 }
 0x490   : > { %2086 = vrot.lane.b32.xlu0 %v4983_v62, %s4655_s24 }
 0x491   : > { %v1458_v33 = vpop.permute.xlu2 %1457 }
 0x493   : > { %4049 = vmatpush.xpose.msk.msra.mxu3 %vm938_vm12, %v1317_v10 }
 0x496   : > { %1697 = vrot.lane.b32.xlu2 %v5058_v21, %s4657_s28 }
 0x497   : > { %4050 = vmatpush.xpose.msk.msra.mxu3 %vm938_vm12, %v1315_v50 }
 0x498   : > { %2082 = vrot.lane.b32.xlu0 %v5043_v28, %s4658_s29 }
 0x499   : > { %v1462_v35 = vpop.permute.xlu2 %1461 }
 0x49b   : > { %4051 = vmatpush.xpose.msk.msra.mxu3 %vm938_vm12, %v1313_v0 }
 0x49e   : > { %2084 = vrot.lane.b32.xlu2 %v5058_v21, %s4658_s29 }
 0x4a0   : > { %4318 = vrot.lane.b32.xlu0 %v5029_v4, %s4656_s26 }
 0x4a1   : > { %v1710_v62 = vpop.permute.xlu2 %1709 }
 0x4a7   : > { %v1213_v57 = vpop.xlane.xlu0 %1212 }
 0x4a8   : > { %4438 = vrcp.f32 %v1213_v57  ;;  %4328 = vrot.lane.b32.xlu0 %v5121_v47, %s4656_s26  ;;  %s6591_s26 = scalar_lea.vmem %s6638_s18, %s4255_s22 }
 0x4a9   : > { %v2101_v36 = vpop.permute.xlu2 %2100 }
 0x4ac   : > { %v1219_v21 = vpop.xlane.xlu1 %1218 }
 0x4ae   : > { %v4439_v34 = vpop.eup %4438 }
 0x4af   : > { %v1216_v59 = vpop.xlane.xlu0 %1215  ;;  %v1233_v28 = vmul.f32 %v4439_v34, %v5233_v44 }
 0x4b0   : > { %4440 = vrcp.f32 %v1216_v59  ;;  %1860 = vrot.lane.b32.xlu0 %v5050_v18, %s4657_s28 }
 0x4b1   : > { %v2099_v2 = vpop.permute.xlu2 %2098  ;;  %4039 = vmatmul.msk.f32.gmra.mxu3 %vm1147_vm14, %v1233_v28  ;;  %4442 = vrcp.f32 %v1219_v21 }
 0x4b6   : > { %v4441_v48 = vpop.eup %4440 }
 0x4b7   : > { %v1234_v58 = vmul.f32 %v4441_v48, %v5241_v41  ;;  %v4443_v7 = vpop.eup %4442 }
 0x4b8   : > { %1842 = vrot.lane.b32.xlu0 %v5071_v24, %s4657_s28  ;;  %v1235_v44 = vmul.f32 %v4443_v7, %v5237_v45 }
 0x4b9   : > { %v1466_v56 = vpop.permute.xlu2 %1465  ;;  %4040 = vmatmul.msk.f32.gmra.mxu3 %vm1147_vm14, %v1234_v58 }
 0x4c0   : > { %2245 = vrot.lane.b32.xlu0 %v5040_v14, %s4658_s29 }
 0x4c1   : > { %v1704_v11 = vpop.permute.xlu2 %1703  ;;  %4041 = vmatmul.msk.f32.gmra.mxu3 %vm1147_vm14, %v1235_v44 }
 0x4c2   : > { %v1309_v29 = vpop.permute.xlu0 %1308 }
 0x4c4   : > { %v1460_v37 = vpop.permute.xlu1 %1459 }
 0x4c8   : > { %1844 = vrot.lane.b32.xlu0 %v5077_v25, %s4657_s28 }
 0x4c9   : > { %v2095_v41 = vpop.permute.xlu2 %2094  ;;  %4052 = vmatmul.msk.f32.vlgmr.msra.gmra.mxu3 %vm938_vm12, %v1309_v29 }
 0x4ca   : > { %v1474_v12 = vpop.permute.xlu0 %1473 }
 0x4cb   : > { %4064 = vmatpush.xpose.msk.msrb.mxu2 %vm938_vm12, %v1474_v12 }
 0x4cc   : > { %v1708_v42 = vpop.permute.xlu1 %1707 }
 0x4cf   : > { %4065 = vmatpush.xpose.msk.msrb.mxu2 %vm938_vm12, %v1472_v9 }
 0x4d0   : > { %2231 = vrot.lane.b32.xlu0 %v5077_v25, %s4658_s29 }
 0x4d1   : > { %v1702_v45 = vpop.permute.xlu2 %1701  ;;  %4053 = vmatmul.msk.f32.gmra.mxu3 %vm938_vm12, %v5302_v13 }
 0x4d2   : > { %v1456_v6 = vpop.permute.xlu0 %1455 }
 0x4d3   : > { %4126 = vmatpush.xpose.msk.msra.mxu2 %vm938_vm12, %v2101_v36 }
 0x4d4   : > { %4066 = vmatmul.msk.f32.vlgmr.msrb.gmra.mxu2 %vm938_vm12, %v1456_v6  ;;  %v1706_v8 = vpop.permute.xlu1 %1705  ;;  %v4056_v6 = vld [vmem:[%s6626_s6 + $0x40] sm:$0xff] }
 0x4d7   : > { %4127 = vmatpush.xpose.msk.msra.mxu2 %vm938_vm12, %v2099_v2 }
 0x4d8   : > { %1846 = vrot.lane.b32.xlu0 %v5082_v26, %s4657_s28 }
 0x4d9   : > { %v2093_v54 = vpop.permute.xlu2 %2092 }
 0x4da   : > { %v1714_v46 = vpop.permute.xlu0 %1713 }
 0x4db   : > { %4085 = vmatpush.xpose.msk.msrb.mxu1 %vm938_vm12, %v1714_v46 }
 0x4dc   : > { %4067 = vmatmul.msk.f32.gmra.mxu2 %vm938_vm12, %v1458_v33  ;;  %v2097_v25 = vpop.permute.xlu1 %2096 }
 0x4dd   : > { %4128 = vmatpush.xpose.msk.msra.mxu2 %vm938_vm12, %v2097_v25  ;;  %v4057_v25 = vld [vmem:[%s6626_s6 + $0x48] sm:$0xff] }
 0x4e1   : > { %v1700_v55 = vpop.permute.xlu2 %1699  ;;  %4129 = vmatpush.xpose.msk.msra.mxu2 %vm938_vm12, %v2095_v41  ;;  %v4042_v41 = vld [vmem:[%s6625_s5 + $0x10] sm:$0xff] }
 0x4e2   : > { %v1712_v61 = vpop.permute.xlu0 %1711 }
 0x4e3   : > { %4086 = vmatpush.xpose.msk.msrb.mxu1 %vm938_vm12, %v1712_v61 }
 0x4e4   : > { %4068 = vmatmul.msk.f32.gmra.mxu2 %vm938_vm12, %v1460_v37  ;;  %v1470_v32 = vpop.permute.xlu1 %1469 }
 0x4e5   : > { %4130 = vmatpush.xpose.msk.msra.mxu2 %vm938_vm12, %v2093_v54  ;;  %v5378_v1 = vpop.f32.mrf.mxu3 }
 0x4e7   : > { %4087 = vmatpush.xpose.msk.msrb.mxu1 %vm938_vm12, %v1710_v62 }
 0x4e9   : > { %v2091_v10 = vpop.permute.xlu2 %2090 }
 0x4ea   : > { %4131 = vmatpush.xpose.msk.msra.mxu2 %vm938_vm12, %v2091_v10  ;;  %v1464_v60 = vpop.permute.xlu0 %1463 }
 0x4eb   : > { %4088 = vmatpush.xpose.msk.msrb.mxu1 %vm938_vm12, %v1708_v42 }
 0x4ec   : > { %4069 = vmatmul.msk.f32.gmra.mxu2 %vm938_vm12, %v1462_v35  ;;  %v4324_v53 = vpop.permute.xlu1 %4323 }
 0x4ed   : > { %v5383_v9 = vpop.f32.mrf.mxu3  ;;  %v4325_v62 = vunpack.i.l.bf16 %v4324_v53  ;;  %v4326_v36 = vunpack.i.h.bf16 %v4324_v53 }
 0x4ef   : > { %4089 = vmatpush.xpose.msk.msrb.mxu1 %vm938_vm12, %v1706_v8 }
 0x4f1   : > { %v2089_v63 = vpop.permute.xlu2 %2088 }
 0x4f2   : > { %4132 = vmatpush.xpose.msk.msra.mxu2 %vm938_vm12, %v2089_v63  ;;  %v1468_v52 = vpop.permute.xlu0 %1467 }
 0x4f3   : > { %4090 = vmatpush.xpose.msk.msrb.mxu1 %vm938_vm12, %v1704_v11 }
 0x4f4   : > { %4070 = vmatmul.msk.f32.gmra.mxu2 %vm938_vm12, %v1464_v60  ;;  %v4334_v2 = vpop.permute.xlu1 %4333  ;;  %v4058_v60 = vld [vmem:[%s6626_s6 + $0x50] sm:$0xff] }
 0x4f5   : > { %v5386_v57 = vpop.f32.mrf.mxu3  ;;  %v4335_v48 = vunpack.i.l.bf16 %v4334_v2  ;;  %v4336_v58 = vunpack.i.h.bf16 %v4334_v2 }
 0x4f7   : > { %4091 = vmatpush.xpose.msk.msrb.mxu1 %vm938_vm12, %v1702_v45 }
 0x4f9   : > { %v1698_v13 = vpop.permute.xlu2 %1697 }
 0x4fa   : > { %v1696_v0 = vpop.permute.xlu0 %1695 }
 0x4fb   : > { %4092 = vmatpush.xpose.msk.msrb.mxu1 %vm938_vm12, %v1700_v55 }
 0x4fc   : > { %4071 = vmatmul.msk.f32.gmra.mxu2 %vm938_vm12, %v1466_v56 }
 0x4fd   : > { %v5389_v56 = vpop.f32.mrf.mxu3 }
 0x4fe   : > { %4093 = vmatmul.msk.f32.vlgmr.msrb.gmra.mxu1 %vm938_vm12, %v1696_v0 }
 0x501   : > { %v2085_v34 = vpop.permute.xlu2 %2084 }
 0x502   : > { %v2087_v51 = vpop.permute.xlu0 %2086 }
 0x503   : > { %4133 = vmatpush.xpose.msk.msra.mxu2 %vm938_vm12, %v2087_v51 }
 0x504   : > { %4072 = vmatmul.msk.f32.gmra.mxu2 %vm938_vm12, %v1468_v52 }
 0x505   : > { %v5392_v44 = vpop.f32.mrf.mxu3 }
 0x506   : > { %4094 = vmatmul.msk.f32.gmra.mxu1 %vm938_vm12, %v1698_v13 }
 0x50a   : > { %v2083_v5 = vpop.permute.xlu0 %2082 }
 0x50c   : > { %4073 = vmatmul.msk.f32.gmra.mxu2 %vm938_vm12, %v1470_v32  ;;  %v4061_v32 = vld [vmem:[%s6626_s6 + $0x68] sm:$0xff] }
 0x512   : > { %v4319_v33 = vpop.permute.xlu0 %4318 }
 0x513   : > { %v4320_v50 = vunpack.i.l.bf16 %v4319_v33  ;;  %v4321_v35 = vunpack.i.h.bf16 %v4319_v33 }
 0x514   : > { %4134 = vmatmul.msk.f32.vlgmr.msra.gmra.mxu2 %vm938_vm12, %v2083_v5 }
 0x515   : > { %1431 = vmatpush.msrb.mxu0 %v4320_v50  ;;  %v4083_v50 = vld [vmem:[%s6625_s5 + $0x20] sm:$0xff] }
 0x517   : > { %1432 = vmatpush.msrb.mxu0 %v4321_v35 }
 0x519   : > { %1433 = vmatpush.msrb.mxu0 %v4325_v62  ;;  %v4060_v62 = vld [vmem:[%s6626_s6 + $0x60] sm:$0xff] }
 0x51a   : > { %v4329_v59 = vpop.permute.xlu0 %4328 }
 0x51b   : > { %1434 = vmatpush.msrb.mxu0 %v4326_v36  ;;  %v4330_v28 = vunpack.i.l.bf16 %v4329_v59  ;;  %v4331_v21 = vunpack.i.h.bf16 %v4329_v59  ;;  %v4043_v59 = vld [vmem:[%s6625_s5 + $0x18] sm:$0x1] }
 0x51c   : > { %4135 = vmatmul.msk.f32.gmra.mxu2 %vm938_vm12, %v2085_v34  ;;  %v4059_v34 = vld [vmem:[%s6626_s6 + $0x58] sm:$0xff] }
 0x51d   : > { %1435 = vmatpush.msrb.mxu0 %v4330_v28 }
 0x51f   : > { %1436 = vmatpush.msrb.mxu0 %v4331_v21 }
 0x521   : > { %1437 = vmatpush.msrb.mxu0 %v4335_v48 }
 0x522   : > { %v1861_v7 = vpop.permute.xlu0 %1860 }
 0x523   : > { %1438 = vmatpush.msrb.mxu0 %v4336_v58  ;;  %4105 = vmatpush.xpose.msk.msra.mxu1 %vm938_vm12, %v1861_v7 }
 0x52a   : > { %v1843_v7 = vpop.permute.xlu0 %1842 }
 0x534   : > { %v5394_v11 = vpop.f32.mrf.mxu3 }
 0x535   : > { %6654 = vst [vmem:[#allocation6_spill] sm:$0xff] %v5394_v11 }
 0x53c   : > { %v5396_v29 = vpop.f32.mrf.mxu3 }
 0x53d   : > { %6655 = vst [vmem:[#allocation7_spill] sm:$0xff] %v5396_v29 }
 0x544   : > { %v5398_v37 = vpop.f32.mrf.mxu3 }
 0x545   : > { %6656 = vst [vmem:[#allocation8_spill] sm:$0xff] %v5398_v37 }
 0x54c   : > { %v1365_v12 = vpop.f32.mrf.mxu3 }
 0x54d   : > { %v5403_v42 = vadd.f32 %v4042_v41, %v1365_v12  ;;  %v2246_v41 = vpop.permute.xlu0 %2245 }
 0x54f   : > { %v1371_v45 = vsel %vm880_vm11, %v5403_v42, -inf }
 0x550   : > { %1372 = vmax.xlane.f32.xlu0 %v1371_v45 }
 0x554   : > { %v1368_v28 = vpop.f32.mrf.mxu3 }
 0x555   : > { %v5460_v21 = vadd.f32 %v4043_v59, %v1368_v28  ;;  %v1845_v12 = vpop.permute.xlu0 %1844 }
 0x557   : > { %v1512_v8 = vpop.f32.mrf.mxu2  ;;  %v1374_v58 = vsel %vm987_vm13, %v5460_v21, -inf }
 0x558   : > { %v1513_v54 = vadd.f32 %v4056_v6, %v1512_v8 }
 0x55a   : > { %v1536_v46 = vsel %vm1147_vm14, %v1513_v54, -inf }
 0x55b   : > { %1537 = vmax.xlane.f32.xlu1 %v1536_v46 }
 0x55d   : > { %v2232_v45 = vpop.permute.xlu0 %2231 }
 0x55f   : > { %v1515_v55 = vpop.f32.mrf.mxu2 }
 0x560   : > { %v5414_v61 = vadd.f32 %v4057_v25, %v1515_v55 }
 0x562   : > { %v1539_v10 = vsel %vm1147_vm14, %v5414_v61, -inf }
 0x563   : > { %1540 = vmax.xlane.f32.xlu2 %v1539_v10 }
 0x565   : > { %v1847_v10 = vpop.permute.xlu0 %1846 }
 0x567   : > { %v1518_v63 = vpop.f32.mrf.mxu2 }
 0x568   : > { %v5421_v52 = vadd.f32 %v4058_v60, %v1518_v63 }
 0x56a   : > { %v1542_v0 = vsel %vm1147_vm14, %v5421_v52, -inf }
 0x56b   : > { %1543 = vmax.xlane.f32.xlu2 %v1542_v0 }
 0x56f   : > { %v1521_v51 = vpop.f32.mrf.mxu2 }
 0x570   : > { %v5458_v2 = vadd.f32 %v4059_v34, %v1521_v51 }
 0x572   : > { %v1545_v48 = vsel %vm1147_vm14, %v5458_v2, -inf }
 0x574   : > { %2247 = vrot.lane.b32.xlu1 %v5050_v18, %s4658_s29 }
 0x577   : > { %v1524_v13 = vpop.f32.mrf.mxu2 }
 0x578   : > { %v5448_v36 = vadd.f32 %v4060_v62, %v1524_v13 }
 0x57b   : > { %v1752_v35 = vpop.f32.mrf.mxu1 }
 0x57c   : > { %2229 = vrot.lane.b32.xlu1 %v5071_v24, %s4658_s29  ;;  %v5441_v18 = vadd.f32 %v4083_v50, %v1752_v35 }
 0x57e   : > { %v1758_v24 = vsel %vm880_vm11, %v5441_v18, -inf }
 0x57f   : > { %v1527_v5 = vpop.f32.mrf.mxu2 }
 0x580   : > { %v5432_v53 = vadd.f32 %v4061_v32, %v1527_v5  ;;  %v4062_v5 = vld [vmem:[%s6626_s6 + $0x70] sm:$0xff] }
 0x582   : > { %v1551_v33 = vsel %vm1147_vm14, %v5432_v53, -inf }
 0x583   : > { %1858 = vrot.lane.b32.xlu2 %v5040_v14, %s4657_s28  ;;  %1552 = vmax.xlane.f32.xlu0 %v1551_v33  ;;  %v1548_v14 = vsel %vm1147_vm14, %v5448_v36, -inf }
 0x587   : > { %v1530_v46 = vpop.f32.mrf.mxu2 }
 0x58b   : > { %1759 = vmax.xlane.f32.xlu0 %v1758_v24  ;;  %v5493_v24 = vadd.f32 %v4062_v5, %v1530_v46 }
 0x58d   : > { %v1554_v62 = vsel %vm1147_vm14, %v5493_v24, -inf }
 0x58f   : > { %v1533_v63 = vpop.f32.mrf.mxu2 }
 0x5a6   : > { %1549 = vmax.xlane.f32.xlu1 %v1548_v14 }
 0x5ac   : > { %1546 = vmax.xlane.f32.xlu2 %v1545_v48  ;;  %v4084_v48 = vld [vmem:[%s6625_s5 + $0x28] sm:$0x1] }
 0x5ae   : > { %1375 = vmax.xlane.f32.xlu1 %v1374_v58  ;;  %v1755_v58 = vpop.f32.mrf.mxu1 }
 0x5c3   : > { %v1373_v51 = vpop.xlane.xlu0 %1372 }
 0x5c4   : > { %2233 = vrot.lane.b32.xlu2 %v5082_v26, %s4658_s29  ;;  %v1377_v32 = vsub.f32 %v5403_v42, %v1373_v51 }
 0x5c6   : > { %v1379_v35 = vmul.f32 1.442695, %v1377_v32 }
 0x5c7   : > { %1848 = vrot.lane.b32.xlu1 %v5087_v43, %s4657_s28 }
 0x5ce   : > { %v1538_v6 = vpop.xlane.xlu1 %1537 }
 0x5cf   : > { %v1560_v8 = vsub.f32 %v1513_v54, %v1538_v6  ;;  %2235 = vrot.lane.b32.xlu1 %v5087_v43, %s4658_s29  ;;  %v4063_v54 = vld [vmem:[%s6626_s6 + $0x78] sm:$0xff] }
 0x5d0   : > { %v5481_v43 = vadd.f32 %v4063_v54, %v1533_v63 }
 0x5d1   : > { %v1568_v25 = vmul.f32 1.442695, %v1560_v8 }
 0x5d2   : > { %v1557_v13 = vsel %vm1147_vm14, %v5481_v43, -inf }
 0x5d3   : > { %4444 = vpow2.f32 %v1568_v25 }
 0x5d4   : > { %4446 = vpow2.f32 %v1379_v35 }
 0x5d6   : > { %v1541_v55 = vpop.xlane.xlu2 %1540 }
 0x5d7   : > { %1850 = vrot.lane.b32.xlu1 %v5092_v27, %s4657_s28  ;;  %v1561_v42 = vsub.f32 %v5414_v61, %v1541_v55 }
 0x5d9   : > { %v5474_v60 = vpop.eup %4444  ;;  %v1570_v14 = vmul.f32 1.442695, %v1561_v42 }
 0x5da   : > { %v1584_v26 = vsel %vm1147_vm14, %v5474_v60, 0.0  ;;  %v5508_v61 = vpop.eup %4446 }
 0x5db   : > { %1585 = vadd.xlane.f32.xlu0 %v1584_v26  ;;  %4448 = vpow2.f32 %v1570_v14  ;;  %v1383_v59 = vsel %vm880_vm11, %v5508_v61, 0.0 }
 0x5de   : > { %v5483_v0 = vpop.xlane.xlu2 %1543 }
 0x5e1   : > { %v5523_v28 = vpop.eup %4448 }
 0x5e3   : > { %1558 = vmax.xlane.f32.xlu0 %v1557_v13 }
 0x5e6   : > { %v1859_v33 = vpop.permute.xlu2 %1858  ;;  %v2248_v50 = vpop.permute.xlu1 %2247 }
 0x5e7   : > { %4106 = vmatpush.xpose.msk.msra.mxu1 %vm938_vm12, %v1859_v33  ;;  %4146 = vmatpush.xpose.msk.msrb.mxu2 %vm938_vm12, %v2248_v50 }
 0x5ea   : > { %4107 = vmatmul.msk.f32.vlgmr.msra.gmra.mxu1 %vm938_vm12, %v1843_v7  ;;  %v5532_v7 = vadd.f32 %v4084_v48, %v1755_v58  ;;  %v4125_v58 = vld [vmem:[%s6625_s5 + $0x38] sm:$0x1] }
 0x5eb   : > { %2630 = vmatpush.msrb.mxu1 %v5048_v17  ;;  %4147 = vmatpush.xpose.msk.msrb.mxu2 %vm938_vm12, %v2246_v41  ;;  %v1587_v41 = vsel %vm1147_vm14, %v5523_v28, 0.0 }
 0x5ed   : > { %2631 = vmatpush.msrb.mxu1 %v5052_v20  ;;  %1555 = vmax.xlane.f32.xlu2 %v1554_v62  ;;  %v2139_v62 = vpop.f32.mrf.mxu2 }
 0x5ee   : > { %v2230_v34 = vpop.permute.xlu1 %2229 }
 0x5ef   : > { %2804 = vmatpush.msra.mxu2 %v5048_v17  ;;  %2632 = vmatpush.msrb.mxu1 %v5060_v23 }
 0x5f0   : > { %4148 = vmatmul.msk.f32.vlgmr.msrb.gmra.mxu2 %vm938_vm12, %v2230_v34 }
 0x5f1   : > { %2805 = vmatpush.msra.mxu2 %v5052_v20  ;;  %2633 = vmatpush.msrb.mxu1 %v5063_v19 }
 0x5f2   : > { %4108 = vmatmul.msk.f32.gmra.mxu1 %vm938_vm12, %v1845_v12  ;;  %v1761_v12 = vsel %vm987_vm13, %v5532_v7, -inf }
 0x5f3   : > { %2806 = vmatpush.msra.mxu2 %v5060_v23  ;;  %2634 = vmatpush.msrb.mxu1 %v5148_v15 }
 0x5f5   : > { %2807 = vmatpush.msra.mxu2 %v5063_v19  ;;  %2635 = vmatpush.msrb.mxu1 %v5155_v38 }
 0x5f6   : > { %1384 = vadd.xlane.f32.xlu2 %v1383_v59  ;;  %v1553_v32 = vpop.xlane.xlu0 %1552 }
 0x5f7   : > { %2808 = vmatpush.msra.mxu2 %v5148_v15  ;;  %2636 = vmatpush.msrb.mxu1 %v5158_v39  ;;  %v1565_v33 = vsub.f32 %v5432_v53, %v1553_v32  ;;  %v4124_v53 = vld [vmem:[%s6625_s5 + $0x30] sm:$0xff] }
 0x5f8   : > { %4149 = vmatmul.msk.f32.gmra.mxu2 %vm938_vm12, %v2232_v45  ;;  %v5595_v34 = vadd.f32 %v4124_v53, %v2139_v62 }
 0x5f9   : > { %2809 = vmatpush.msra.mxu2 %v5155_v38  ;;  %2637 = vmatpush.msrb.mxu1 %v5161_v40  ;;  %v1578_v50 = vmul.f32 1.442695, %v1565_v33 }
 0x5fa   : > { %4109 = vmatmul.msk.f32.gmra.mxu1 %vm938_vm12, %v1847_v10  ;;  %v2145_v48 = vsel %vm880_vm11, %v5595_v34, -inf }
 0x5fb   : > { %2986 = vmatpush.msra.mxu1 %v5048_v17  ;;  %2810 = vmatpush.msra.mxu2 %v5158_v39 }
 0x5fd   : > { %2987 = vmatpush.msra.mxu1 %v5052_v20  ;;  %2811 = vmatpush.msra.mxu2 %v5161_v40 }
 0x5fe   : > { %1588 = vadd.xlane.f32.xlu2 %v1587_v41  ;;  %v2142_v41 = vpop.f32.mrf.mxu2 }
 0x5ff   : > { %3168 = vmatpush.msrb.mxu2 %v5048_v17  ;;  %2988 = vmatpush.msra.mxu1 %v5060_v23 }
 0x601   : > { %3169 = vmatpush.msrb.mxu2 %v5052_v20  ;;  %2989 = vmatpush.msra.mxu1 %v5063_v19 }
 0x602   : > { %1762 = vmax.xlane.f32.xlu1 %v1761_v12 }
 0x603   : > { %3170 = vmatpush.msrb.mxu2 %v5060_v23  ;;  %2990 = vmatpush.msra.mxu1 %v5148_v15 }
 0x605   : > { %3171 = vmatpush.msrb.mxu2 %v5063_v19  ;;  %2991 = vmatpush.msra.mxu1 %v5155_v38 }
 0x607   : > { %3172 = vmatpush.msrb.mxu2 %v5148_v15  ;;  %2992 = vmatpush.msra.mxu1 %v5158_v39 }
 0x609   : > { %3173 = vmatpush.msrb.mxu2 %v5155_v38  ;;  %2993 = vmatpush.msra.mxu1 %v5161_v40 }
 0x60b   : > { %3174 = vmatpush.msrb.mxu2 %v5158_v39 }
 0x60d   : > { %3175 = vmatpush.msrb.mxu2 %v5161_v40 }
 0x616   : > { %1852 = vrot.lane.b32.xlu2 %v5097_v30, %s4657_s28 }
 0x619   : > { %v1550_v45 = vpop.xlane.xlu1 %1549 }
 0x61a   : > { %v1564_v54 = vsub.f32 %v5448_v36, %v1550_v45 }
 0x61b   : > { %2239 = vrot.lane.b32.xlu1 %v5097_v30, %s4658_s29  ;;  %v1562_v30 = vsub.f32 %v5421_v52, %v5483_v0 }
 0x61c   : > { %v1576_v63 = vmul.f32 1.442695, %v1564_v54 }
 0x61f   : > { %v1547_v6 = vpop.xlane.xlu2 %1546 }
 0x620   : > { %v1563_v59 = vsub.f32 %v5458_v2, %v1547_v6 }
 0x621   : > { %v1376_v8 = vpop.xlane.xlu1 %1375 }
 0x622   : > { %v1378_v46 = vsub.f32 %v5460_v21, %v1376_v8  ;;  %v1572_v21 = vmul.f32 1.442695, %v1562_v30  ;;  %v1574_v12 = vmul.f32 1.442695, %v1563_v59  ;;  %v5603_v8 = vadd.f32 %v4125_v58, %v2142_v41  ;;  %v2590_v58 = vld [vmem:[#allocation2] sm:$0xff] }
 0x623   : > { %1854 = vrot.lane.b32.xlu1 %v5102_v31, %s4657_s28 }
 0x624   : > { %v1381_v25 = vmul.f32 1.442695, %v1378_v46  ;;  %v2148_v2 = vsel %vm987_vm13, %v5603_v8, -inf }
 0x626   : > { %4450 = vpow2.f32 %v1381_v25 }
 0x627   : > { %v2234_v55 = vpop.permute.xlu2 %2233  ;;  %4452 = vpow2.f32 %v1572_v21 }
 0x628   : > { %4150 = vmatmul.msk.f32.gmra.mxu2 %vm938_vm12, %v2234_v55  ;;  %4454 = vpow2.f32 %v1576_v63  ;;  %v1760_v55 = vpop.xlane.xlu0 %1759 }
 0x629   : > { %4456 = vpow2.f32 %v1578_v50  ;;  %v1764_v6 = vsub.f32 %v5441_v18, %v1760_v55 }
 0x62b   : > { %2241 = vrot.lane.b32.xlu1 %v5102_v31, %s4658_s29  ;;  %v1766_v21 = vmul.f32 1.442695, %v1764_v6 }
 0x62c   : > { %v5561_v10 = vpop.eup %4450 }
 0x62d   : > { %v1386_v26 = vsel %vm987_vm13, %v5561_v10, 0.0  ;;  %v5570_v13 = vpop.eup %4452 }
 0x62e   : > { %1387 = vadd.xlane.f32.xlu0 %v1386_v26  ;;  %v1590_v31 = vsel %vm1147_vm14, %v5570_v13, 0.0  ;;  %v5575_v0 = vpop.eup %4454 }
 0x62f   : > { %v1596_v36 = vsel %vm1147_vm14, %v5575_v0, 0.0  ;;  %v5584_v35 = vpop.eup %4456 }
 0x630   : > { %v1599_v42 = vsel %vm1147_vm14, %v5584_v35, 0.0 }
 0x633   : > { %1856 = vrot.lane.b32.xlu1 %v5107_v16, %s4657_s28  ;;  %s4659_s28 = smov 48  }
 0x639   : > { %v1849_v51 = vpop.permute.xlu1 %1848 }
 0x63a   : > { %4110 = vmatmul.msk.f32.gmra.mxu1 %vm938_vm12, %v1849_v51 }
 0x63f   : > { %1591 = vadd.xlane.f32.xlu2 %v1590_v31 }
 0x641   : > { %v2236_v52 = vpop.permute.xlu1 %2235 }
 0x642   : > { %4151 = vmatmul.msk.f32.gmra.mxu2 %vm938_vm12, %v2236_v52  ;;  %2237 = vrot.lane.b32.xlu0 %v5092_v27, %s4658_s29 }
 0x647   : > { %1597 = vadd.xlane.f32.xlu2 %v1596_v36 }
 0x649   : > { %v1851_v5 = vpop.permute.xlu1 %1850 }
 0x64a   : > { %4111 = vmatmul.msk.f32.gmra.mxu1 %vm938_vm12, %v1851_v5 }
 0x64e   : > { %v5620_v51 = vpop.xlane.xlu0 %1585 }
 0x656   : > { %v1559_v36 = vpop.xlane.xlu0 %1558 }
 0x657   : > { %v1567_v33 = vsub.f32 %v5481_v43, %v1559_v36 }
 0x65d   : > { %1600 = vadd.xlane.f32.xlu1 %v1599_v42 }
 0x65f   : > { %4338 = vrot.lane.b32.xlu2 %v5029_v4, %s4659_s28 }
 0x660   : > { %v5590_v27 = vpop.xlane.xlu2 %1555 }
 0x661   : > { %v1566_v41 = vsub.f32 %v5493_v24, %v5590_v27 }
 0x667   : > { %v1899_v6 = vpop.f32.mrf.mxu1 }
 0x669   : > { %v1385_v14 = vpop.xlane.xlu2 %1384 }
 0x66a   : > { %4458 = vrcp.f32 %v1385_v14 }
 0x66b   : > { %4460 = vpow2.f32 %v1574_v12 }
 0x66c   : > { %2146 = vmax.xlane.f32.xlu0 %v2145_v48  ;;  %4462 = vpow2.f32 %v1766_v21 }
 0x670   : > { %v4459_v45 = vpop.eup %4458 }
 0x671   : > { %v5605_v46 = vpop.xlane.xlu2 %1588  ;;  %v1391_v25 = vmul.f32 %v4459_v45, %v5508_v61  ;;  %v5614_v30 = vpop.eup %4460 }
 0x672   : > { %v1593_v54 = vsel %vm1147_vm14, %v5614_v30, 0.0  ;;  %v5622_v31 = vpop.eup %4462 }
 0x673   : > { %4054 = vmatmul.msk.f32.vlgmr.msrb.gmra.mxu0 %vm880_vm11, %v1391_v25  ;;  %v1770_v52 = vsel %vm880_vm11, %v5622_v31, 0.0 }
 0x674   : > { %2149 = vmax.xlane.f32.xlu0 %v2148_v2  ;;  %v4097_v2 = vld [vmem:[%s6626_s6 + $0x80] sm:$0xff] }
 0x675   : > { %v1763_v61 = vpop.xlane.xlu1 %1762 }
 0x676   : > { %4348 = vrot.lane.b32.xlu1 %v5121_v47, %s4659_s28  ;;  %v1765_v63 = vsub.f32 %v5532_v7, %v1763_v61  ;;  %v1582_v7 = vmul.f32 1.442695, %v1567_v33 }
 0x678   : > { %v1768_v18 = vmul.f32 1.442695, %v1765_v63  ;;  %v1902_v63 = vpop.f32.mrf.mxu1 }
 0x679   : > { %v1853_v26 = vpop.permute.xlu2 %1852 }
 0x67a   : > { %4112 = vmatmul.msk.f32.gmra.mxu1 %vm938_vm12, %v1853_v26  ;;  %4464 = vpow2.f32 %v1768_v18  ;;  %v5676_v26 = vadd.f32 %v4097_v2, %v1899_v6 }
 0x67b   : > { %4466 = vpow2.f32 %v1582_v7  ;;  %v2286_v7 = vpop.f32.mrf.mxu2 }
 0x67c   : > { %1594 = vadd.xlane.f32.xlu0 %v1593_v54  ;;  %v1923_v61 = vsel %vm1147_vm14, %v5676_v26, -inf }
 0x680   : > { %v5626_v32 = vpop.eup %4464  ;;  %v1905_v36 = vpop.f32.mrf.mxu1 }
 0x681   : > { %v1773_v50 = vsel %vm987_vm13, %v5626_v32, 0.0  ;;  %v5636_v62 = vpop.eup %4466 }
 0x682   : > { %v1605_v43 = vsel %vm1147_vm14, %v5636_v62, 0.0 }
 0x688   : > { %1771 = vadd.xlane.f32.xlu2 %v1770_v52 }
 0x68d   : > { %v2240_v5 = vpop.permute.xlu1 %2239 }
 0x690   : > { %1774 = vadd.xlane.f32.xlu2 %v1773_v50  ;;  %2243 = vrot.lane.b32.xlu0 %v5107_v16, %s4658_s29  ;;  %s4660_s29 = smov 40  }
 0x695   : > { %v1855_v42 = vpop.permute.xlu1 %1854 }
 0x696   : > { %4113 = vmatmul.msk.f32.gmra.mxu1 %vm938_vm12, %v1855_v42 }
 0x698   : > { %4343 = vrot.lane.b32.xlu0 %v5022_v3, %s4659_s28 }
 0x69d   : > { %v2242_v53 = vpop.permute.xlu1 %2241 }
 0x6a0   : > { %1606 = vadd.xlane.f32.xlu1 %v1605_v43 }
 0x6a1   : > { %v1388_v14 = vpop.xlane.xlu0 %1387 }
 0x6a2   : > { %4468 = vrcp.f32 %v1388_v14  ;;  %v4138_v14 = vld [vmem:[%s6626_s6 + $0xc0] sm:$0xff] }
 0x6a5   : > { %v1857_v59 = vpop.permute.xlu1 %1856 }
 0x6a6   : > { %4114 = vmatmul.msk.f32.gmra.mxu1 %vm938_vm12, %v1857_v59  ;;  %v5700_v59 = vadd.f32 %v4138_v14, %v2286_v7  ;;  %v4103_v7 = vld [vmem:[%s6626_s6 + $0xb0] sm:$0xff] }
 0x6a8   : > { %4358 = vrot.lane.b32.xlu2 %v5029_v4, %s4660_s29  ;;  %v4469_v16 = vpop.eup %4468  ;;  %v1580_v4 = vmul.f32 1.442695, %v1566_v41  ;;  %v4139_v41 = vld [vmem:[%s6626_s6 + $0xc8] sm:$0xff] }
 0x6a9   : > { %v1392_v48 = vmul.f32 %v4469_v16, %v5561_v10 }
 0x6aa   : > { %4470 = vpow2.f32 %v1580_v4  ;;  %v2289_v4 = vpop.f32.mrf.mxu2 }
 0x6ab   : > { %4055 = vmatmul.msk.f32.gmra.mxu0 %vm880_vm11, %v1392_v48  ;;  %v2310_v48 = vsel %vm1147_vm14, %v5700_v59, -inf }
 0x6ae   : > { %4165 = vmatmul.msk.f32.vlgmr.msrb.gmra.mxu1 %vm880_vm11, %v2590_v58 }
 0x6af   : > { %3350 = vmatpush.msrb.mxu1 %v5048_v17 }
 0x6b0   : > { %4368 = vrot.lane.b32.xlu2 %v5121_v47, %s4660_s29  ;;  %v5666_v24 = vpop.eup %4470 }
 0x6b1   : > { %3351 = vmatpush.msrb.mxu1 %v5052_v20  ;;  %v1602_v45 = vsel %vm1147_vm14, %v5666_v24, 0.0 }
 0x6b2   : > { %v5652_v12 = vpop.xlane.xlu2 %1591 }
 0x6b3   : > { %3352 = vmatpush.msrb.mxu1 %v5060_v23 }
 0x6b4   : > { %v2238_v10 = vpop.permute.xlu0 %2237 }
 0x6b5   : > { %3353 = vmatpush.msrb.mxu1 %v5063_v19  ;;  %4152 = vmatmul.msk.f32.gmra.mxu2 %vm938_vm12, %v2238_v10 }
 0x6b7   : > { %3354 = vmatpush.msrb.mxu1 %v5148_v15  ;;  %v1908_v42 = vpop.f32.mrf.mxu1 }
 0x6b8   : > { %4373 = vrot.lane.b32.xlu2 %v5127_v49, %s4660_s29 }
 0x6b9   : > { %3355 = vmatpush.msrb.mxu1 %v5155_v38 }
 0x6ba   : > { %v5661_v47 = vpop.xlane.xlu2 %1597 }
 0x6bb   : > { %3356 = vmatpush.msrb.mxu1 %v5158_v39 }
 0x6bd   : > { %3357 = vmatpush.msrb.mxu1 %v5161_v40  ;;  %4153 = vmatmul.msk.f32.gmra.mxu2 %vm938_vm12, %v2240_v5 }
 0x6c2   : > { %v4339_v27 = vpop.permute.xlu2 %4338  ;;  %1603 = vadd.xlane.f32.xlu0 %v1602_v45 }
 0x6c3   : > { %v4340_v25 = vunpack.i.l.bf16 %v4339_v27  ;;  %v4341_v55 = vunpack.i.h.bf16 %v4339_v27  ;;  %v5712_v27 = vadd.f32 %v4139_v41, %v2289_v4  ;;  %v4141_v41 = vld [vmem:[%s6626_s6 + $0xd8] sm:$0xff] }
 0x6c5   : > { %1818 = vmatpush.msrb.mxu3 %v4340_v25  ;;  %4154 = vmatmul.msk.f32.gmra.mxu2 %vm938_vm12, %v2242_v53  ;;  %v4099_v25 = vld [vmem:[%s6626_s6 + $0x90] sm:$0xff] }
 0x6c6   : > { %v5719_v6 = vadd.f32 %v4099_v25, %v1905_v36 }
 0x6c7   : > { %1819 = vmatpush.msrb.mxu3 %v4341_v55  ;;  %v1911_v16 = vpop.f32.mrf.mxu1 }
 0x6c8   : > { %v1929_v36 = vsel %vm1147_vm14, %v5719_v6, -inf }
 0x6d0   : > { %v5710_v10 = vpop.xlane.xlu1 %1600 }
 0x6d6   : > { %4353 = vrot.lane.b32.xlu0 %v5127_v49, %s4659_s28 }
 0x6de   : > { %4363 = vrot.lane.b32.xlu0 %v5022_v3, %s4660_s29  ;;  %v4098_v3 = vld [vmem:[%s6626_s6 + $0x88] sm:$0xff]  ;;  %s4661_s29 = smov 8  }
 0x6df   : > { %v2147_v21 = vpop.xlane.xlu0 %2146  ;;  %v5691_v50 = vadd.f32 %v4098_v3, %v1902_v63  ;;  %v2292_v63 = vpop.f32.mrf.mxu2 }
 0x6e0   : > { %v2151_v33 = vsub.f32 %v5595_v34, %v2147_v21 }
 0x6e1   : > { %1924 = vmax.xlane.f32.xlu2 %v1923_v61  ;;  %v1926_v43 = vsel %vm1147_vm14, %v5691_v50, -inf  ;;  %v2313_v61 = vsel %vm1147_vm14, %v5712_v27, -inf }
 0x6e7   : > { %v2150_v54 = vpop.xlane.xlu0 %2149  ;;  %v2295_v4 = vpop.f32.mrf.mxu2 }
 0x6e8   : > { %v2152_v18 = vsub.f32 %v5603_v8, %v2150_v54  ;;  %v2153_v8 = vmul.f32 1.442695, %v2151_v33  ;;  %v4140_v54 = vld [vmem:[%s6626_s6 + $0xd0] sm:$0xff]  ;;  %v4100_v33 = vld [vmem:[%s6626_s6 + $0x98] sm:$0xff] }
 0x6e9   : > { %v5736_v14 = vadd.f32 %v4100_v33, %v1908_v42 }
 0x6ea   : > { %v2155_v49 = vmul.f32 1.442695, %v2152_v18  ;;  %v4349_v18 = vpop.permute.xlu1 %4348 }
 0x6eb   : > { %v4350_v3 = vunpack.i.l.bf16 %v4349_v18  ;;  %v1932_v42 = vsel %vm1147_vm14, %v5736_v14, -inf }
 0x6ec   : > { %4472 = vpow2.f32 %v2155_v49 }
 0x6ed   : > { %4474 = vpow2.f32 %v2153_v8  ;;  %v4351_v8 = vunpack.i.h.bf16 %v4349_v18 }
 0x6ee   : > { %4476 = vrcp.f32 %v5620_v51 }
 0x6ef   : > { %v5693_v53 = vpop.xlane.xlu0 %1594  ;;  %4478 = vrcp.f32 %v5605_v46  ;;  %v4142_v46 = vld [vmem:[%s6626_s6 + $0xe0] sm:$0xff] }
 0x6f0   : > { %4480 = vrcp.f32 %v5652_v12 }
 0x6f1   : > { %4482 = vrcp.f32 %v5693_v53 }
 0x6f2   : > { %v5683_v52 = vpop.eup %4472  ;;  %4484 = vrcp.f32 %v5661_v47 }
 0x6f3   : > { %v2160_v5 = vsel %vm987_vm13, %v5683_v52, 0.0  ;;  %v5705_v58 = vpop.eup %4474 }
 0x6f4   : > { %2161 = vadd.xlane.f32.xlu1 %v2160_v5  ;;  %v2157_v45 = vsel %vm880_vm11, %v5705_v58, 0.0  ;;  %v5726_v5 = vadd.f32 %v4140_v54, %v2292_v63 }
 0x6f7   : > { %v1914_v55 = vpop.f32.mrf.mxu1 }
 0x6fc   : > { %1927 = vmax.xlane.f32.xlu1 %v1926_v43 }
 0x702   : > { %v2244_v34 = vpop.permute.xlu0 %2243 }
 0x703   : > { %4155 = vmatmul.msk.f32.gmra.mxu2 %vm938_vm12, %v2244_v34 }
 0x704   : > { %2311 = vmax.xlane.f32.xlu1 %v2310_v48  ;;  %v2316_v48 = vsel %vm1147_vm14, %v5726_v5, -inf }
 0x708   : > { %2158 = vadd.xlane.f32.xlu0 %v2157_v45  ;;  %v1772_v45 = vpop.xlane.xlu2 %1771 }
 0x709   : > { %4486 = vrcp.f32 %v1772_v45 }
 0x70a   : > { %v4344_v2 = vpop.permute.xlu0 %4343  ;;  %4488 = vrcp.f32 %v5710_v10 }
 0x70b   : > { %v4345_v21 = vunpack.i.l.bf16 %v4344_v2  ;;  %v4346_v49 = vunpack.i.h.bf16 %v4344_v2  ;;  %v5747_v2 = vadd.f32 %v4141_v41, %v2295_v4 }
 0x70c   : > { %2314 = vmax.xlane.f32.xlu1 %v2313_v61 }
 0x70d   : > { %1820 = vmatpush.msrb.mxu3 %v4345_v21  ;;  %v4101_v21 = vld [vmem:[%s6626_s6 + $0xa0] sm:$0xff]  ;;  %v2319_v54 = vsel %vm1147_vm14, %v5747_v2, -inf }
 0x70e   : > { %v5754_v61 = vadd.f32 %v4101_v21, %v1911_v16 }
 0x70f   : > { %1821 = vmatpush.msrb.mxu3 %v4346_v49  ;;  %v1440_v49 = vpop.f32.mrf.mxu0 }
 0x710   : > { %1930 = vmax.xlane.f32.xlu0 %v1929_v36  ;;  %v1775_v63 = vpop.xlane.xlu2 %1774  ;;  %v1935_v18 = vsel %vm1147_vm14, %v5754_v61, -inf  ;;  %v4104_v36 = vld [vmem:[%s6626_s6 + $0xb8] sm:$0xff] }
 0x711   : > { %1822 = vmatpush.msrb.mxu3 %v4350_v3  ;;  %v4102_v3 = vld [vmem:[%s6626_s6 + $0xa8] sm:$0xff]  ;;  %4490 = vrcp.f32 %v1775_v63 }
 0x712   : > { %v5767_v33 = vadd.f32 %v4102_v3, %v1914_v55 }
 0x713   : > { %v1917_v43 = vpop.f32.mrf.mxu1  ;;  %1823 = vmatpush.msrb.mxu3 %v4351_v8 }
 0x714   : > { %v5738_v34 = vadd.f32 %v4103_v7, %v1917_v43  ;;  %2317 = vmax.xlane.f32.xlu1 %v2316_v48  ;;  %v4477_v43 = vpop.eup %4476  ;;  %v1938_v48 = vsel %vm1147_vm14, %v5767_v33, -inf }
 0x715   : > { %v1616_v51 = vmul.f32 %v4477_v43, %v5474_v60 }
 0x716   : > { %v1941_v25 = vsel %vm1147_vm14, %v5738_v34, -inf }
 0x717   : > { %1942 = vmax.xlane.f32.xlu2 %v1941_v25 }
 0x718   : > { %1933 = vmax.xlane.f32.xlu0 %v1932_v42  ;;  %v4359_v41 = vpop.permute.xlu2 %4358  ;;  %v4479_v42 = vpop.eup %4478 }
 0x719   : > { %v4360_v55 = vunpack.i.l.bf16 %v4359_v41  ;;  %v4361_v25 = vunpack.i.h.bf16 %v4359_v41  ;;  %v1617_v21 = vmul.f32 %v4479_v42, %v5523_v28  ;;  %v4143_v28 = vld [vmem:[%s6626_s6 + $0xe8] sm:$0xff] }
 0x71c   : > { %2320 = vmax.xlane.f32.xlu1 %v2319_v54  ;;  %v4481_v54 = vpop.eup %4480 }
 0x71d   : > { %v4483_v12 = vpop.eup %4482 }
 0x71e   : > { %v4485_v41 = vpop.eup %4484 }
 0x71f   : > { %v4487_v47 = vpop.eup %4486  ;;  %v1620_v45 = vmul.f32 %v4485_v41, %v5575_v0 }
 0x720   : > { %1936 = vmax.xlane.f32.xlu0 %v1935_v18  ;;  %v4369_v53 = vpop.permute.xlu2 %4368  ;;  %v4489_v10 = vpop.eup %4488 }
 0x721   : > { %v1621_v63 = vmul.f32 %v4489_v10, %v5584_v35 }
 0x723   : > { %v1920_v16 = vpop.f32.mrf.mxu1 }
 0x724   : > { %v5769_v7 = vadd.f32 %v4104_v36, %v1920_v16 }
 0x726   : > { %v1944_v8 = vsel %vm1147_vm14, %v5769_v7, -inf }
 0x727   : > { %1945 = vmax.xlane.f32.xlu2 %v1944_v8 }
 0x728   : > { %v1443_v4 = vpop.f32.mrf.mxu0  ;;  %1939 = vmax.xlane.f32.xlu0 %v1938_v48  ;;  %v4144_v48 = vld [vmem:[%s6626_s6 + $0xf0] sm:$0xff] }
 0x729   : > { %4074 = vmatpush.msk.msra.mxu0 %vm1260_vm15, %v1443_v4 }
 0x72b   : > { %1666 = vmatpush.msra.mxu0 %v1440_v49  ;;  %v1618_v49 = vmul.f32 %v4481_v54, %v5570_v13  ;;  %v1619_v13 = vmul.f32 %v4483_v12, %v5614_v30  ;;  %v4370_v12 = vunpack.i.l.bf16 %v4369_v53 }
 0x72c   : > { %4075 = vmatmul.msk.f32.vlgmr.msra.gmra.mxu0 %vm1147_vm14, %v1616_v51 }
 0x72d   : > { %2205 = vmatpush.msrb.mxu0 %v4360_v55 }
 0x72f   : > { %2206 = vmatpush.msrb.mxu0 %v4361_v25  ;;  %v4374_v25 = vpop.permute.xlu2 %4373 }
 0x730   : > { %v4375_v35 = vunpack.i.l.bf16 %v4374_v25 }
 0x734   : > { %4076 = vmatmul.msk.f32.gmra.mxu0 %vm1147_vm14, %v1617_v21 }
 0x735   : > { %v1604_v36 = vpop.xlane.xlu0 %1603 }
 0x736   : > { %4492 = vrcp.f32 %v1604_v36  ;;  %v4371_v36 = vunpack.i.h.bf16 %v4369_v53 }
 0x738   : > { %v2298_v60 = vpop.f32.mrf.mxu2 }
 0x739   : > { %v5786_v18 = vadd.f32 %v4142_v46, %v2298_v60  ;;  %v1778_v46 = vmul.f32 %v4487_v47, %v5622_v31  ;;  %v4491_v60 = vpop.eup %4490 }
 0x73a   : > { %v1779_v31 = vmul.f32 %v4491_v60, %v5626_v32 }
 0x73b   : > { %v2322_v3 = vsel %vm1147_vm14, %v5786_v18, -inf }
 0x73c   : > { %4077 = vmatmul.msk.f32.gmra.mxu0 %vm1147_vm14, %v1618_v49  ;;  %2323 = vmax.xlane.f32.xlu1 %v2322_v3 }
 0x740   : > { %v2301_v16 = vpop.f32.mrf.mxu2 }
 0x741   : > { %v5796_v8 = vadd.f32 %v4143_v28, %v2301_v16  ;;  %v1607_v16 = vpop.xlane.xlu1 %1606 }
 0x743   : > { %v2325_v43 = vsel %vm1147_vm14, %v5796_v8, -inf }
 0x744   : > { %2326 = vmax.xlane.f32.xlu0 %v2325_v43  ;;  %4078 = vmatmul.msk.f32.gmra.mxu0 %vm1147_vm14, %v1619_v13  ;;  %v4493_v43 = vpop.eup %4492 }
 0x748   : > { %v2304_v4 = vpop.f32.mrf.mxu2  ;;  %v4354_v51 = vpop.permute.xlu0 %4353 }
 0x749   : > { %v5806_v55 = vadd.f32 %v4144_v48, %v2304_v4  ;;  %v4355_v30 = vunpack.i.l.bf16 %v4354_v51  ;;  %v4356_v42 = vunpack.i.h.bf16 %v4354_v51  ;;  %v1622_v48 = vmul.f32 %v4493_v43, %v5666_v24 }
 0x74b   : > { %1824 = vmatpush.msrb.mxu3 %v4355_v30  ;;  %v2328_v21 = vsel %vm1147_vm14, %v5806_v55, -inf }
 0x74c   : > { %2329 = vmax.xlane.f32.xlu0 %v2328_v21  ;;  %4079 = vmatmul.msk.f32.gmra.mxu0 %vm1147_vm14, %v1620_v45 }
 0x74d   : > { %1825 = vmatpush.msrb.mxu3 %v4356_v42 }
 0x74e   : > { %4095 = vmatmul.msk.f32.vlgmr.msrb.gmra.mxu3 %vm880_vm11, %v1778_v46 }
 0x750   : > { %v4364_v54 = vpop.permute.xlu0 %4363 }
 0x751   : > { %v4365_v0 = vunpack.i.l.bf16 %v4364_v54  ;;  %v4366_v49 = vunpack.i.h.bf16 %v4364_v54 }
 0x753   : > { %2207 = vmatpush.msrb.mxu0 %v4365_v0 }
 0x754   : > { %v1925_v3 = vpop.xlane.xlu2 %1924  ;;  %4080 = vmatmul.msk.f32.gmra.mxu0 %vm1147_vm14, %v1621_v63 }
 0x755   : > { %v1947_v28 = vsub.f32 %v5676_v26, %v1925_v3  ;;  %2208 = vmatpush.msrb.mxu0 %v4366_v49  ;;  %v4376_v26 = vunpack.i.h.bf16 %v4374_v25 }
 0x756   : > { %4096 = vmatmul.msk.f32.gmra.mxu3 %vm880_vm11, %v1779_v31 }
 0x757   : > { %v1955_v13 = vmul.f32 1.442695, %v1947_v28  ;;  %2209 = vmatpush.msrb.mxu0 %v4370_v12  ;;  %v4145_v28 = vld [vmem:[%s6626_s6 + $0xf8] sm:$0xff] }
 0x759   : > { %4494 = vpow2.f32 %v1955_v13  ;;  %2210 = vmatpush.msrb.mxu0 %v4371_v36 }
 0x75a   : > { %4496 = vrcp.f32 %v1607_v16 }
 0x75b   : > { %2211 = vmatpush.msrb.mxu0 %v4375_v35 }
 0x75c   : > { %4081 = vmatmul.msk.f32.gmra.mxu0 %vm1147_vm14, %v1622_v48 }
 0x75d   : > { %2212 = vmatpush.msrb.mxu0 %v4376_v26 }
 0x75f   : > { %v5821_v32 = vpop.eup %4494 }
 0x760   : > { %v4497_v41 = vpop.eup %4496  ;;  %v1971_v4 = vsel %vm1147_vm14, %v5821_v32, 0.0 }
 0x761   : > { %1972 = vadd.xlane.f32.xlu1 %v1971_v4  ;;  %v1623_v53 = vmul.f32 %v4497_v41, %v5636_v62 }
 0x764   : > { %4082 = vmatmul.msk.f32.gmra.mxu0 %vm1147_vm14, %v1623_v53 }
 0x767   : > { %v2162_v51 = vpop.xlane.xlu1 %2161 }
 0x76f   : > { %v1928_v47 = vpop.xlane.xlu1 %1927 }
 0x770   : > { %v1948_v24 = vsub.f32 %v5691_v50, %v1928_v47 }
 0x772   : > { %v1957_v30 = vmul.f32 1.442695, %v1948_v24 }
 0x774   : > { %4498 = vpow2.f32 %v1957_v30 }
 0x777   : > { %v2312_v45 = vpop.xlane.xlu1 %2311 }
 0x778   : > { %v2334_v25 = vsub.f32 %v5700_v59, %v2312_v45 }
 0x77a   : > { %v5829_v42 = vpop.eup %4498  ;;  %v2342_v21 = vmul.f32 1.442695, %v2334_v25 }
 0x77b   : > { %v2159_v46 = vpop.xlane.xlu0 %2158  ;;  %v1974_v10 = vsel %vm1147_vm14, %v5829_v42, 0.0 }
 0x77c   : > { %4500 = vpow2.f32 %v2342_v21  ;;  %1975 = vadd.xlane.f32.xlu1 %v1974_v10 }
 0x77d   : > { %4502 = vrcp.f32 %v2159_v46 }
 0x77e   : > { %4504 = vrcp.f32 %v2162_v51 }
 0x77f   : > { %v2315_v62 = vpop.xlane.xlu1 %2314 }
 0x780   : > { %v2335_v54 = vsub.f32 %v5712_v27, %v2315_v62 }
 0x782   : > { %v5834_v60 = vpop.eup %4500  ;;  %v2344_v50 = vmul.f32 1.442695, %v2335_v54 }
 0x783   : > { %v4503_v0 = vpop.eup %4502  ;;  %v1931_v63 = vpop.xlane.xlu0 %1930  ;;  %v2358_v59 = vsel %vm1147_vm14, %v5834_v60, 0.0 }
 0x784   : > { %v2165_v49 = vmul.f32 %v4503_v0, %v5705_v58  ;;  %4506 = vpow2.f32 %v2344_v50  ;;  %v1949_v3 = vsub.f32 %v5719_v6, %v1931_v63  ;;  %2359 = vadd.xlane.f32.xlu2 %v2358_v59  ;;  %v4505_v43 = vpop.eup %4504 }
 0x785   : > { %v2166_v41 = vmul.f32 %v4505_v43, %v5683_v52 }
 0x786   : > { %v1959_v27 = vmul.f32 1.442695, %v1949_v3  ;;  %4136 = vmatmul.msk.f32.vlgmr.msrb.gmra.mxu0 %vm880_vm11, %v2165_v49  ;;  %v2307_v31 = vpop.f32.mrf.mxu2 }
 0x787   : > { %v5844_v12 = vadd.f32 %v4145_v28, %v2307_v31  ;;  %v2318_v16 = vpop.xlane.xlu1 %2317 }
 0x788   : > { %4508 = vpow2.f32 %v1959_v27  ;;  %v2336_v13 = vsub.f32 %v5726_v5, %v2318_v16 }
 0x789   : > { %v2331_v58 = vsel %vm1147_vm14, %v5844_v12, -inf }
 0x78a   : > { %v5849_v6 = vpop.eup %4506  ;;  %v2346_v36 = vmul.f32 1.442695, %v2336_v13  ;;  %2332 = vmax.xlane.f32.xlu0 %v2331_v58  ;;  %v1943_v30 = vpop.xlane.xlu2 %1942 }
 0x78b   : > { %v1934_v35 = vpop.xlane.xlu0 %1933  ;;  %v2361_v48 = vsel %vm1147_vm14, %v5849_v6, 0.0  ;;  %v1953_v21 = vsub.f32 %v5738_v34, %v1943_v30 }
 0x78c   : > { %v1950_v26 = vsub.f32 %v5736_v14, %v1934_v35  ;;  %2362 = vadd.xlane.f32.xlu2 %v2361_v48  ;;  %4510 = vpow2.f32 %v2346_v36 }
 0x78d   : > { %v1967_v62 = vmul.f32 1.442695, %v1953_v21 }
 0x78e   : > { %v5855_v4 = vpop.eup %4508  ;;  %v1961_v5 = vmul.f32 1.442695, %v1950_v26  ;;  %4137 = vmatmul.msk.f32.gmra.mxu0 %vm880_vm11, %v2166_v41 }
 0x78f   : > { %v2321_v53 = vpop.xlane.xlu1 %2320  ;;  %v1977_v51 = vsel %vm1147_vm14, %v5855_v4, 0.0 }
 0x790   : > { %4512 = vpow2.f32 %v1961_v5  ;;  %v2337_v47 = vsub.f32 %v5747_v2, %v2321_v53  ;;  %1978 = vadd.xlane.f32.xlu1 %v1977_v51 }
 0x792   : > { %v2348_v24 = vmul.f32 1.442695, %v2337_v47  ;;  %v5861_v45 = vpop.eup %4510 }
 0x793   : > { %v1937_v14 = vpop.xlane.xlu0 %1936  ;;  %v2364_v10 = vsel %vm1147_vm14, %v5861_v45, 0.0 }
 0x794   : > { %v1951_v52 = vsub.f32 %v5754_v61, %v1937_v14  ;;  %4514 = vpow2.f32 %v2348_v24 }
 0x796   : > { %v5864_v25 = vpop.eup %4512  ;;  %v1963_v46 = vmul.f32 1.442695, %v1951_v52 }
 0x797   : > { %v1980_v2 = vsel %vm1147_vm14, %v5864_v25, 0.0 }
 0x798   : > { %4516 = vpow2.f32 %v1963_v46  ;;  %2365 = vadd.xlane.f32.xlu1 %v2364_v10  ;;  %1981 = vadd.xlane.f32.xlu0 %v1980_v2 }
 0x799   : > { %4518 = vpow2.f32 %v1967_v62 }
 0x79a   : > { %v5871_v50 = vpop.eup %4514  ;;  %v1946_v27 = vpop.xlane.xlu2 %1945 }
 0x79b   : > { %v1940_v54 = vpop.xlane.xlu0 %1939  ;;  %v2367_v63 = vsel %vm1147_vm14, %v5871_v50, 0.0  ;;  %v1954_v13 = vsub.f32 %v5769_v7, %v1946_v27 }
 0x79c   : > { %v1952_v61 = vsub.f32 %v5767_v33, %v1940_v54 }
 0x79d   : > { %v1969_v36 = vmul.f32 1.442695, %v1954_v13 }
 0x79e   : > { %v5874_v0 = vpop.eup %4516  ;;  %v1965_v34 = vmul.f32 1.442695, %v1952_v61 }
 0x79f   : > { %v1983_v59 = vsel %vm1147_vm14, %v5874_v0, 0.0  ;;  %v5880_v49 = vpop.eup %4518 }
 0x7a0   : > { %4520 = vpow2.f32 %v1965_v34  ;;  %2368 = vadd.xlane.f32.xlu0 %v2367_v63  ;;  %1984 = vadd.xlane.f32.xlu2 %v1983_v59  ;;  %v1989_v33 = vsel %vm1147_vm14, %v5880_v49, 0.0 }
 0x7a6   : > { %v5882_v3 = vpop.eup %4520 }
 0x7a7   : > { %v1986_v28 = vsel %vm1147_vm14, %v5882_v3, 0.0 }
 0x7a8   : > { %1990 = vadd.xlane.f32.xlu0 %v1989_v33  ;;  %1987 = vadd.xlane.f32.xlu1 %v1986_v28 }
 0x7a9   : > { %v1668_v58 = vpop.f32.mrf.mxu0 }
 0x7af   : > { %v2324_v31 = vpop.xlane.xlu1 %2323 }
 0x7b0   : > { %v2338_v16 = vsub.f32 %v5786_v18, %v2324_v31 }
 0x7b1   : > { %v1671_v53 = vpop.f32.mrf.mxu0 }
 0x7b2   : > { %v2350_v43 = vmul.f32 1.442695, %v2338_v16 }
 0x7b4   : > { %4522 = vpow2.f32 %v2350_v43 }
 0x7b5   : > { %4524 = vpow2.f32 %v1969_v36 }
 0x7b7   : > { %v2327_v35 = vpop.xlane.xlu0 %2326 }
 0x7b8   : > { %v2339_v48 = vsub.f32 %v5796_v8, %v2327_v35 }
 0x7b9   : > { %v5904_v14 = vpop.f32.mrf.mxu0 }
 0x7ba   : > { %v5891_v26 = vpop.eup %4522  ;;  %v2352_v41 = vmul.f32 1.442695, %v2339_v48 }
 0x7bb   : > { %v2370_v5 = vsel %vm1147_vm14, %v5891_v26, 0.0  ;;  %v5895_v51 = vpop.eup %4524 }
 0x7bc   : > { %4526 = vpow2.f32 %v2352_v41  ;;  %2371 = vadd.xlane.f32.xlu2 %v2370_v5  ;;  %v1992_v8 = vsel %vm1147_vm14, %v5895_v51, 0.0 }
 0x7bf   : > { %v2330_v18 = vpop.xlane.xlu0 %2329 }
 0x7c0   : > { %v2340_v7 = vsub.f32 %v5806_v55, %v2330_v18 }
 0x7c1   : > { %v5910_v46 = vpop.f32.mrf.mxu0 }
 0x7c2   : > { %v5898_v47 = vpop.eup %4526  ;;  %v2354_v24 = vmul.f32 1.442695, %v2340_v7 }
 0x7c3   : > { %v2373_v30 = vsel %vm1147_vm14, %v5898_v47, 0.0 }
 0x7c4   : > { %4528 = vpow2.f32 %v2354_v24  ;;  %1993 = vadd.xlane.f32.xlu2 %v1992_v8  ;;  %2374 = vadd.xlane.f32.xlu1 %v2373_v30 }
 0x7c9   : > { %v5915_v61 = vpop.f32.mrf.mxu0 }
 0x7ca   : > { %v5906_v52 = vpop.eup %4528 }
 0x7cb   : > { %v2376_v21 = vsel %vm1147_vm14, %v5906_v52, 0.0 }
 0x7cc   : > { %2377 = vadd.xlane.f32.xlu0 %v2376_v21 }
 0x7d1   : > { %v1827_v55 = vpop.f32.mrf.mxu3 }
 0x7d4   : > { %v1973_v10 = vpop.xlane.xlu1 %1972 }
 0x7d5   : > { %4530 = vrcp.f32 %v1973_v10 }
 0x7d9   : > { %v1830_v2 = vpop.f32.mrf.mxu3 }
 0x7da   : > { %4115 = vmatpush.msk.msra.mxu3 %vm1260_vm15, %v1830_v2 }
 0x7db   : > { %v4531_v62 = vpop.eup %4530 }
 0x7dc   : > { %v2003_v54 = vmul.f32 %v4531_v62, %v5821_v32  ;;  %2474 = vrot.lane.b32.xlu2 %v1668_v58, %s4661_s29  ;;  %2053 = vmatpush.msra.mxu3 %v1827_v55  ;;  %v5924_v32 = vpop.f32.mrf.mxu0 }
 0x7de   : > { %4116 = vmatmul.msk.f32.vlgmr.msra.gmra.mxu3 %vm1147_vm14, %v2003_v54 }
 0x7df   : > { %2713 = vmatpush.msrb.mxu3 %v5048_v17 }
 0x7e1   : > { %2714 = vmatpush.msrb.mxu3 %v5052_v20 }
 0x7e3   : > { %2715 = vmatpush.msrb.mxu3 %v5060_v23 }
 0x7e4   : > { %2476 = vrot.lane.b32.xlu2 %v1671_v53, %s4661_s29  ;;  %v5931_v63 = vpop.f32.mrf.mxu0 }
 0x7e5   : > { %2716 = vmatpush.msrb.mxu3 %v5063_v19 }
 0x7e7   : > { %2717 = vmatpush.msrb.mxu3 %v5148_v15 }
 0x7e9   : > { %2718 = vmatpush.msrb.mxu3 %v5155_v38 }
 0x7eb   : > { %2719 = vmatpush.msrb.mxu3 %v5158_v39 }
 0x7ec   : > { %v5940_v28 = vpop.f32.mrf.mxu0 }
 0x7ed   : > { %2720 = vmatpush.msrb.mxu3 %v5161_v40 }
 0x7ef   : > { %3077 = vmatpush.msra.mxu3 %v5048_v17  ;;  %v1976_v34 = vpop.xlane.xlu1 %1975 }
 0x7f0   : > { %4532 = vrcp.f32 %v1976_v34 }
 0x7f1   : > { %3078 = vmatpush.msra.mxu3 %v5052_v20 }
 0x7f3   : > { %3079 = vmatpush.msra.mxu3 %v5060_v23 }
 0x7f5   : > { %3080 = vmatpush.msra.mxu3 %v5063_v19 }
 0x7f6   : > { %v4533_v59 = vpop.eup %4532 }
 0x7f7   : > { %3081 = vmatpush.msra.mxu3 %v5148_v15  ;;  %v2004_v33 = vmul.f32 %v4533_v59, %v5829_v42  ;;  %v2360_v16 = vpop.xlane.xlu2 %2359 }
 0x7f9   : > { %3082 = vmatpush.msra.mxu3 %v5155_v38 }
 0x7fa   : > { %4117 = vmatmul.msk.f32.gmra.mxu3 %vm1147_vm14, %v2004_v33 }
 0x7fb   : > { %3083 = vmatpush.msra.mxu3 %v5158_v39 }
 0x7fd   : > { %3084 = vmatpush.msra.mxu3 %v5161_v40  ;;  %v2333_v27 = vpop.xlane.xlu0 %2332 }
 0x7fe   : > { %v2341_v31 = vsub.f32 %v5844_v12, %v2333_v27 }
 0x7ff   : > { %v2363_v35 = vpop.xlane.xlu2 %2362 }
 0x800   : > { %v2356_v13 = vmul.f32 1.442695, %v2341_v31 }
 0x802   : > { %4534 = vpow2.f32 %v2356_v13  ;;  %v2592_v13 = vld [vmem:[#allocation2 + $0x10] sm:$0xff] }
 0x803   : > { %4536 = vrcp.f32 %v2360_v16  ;;  %v2214_v43 = vpop.f32.mrf.mxu0  ;;  %v1979_v58 = vpop.xlane.xlu1 %1978 }
 0x804   : > { %4538 = vrcp.f32 %v1979_v58  ;;  %v2673_v58 = vld [vmem:[#allocation2 + $0x40] sm:$0xff] }
 0x805   : > { %4540 = vrcp.f32 %v2363_v35 }
 0x808   : > { %v5944_v36 = vpop.eup %4534 }
 0x809   : > { %v4537_v42 = vpop.eup %4536  ;;  %v2379_v48 = vsel %vm1147_vm14, %v5944_v36, 0.0 }
 0x80a   : > { %v4539_v41 = vpop.eup %4538  ;;  %2380 = vadd.xlane.f32.xlu1 %v2379_v48  ;;  %v2390_v18 = vmul.f32 %v4537_v42, %v5834_v60  ;;  %v2593_v42 = vld [vmem:[#allocation2 + $0x18] sm:$0xff]  ;;  %v2594_v48 = vld [vmem:[#allocation2 + $0x20] sm:$0xff] }
 0x80b   : > { %v2217_v5 = vpop.f32.mrf.mxu0  ;;  %v2005_v53 = vmul.f32 %v4539_v41, %v5855_v4  ;;  %v1982_v12 = vpop.xlane.xlu0 %1981  ;;  %v2769_v41 = vld [vmem:[#allocation2 + $0xa8] sm:$0xff] }
 0x80c   : > { %4156 = vmatpush.msk.msra.mxu0 %vm1260_vm15, %v2217_v5  ;;  %4542 = vrcp.f32 %v1982_v12  ;;  %v4541_v7 = vpop.eup %4540  ;;  %v2366_v24 = vpop.xlane.xlu1 %2365  ;;  %v2675_v5 = vld [vmem:[#allocation2 + $0x50] sm:$0xff] }
 0x80d   : > { %4118 = vmatmul.msk.f32.gmra.mxu3 %vm1147_vm14, %v2005_v53  ;;  %v2391_v60 = vmul.f32 %v4541_v7, %v5849_v6  ;;  %v2676_v53 = vld [vmem:[#allocation2 + $0x58] sm:$0xff]  ;;  %v2770_v12 = vld [vmem:[#allocation2 + $0xb0] sm:$0xff] }
 0x80e   : > { %2440 = vmatpush.msra.mxu0 %v2214_v43 }
 0x80f   : > { %4157 = vmatmul.msk.f32.vlgmr.msra.gmra.mxu0 %vm1147_vm14, %v2390_v18  ;;  %v2596_v18 = vld [vmem:[#allocation2 + $0x30] sm:$0xff] }
 0x810   : > { %2895 = vmatpush.msrb.mxu0 %v5048_v17 }
 0x812   : > { %2896 = vmatpush.msrb.mxu0 %v5052_v20  ;;  %v4543_v8 = vpop.eup %4542 }
 0x813   : > { %v1985_v4 = vpop.xlane.xlu2 %1984  ;;  %v2006_v30 = vmul.f32 %v4543_v8, %v5864_v25  ;;  %v2369_v21 = vpop.xlane.xlu0 %2368  ;;  %v2771_v8 = vld [vmem:[#allocation2 + $0xb8] sm:$0xff] }
 0x814   : > { %2897 = vmatpush.msrb.mxu0 %v5060_v23  ;;  %4544 = vrcp.f32 %v1985_v4  ;;  %v2597_v4 = vld [vmem:[#allocation2 + $0x38] sm:$0xff] }
 0x815   : > { %4546 = vrcp.f32 %v2366_v24  ;;  %4119 = vmatmul.msk.f32.gmra.mxu3 %vm1147_vm14, %v2006_v30  ;;  %v2677_v24 = vld [vmem:[#allocation2 + $0x60] sm:$0xff]  ;;  %v2678_v30 = vld [vmem:[#allocation2 + $0x68] sm:$0xff] }
 0x816   : > { %2898 = vmatpush.msrb.mxu0 %v5063_v19 }
 0x817   : > { %4158 = vmatmul.msk.f32.gmra.mxu0 %vm1147_vm14, %v2391_v60  ;;  %v3128_v60 = vld [vmem:[#allocation2 + $0x180] sm:$0xff] }
 0x818   : > { %2899 = vmatpush.msrb.mxu0 %v5148_v15 }
 0x81a   : > { %v4545_v55 = vpop.eup %4544  ;;  %2900 = vmatpush.msrb.mxu0 %v5155_v38 }
 0x81b   : > { %v4547_v10 = vpop.eup %4546  ;;  %v1988_v2 = vpop.xlane.xlu1 %1987  ;;  %v2007_v62 = vmul.f32 %v4545_v55, %v5874_v0  ;;  %v2679_v55 = vld [vmem:[#allocation2 + $0x70] sm:$0xff] }
 0x81c   : > { %2901 = vmatpush.msrb.mxu0 %v5158_v39  ;;  %4548 = vrcp.f32 %v1988_v2  ;;  %v2392_v6 = vmul.f32 %v4547_v10, %v5861_v45  ;;  %v1991_v25 = vpop.xlane.xlu0 %1990  ;;  %v3129_v10 = vld [vmem:[#allocation2 + $0x188] sm:$0xff] }
 0x81d   : > { %4550 = vrcp.f32 %v2369_v21  ;;  %4120 = vmatmul.msk.f32.gmra.mxu3 %vm1147_vm14, %v2007_v62  ;;  %v2946_v21 = vld [vmem:[#allocation2 + $0x100] sm:$0xff]  ;;  %v2947_v2 = vld [vmem:[#allocation2 + $0x108] sm:$0xff] }
 0x81e   : > { %2902 = vmatpush.msrb.mxu0 %v5161_v40  ;;  %4552 = vrcp.f32 %v1991_v25  ;;  %v2680_v25 = vld [vmem:[#allocation2 + $0x78] sm:$0xff] }
 0x81f   : > { %4159 = vmatmul.msk.f32.gmra.mxu0 %vm1147_vm14, %v2392_v6 }
 0x820   : > { %3259 = vmatpush.msra.mxu0 %v5048_v17 }
 0x822   : > { %3260 = vmatpush.msra.mxu0 %v5052_v20  ;;  %v4549_v54 = vpop.eup %4548  ;;  %v2764_v20 = vld [vmem:[#allocation2 + $0x80] sm:$0xff] }
 0x823   : > { %v4551_v34 = vpop.eup %4550  ;;  %v2008_v0 = vmul.f32 %v4549_v54, %v5882_v3  ;;  %4181 = vmatmul.msk.f32.vlgmr.msra.gmra.mxu2 %vm880_vm11, %v2764_v20  ;;  %v3130_v54 = vld [vmem:[#allocation2 + $0x190] sm:$0xff]  ;;  %v3131_v20 = vld [vmem:[#allocation2 + $0x198] sm:$0xff] }
 0x824   : > { %3261 = vmatpush.msra.mxu0 %v5060_v23  ;;  %v2393_v45 = vmul.f32 %v4551_v34, %v5871_v50  ;;  %v4553_v17 = vpop.eup %4552  ;;  %v2765_v50 = vld [vmem:[#allocation2 + $0x88] sm:$0xff]  ;;  %v2948_v34 = vld [vmem:[#allocation2 + $0x110] sm:$0xff] }
 0x825   : > { %4121 = vmatmul.msk.f32.gmra.mxu3 %vm1147_vm14, %v2008_v0  ;;  %v2009_v23 = vmul.f32 %v4553_v17, %v5880_v49  ;;  %v3037_v17 = vld [vmem:[#allocation2 + $0x140] sm:$0xff] }
 0x826   : > { %3262 = vmatpush.msra.mxu0 %v5063_v19 }
 0x827   : > { %4160 = vmatmul.msk.f32.gmra.mxu0 %vm1147_vm14, %v2393_v45 }
 0x828   : > { %3263 = vmatpush.msra.mxu0 %v5148_v15  ;;  %v2591_v15 = vld [vmem:[#allocation2 + $0x8] sm:$0xff] }
 0x829   : > { %4166 = vmatmul.msk.f32.gmra.mxu1 %vm880_vm11, %v2591_v15  ;;  %v3038_v15 = vld [vmem:[#allocation2 + $0x148] sm:$0xff] }
 0x82a   : > { %3264 = vmatpush.msra.mxu0 %v5155_v38 }
 0x82b   : > { %4182 = vmatmul.msk.f32.gmra.mxu2 %vm880_vm11, %v2765_v50  ;;  %v2855_v50 = vld [vmem:[#allocation2 + $0xc0] sm:$0xff] }
 0x82c   : > { %3265 = vmatpush.msra.mxu0 %v5158_v39 }
 0x82d   : > { %4122 = vmatmul.msk.f32.gmra.mxu3 %vm1147_vm14, %v2009_v23  ;;  %v2949_v23 = vld [vmem:[#allocation2 + $0x118] sm:$0xff] }
 0x82e   : > { %3266 = vmatpush.msra.mxu0 %v5161_v40  ;;  %v2766_v40 = vld [vmem:[#allocation2 + $0x90] sm:$0xff] }
 0x82f   : > { %v2372_v19 = vpop.xlane.xlu2 %2371 }
 0x830   : > { %4554 = vrcp.f32 %v2372_v19 }
 0x831   : > { %4167 = vmatmul.msk.f32.gmra.mxu1 %vm880_vm11, %v2592_v13  ;;  %v3134_v13 = vld [vmem:[#allocation2 + $0x1b0] sm:$0xff] }
 0x833   : > { %4183 = vmatmul.msk.f32.gmra.mxu2 %vm880_vm11, %v2766_v40  ;;  %v3039_v40 = vld [vmem:[#allocation2 + $0x150] sm:$0xff] }
 0x836   : > { %v4555_v38 = vpop.eup %4554 }
 0x837   : > { %v1994_v3 = vpop.xlane.xlu2 %1993  ;;  %v2375_v59 = vpop.xlane.xlu1 %2374  ;;  %v2394_v39 = vmul.f32 %v4555_v38, %v5891_v26  ;;  %v2767_v26 = vld [vmem:[#allocation2 + $0x98] sm:$0xff] }
 0x838   : > { %4556 = vrcp.f32 %v1994_v3  ;;  %v2950_v3 = vld [vmem:[#allocation2 + $0x120] sm:$0xff] }
 0x839   : > { %4558 = vrcp.f32 %v2375_v59  ;;  %4161 = vmatmul.msk.f32.gmra.mxu0 %vm1147_vm14, %v2394_v39  ;;  %4168 = vmatmul.msk.f32.gmra.mxu1 %vm880_vm11, %v2593_v42  ;;  %v2856_v39 = vld [vmem:[#allocation2 + $0xc8] sm:$0xff] }
 0x83b   : > { %4184 = vmatmul.msk.f32.gmra.mxu2 %vm880_vm11, %v2767_v26  ;;  %v2952_v26 = vld [vmem:[#allocation2 + $0x130] sm:$0xff] }
 0x83e   : > { %v4557_v49 = vpop.eup %4556 }
 0x83f   : > { %v4559_v33 = vpop.eup %4558  ;;  %v2378_v27 = vpop.xlane.xlu0 %2377  ;;  %v2010_v31 = vmul.f32 %v4557_v49, %v5895_v51  ;;  %v2768_v51 = vld [vmem:[#allocation2 + $0xa0] sm:$0xff]  ;;  %v3133_v49 = vld [vmem:[#allocation2 + $0x1a8] sm:$0xff] }
 0x840   : > { %4560 = vrcp.f32 %v2378_v27  ;;  %v2395_v16 = vmul.f32 %v4559_v33, %v5898_v47  ;;  %v2674_v47 = vld [vmem:[#allocation2 + $0x48] sm:$0xff] }
 0x841   : > { %4123 = vmatmul.msk.f32.gmra.mxu3 %vm1147_vm14, %v2010_v31  ;;  %4169 = vmatmul.msk.f32.gmra.mxu1 %vm880_vm11, %v2594_v48  ;;  %v2951_v33 = vld [vmem:[#allocation2 + $0x128] sm:$0xff]  ;;  %v2857_v31 = vld [vmem:[#allocation2 + $0xd0] sm:$0xff]  ;;  %v6057_v48 = vpop.f32.mrf.mxu1 }
 0x842   : > { %4162 = vmatmul.msk.f32.gmra.mxu0 %vm1147_vm14, %v2395_v16 }
 0x843   : > { %4185 = vmatmul.msk.f32.gmra.mxu2 %vm880_vm11, %v2768_v51  ;;  %v2953_v51 = vld [vmem:[#allocation2 + $0x138] sm:$0xff] }
 0x846   : > { %v4561_v43 = vpop.eup %4560 }
 0x847   : > { %v2396_v35 = vmul.f32 %v4561_v43, %v5906_v52  ;;  %v2595_v52 = vld [vmem:[#allocation2 + $0x28] sm:$0xff] }
 0x849   : > { %4173 = vmatmul.msk.f32.vlgmr.msrb.gmra.mxu3 %vm880_vm11, %v2673_v58  ;;  %4170 = vmatmul.msk.f32.gmra.mxu1 %vm880_vm11, %v2595_v52  ;;  %v2858_v58 = vld [vmem:[#allocation2 + $0xd8] sm:$0xff] }
 0x84a   : > { %4163 = vmatmul.msk.f32.gmra.mxu0 %vm1147_vm14, %v2396_v35  ;;  %v3135_v35 = vld [vmem:[#allocation2 + $0x1b8] sm:$0xff] }
 0x84b   : > { %4186 = vmatmul.msk.f32.gmra.mxu2 %vm880_vm11, %v2769_v41  ;;  %v2859_v41 = vld [vmem:[#allocation2 + $0xe0] sm:$0xff] }
 0x851   : > { %4174 = vmatmul.msk.f32.gmra.mxu3 %vm880_vm11, %v2674_v47  ;;  %4171 = vmatmul.msk.f32.gmra.mxu1 %vm880_vm11, %v2596_v18 }
 0x853   : > { %4187 = vmatmul.msk.f32.gmra.mxu2 %vm880_vm11, %v2770_v12 }
 0x859   : > { %4175 = vmatmul.msk.f32.gmra.mxu3 %vm880_vm11, %v2675_v5  ;;  %4172 = vmatmul.msk.f32.gmra.mxu1 %vm880_vm11, %v2597_v4  ;;  %v3310_v5 = vld [vmem:[#allocation2 + $0x200] sm:$0xff] }
 0x85b   : > { %4188 = vmatmul.msk.f32.gmra.mxu2 %vm880_vm11, %v2771_v8  ;;  %v3044_v8 = vld [vmem:[#allocation2 + $0x178] sm:$0xff] }
 0x861   : > { %v2055_v7 = vpop.f32.mrf.mxu3  ;;  %4176 = vmatmul.msk.f32.gmra.mxu3 %vm880_vm11, %v2676_v53  ;;  %4197 = vmatmul.msk.f32.vlgmr.msra.gmra.mxu1 %vm880_vm11, %v2946_v21  ;;  %v2860_v53 = vld [vmem:[#allocation2 + $0xe8] sm:$0xff]  ;;  %v2862_v21 = vld [vmem:[#allocation2 + $0xf8] sm:$0xff] }
 0x862   : > { %2506 = vrot.lane.b32.xlu0 %v2055_v7, %s4662_s19  ;;  %v3043_v7 = vld [vmem:[#allocation2 + $0x170] sm:$0xff] }
 0x863   : > { %4213 = vmatmul.msk.f32.vlgmr.msrb.gmra.mxu2 %vm880_vm11, %v3128_v60 }
 0x869   : > { %4177 = vmatmul.msk.f32.gmra.mxu3 %vm880_vm11, %v2677_v24  ;;  %4198 = vmatmul.msk.f32.gmra.mxu1 %vm880_vm11, %v2947_v2  ;;  %v2861_v24 = vld [vmem:[#allocation2 + $0xf0] sm:$0xff]  ;;  %v3219_v2 = vld [vmem:[#allocation2 + $0x1c0] sm:$0xff] }
 0x86b   : > { %4214 = vmatmul.msk.f32.gmra.mxu2 %vm880_vm11, %v3129_v10  ;;  %v3313_v10 = vld [vmem:[#allocation2 + $0x218] sm:$0xff] }
 0x871   : > { %4178 = vmatmul.msk.f32.gmra.mxu3 %vm880_vm11, %v2678_v30  ;;  %4199 = vmatmul.msk.f32.gmra.mxu1 %vm880_vm11, %v2948_v34  ;;  %v3315_v34 = vld [vmem:[#allocation2 + $0x228] sm:$0xff] }
 0x873   : > { %4215 = vmatmul.msk.f32.gmra.mxu2 %vm880_vm11, %v3130_v54 }
 0x879   : > { %4179 = vmatmul.msk.f32.gmra.mxu3 %vm880_vm11, %v2679_v55  ;;  %4200 = vmatmul.msk.f32.gmra.mxu1 %vm880_vm11, %v2949_v23 }
 0x87b   : > { %4216 = vmatmul.msk.f32.gmra.mxu2 %vm880_vm11, %v3131_v20  ;;  %v3222_v20 = vld [vmem:[#allocation2 + $0x1d8] sm:$0xff] }
 0x87d   : > { %v2058_v62 = vpop.f32.mrf.mxu3  ;;  %v2381_v6 = vpop.xlane.xlu1 %2380 }
 0x87e   : > { %4562 = vrcp.f32 %v2381_v6  ;;  %2508 = vrot.lane.b32.xlu0 %v2058_v62, %s4662_s19  ;;  %v3314_v6 = vld [vmem:[#allocation2 + $0x220] sm:$0xff] }
 0x881   : > { %4180 = vmatmul.msk.f32.gmra.mxu3 %vm880_vm11, %v2680_v25  ;;  %4201 = vmatmul.msk.f32.gmra.mxu1 %vm880_vm11, %v2950_v3  ;;  %v3220_v25 = vld [vmem:[#allocation2 + $0x1c8] sm:$0xff] }
 0x884   : > { %v4563_v0 = vpop.eup %4562 }
 0x885   : > { %v2397_v45 = vmul.f32 %v4563_v0, %v5944_v36  ;;  %v3132_v36 = vld [vmem:[#allocation2 + $0x1a0] sm:$0xff]  ;;  %v3221_v0 = vld [vmem:[#allocation2 + $0x1d0] sm:$0xff] }
 0x886   : > { %4217 = vmatmul.msk.f32.gmra.mxu2 %vm880_vm11, %v3132_v36  ;;  %v3223_v36 = vld [vmem:[#allocation2 + $0x1e0] sm:$0xff] }
 0x887   : > { %4164 = vmatmul.msk.f32.gmra.mxu0 %vm1147_vm14, %v2397_v45 }
 0x889   : > { %4205 = vmatmul.msk.f32.vlgmr.msra.gmra.mxu3 %vm880_vm11, %v3037_v17  ;;  %4202 = vmatmul.msk.f32.gmra.mxu1 %vm880_vm11, %v2951_v33  ;;  %v3316_v17 = vld [vmem:[#allocation2 + $0x230] sm:$0xff] }
 0x88a   : > { %v3225_v33 = vld [vmem:[#allocation2 + $0x1f0] sm:$0xff] }
 0x88c   : > { %v2442_v19 = vpop.f32.mrf.mxu0 }
 0x88d   : > { %2538 = vrot.lane.b32.xlu1 %v2442_v19, %s4663_s1 }
 0x88e   : > { %4218 = vmatmul.msk.f32.gmra.mxu2 %vm880_vm11, %v3133_v49 }
 0x88f   : > { %4189 = vmatmul.msk.f32.vlgmr.msrb.gmra.mxu0 %vm880_vm11, %v2855_v50 }
 0x890   : > { %v2061_v38 = vpop.f32.mrf.mxu3 }
 0x891   : > { %2510 = vrot.lane.b32.xlu0 %v2061_v38, %s4662_s19  ;;  %4206 = vmatmul.msk.f32.gmra.mxu3 %vm880_vm11, %v3038_v15  ;;  %v3317_v15 = vld [vmem:[#allocation2 + $0x238] sm:$0xff] }
 0x892   : > { %4203 = vmatmul.msk.f32.gmra.mxu1 %vm880_vm11, %v2952_v26  ;;  %v3423_v26 = vld [vmem:[%s6630_s10 + $0x18] sm:$0xff] }
 0x893   : > { %3464 = vmatpush.msrb.mxu3 %v3423_v26 }
 0x894   : > { %v2445_v59 = vpop.f32.mrf.mxu0 }
 0x895   : > { %2478 = vrot.lane.b32.xlu1 %v5904_v14, %s4661_s29  ;;  %2540 = vrot.lane.b32.xlu2 %v2445_v59, %s4663_s1  ;;  %v3040_v14 = vld [vmem:[#allocation2 + $0x158] sm:$0xff] }
 0x896   : > { %4219 = vmatmul.msk.f32.gmra.mxu2 %vm880_vm11, %v3134_v13  ;;  %v3226_v13 = vld [vmem:[#allocation2 + $0x1f8] sm:$0xff] }
 0x897   : > { %4190 = vmatmul.msk.f32.gmra.mxu0 %vm880_vm11, %v2856_v39  ;;  %v3224_v39 = vld [vmem:[#allocation2 + $0x1e8] sm:$0xff] }
 0x898   : > { %v2064_v27 = vpop.f32.mrf.mxu3 }
 0x899   : > { %4207 = vmatmul.msk.f32.gmra.mxu3 %vm880_vm11, %v3039_v40  ;;  %2512 = vrot.lane.b32.xlu0 %v2064_v27, %s4662_s19 }
 0x89a   : > { %4204 = vmatmul.msk.f32.gmra.mxu1 %vm880_vm11, %v2953_v51 }
 0x89c   : > { %v2448_v16 = vpop.f32.mrf.mxu0 }
 0x89d   : > { %2480 = vrot.lane.b32.xlu1 %v5910_v46, %s4661_s29  ;;  %2542 = vrot.lane.b32.xlu2 %v2448_v16, %s4663_s1  ;;  %v3041_v46 = vld [vmem:[#allocation2 + $0x160] sm:$0xff] }
 0x89e   : > { %4220 = vmatmul.msk.f32.gmra.mxu2 %vm880_vm11, %v3135_v35 }
 0x89f   : > { %4191 = vmatmul.msk.f32.gmra.mxu0 %vm880_vm11, %v2857_v31 }
 0x8a0   : > { %v2067_v43 = vpop.f32.mrf.mxu3 }
 0x8a1   : > { %4208 = vmatmul.msk.f32.gmra.mxu3 %vm880_vm11, %v3040_v14  ;;  %2514 = vrot.lane.b32.xlu0 %v2067_v43, %s4662_s19 }
 0x8a2   : > { %4229 = vmatmul.msk.f32.vlgmr.msrb.gmra.mxu1 %vm880_vm11, %v3310_v5 }
 0x8a4   : > { %v2451_v42 = vpop.f32.mrf.mxu0 }
 0x8a5   : > { %2482 = vrot.lane.b32.xlu1 %v5915_v61, %s4661_s29  ;;  %2544 = vrot.lane.b32.xlu2 %v2451_v42, %s4663_s1  ;;  %v3042_v61 = vld [vmem:[#allocation2 + $0x168] sm:$0xff] }
 0x8a6   : > { %v6065_v12 = vpop.f32.mrf.mxu1  ;;  %v2813_v50 = vpop.f32.mrf.mxu2 }
 0x8a7   : > { %4192 = vmatmul.msk.f32.gmra.mxu0 %vm880_vm11, %v2858_v58 }
 0x8a8   : > { %v2070_v47 = vpop.f32.mrf.mxu3 }
 0x8a9   : > { %4209 = vmatmul.msk.f32.gmra.mxu3 %vm880_vm11, %v3041_v46  ;;  %2516 = vrot.lane.b32.xlu0 %v2070_v47, %s4662_s19 }
 0x8ad   : > { %2484 = vrot.lane.b32.xlu1 %v5924_v32, %s4661_s29  ;;  %v3311_v32 = vld [vmem:[#allocation2 + $0x208] sm:$0xff] }
 0x8ae   : > { %4230 = vmatmul.msk.f32.gmra.mxu1 %vm880_vm11, %v3311_v32  ;;  %v6075_v4 = vpop.f32.mrf.mxu1  ;;  %v6108_v59 = vpop.f32.mrf.mxu2 }
 0x8af   : > { %4193 = vmatmul.msk.f32.gmra.mxu0 %vm880_vm11, %v2859_v41 }
 0x8b0   : > { %v2073_v52 = vpop.f32.mrf.mxu3 }
 0x8b1   : > { %4210 = vmatmul.msk.f32.gmra.mxu3 %vm880_vm11, %v3042_v61  ;;  %2518 = vrot.lane.b32.xlu0 %v2073_v52, %s4662_s19  ;;  %v3422_v61 = vld [vmem:[%s6630_s10 + $0x10] sm:$0xff] }
 0x8b2   : > { %3465 = vmatpush.msrb.mxu3 %v3422_v61 }
 0x8b5   : > { %2486 = vrot.lane.b32.xlu1 %v5931_v63, %s4661_s29  ;;  %v3312_v63 = vld [vmem:[#allocation2 + $0x210] sm:$0xff] }
 0x8b6   : > { %v2454_v18 = vpop.f32.mrf.mxu0  ;;  %4231 = vmatmul.msk.f32.gmra.mxu1 %vm880_vm11, %v3312_v63  ;;  %v6082_v55 = vpop.f32.mrf.mxu1 }
 0x8b7   : > { %4194 = vmatmul.msk.f32.gmra.mxu0 %vm880_vm11, %v2860_v53  ;;  %2546 = vrot.lane.b32.xlu2 %v2454_v18, %s4663_s1  ;;  %v6115_v27 = vpop.f32.mrf.mxu2 }
 0x8b9   : > { %4211 = vmatmul.msk.f32.gmra.mxu3 %vm880_vm11, %v3043_v7 }
 0x8bd   : > { %2488 = vrot.lane.b32.xlu1 %v5940_v28, %s4661_s29 }
 0x8be   : > { %4232 = vmatmul.msk.f32.gmra.mxu1 %vm880_vm11, %v3313_v10  ;;  %v6087_v62 = vpop.f32.mrf.mxu1 }
 0x8bf   : > { %v2457_v30 = vpop.f32.mrf.mxu0  ;;  %4195 = vmatmul.msk.f32.gmra.mxu0 %vm880_vm11, %v2861_v24  ;;  %v6127_v43 = vpop.f32.mrf.mxu2  ;;  %v3421_v24 = vld [vmem:[%s6630_s10 + $0x8] sm:$0xff] }
 0x8c0   : > { %2548 = vrot.lane.b32.xlu2 %v2457_v30, %s4663_s1  ;;  %3466 = vmatpush.msrb.mxu3 %v3421_v24  ;;  %v2475_v24 = vpop.permute.xlu2 %2474 }
 0x8c1   : > { %4212 = vmatmul.msk.f32.gmra.mxu3 %vm880_vm11, %v3044_v8 }
 0x8c4   : > { %v2076_v60 = vpop.f32.mrf.mxu3 }
 0x8c5   : > { %2520 = vrot.lane.b32.xlu0 %v2076_v60, %s4662_s19  ;;  %v2588_v60 = vld [vmem:[%s6628_s8] sm:$0xff] }
 0x8c6   : > { %4233 = vmatmul.msk.f32.gmra.mxu1 %vm880_vm11, %v3314_v6  ;;  %v6091_v54 = vpop.f32.mrf.mxu1  ;;  %v6170_v10 = vperm.slane %v2588_v60, 1 }
 0x8c7   : > { %v2460_v28 = vpop.f32.mrf.mxu0  ;;  %4196 = vmatmul.msk.f32.gmra.mxu0 %vm880_vm11, %v2862_v21  ;;  %v6133_v35 = vpop.f32.mrf.mxu2 }
 0x8c8   : > { %2550 = vrot.lane.b32.xlu2 %v2460_v28, %s4663_s1  ;;  %v6168_v28 = vperm.slane %v2588_v60, 0 }
 0x8ca   : > { %v2665_v22 = vmul.f32 %v6168_v28, %v6065_v12 }
 0x8cc   : > { %v2722_v23 = vpop.f32.mrf.mxu3 }
 0x8ce   : > { %4234 = vmatmul.msk.f32.gmra.mxu1 %vm880_vm11, %v3315_v34  ;;  %v6096_v45 = vpop.f32.mrf.mxu1  ;;  %v2664_v34 = vmul.f32 %v6168_v28, %v6057_v48 }
 0x8cf   : > { %4221 = vmatmul.msk.f32.vlgmr.msra.gmra.mxu0 %vm880_vm11, %v3219_v2  ;;  %v6142_v5 = vpop.f32.mrf.mxu2 }
 0x8d4   : > { %v6103_v38 = vpop.f32.mrf.mxu3  ;;  %v2507_v11 = vpop.permute.xlu0 %2506 }
 0x8d5   : > { %v2748_v37 = vmul.f32 %v6170_v10, %v6103_v38 }
 0x8d6   : > { %4235 = vmatmul.msk.f32.gmra.mxu1 %vm880_vm11, %v3316_v17  ;;  %v6100_v19 = vpop.f32.mrf.mxu1  ;;  %v6179_v17 = vperm.slane %v2588_v60, 2 }
 0x8d7   : > { %4222 = vmatmul.msk.f32.gmra.mxu0 %vm880_vm11, %v3220_v25  ;;  %v6152_v32 = vpop.f32.mrf.mxu2 }
 0x8d8   : > { %v2839_v29 = vmul.f32 %v6179_v17, %v6108_v59 }
 0x8dc   : > { %v6113_v49 = vpop.f32.mrf.mxu3 }
 0x8de   : > { %4236 = vmatmul.msk.f32.gmra.mxu1 %vm880_vm11, %v3317_v15  ;;  %v6106_v3 = vpop.f32.mrf.mxu1  ;;  %v6184_v15 = vperm.slane %v2588_v60, 3 }
 0x8df   : > { %4223 = vmatmul.msk.f32.gmra.mxu0 %vm880_vm11, %v3221_v0  ;;  %v6166_v21 = vpop.f32.mrf.mxu2  ;;  %v2747_v0 = vmul.f32 %v6170_v10, %v2722_v23 }
 0x8e0   : > { %6658 = vst [vmem:[#allocation10_spill] sm:$0xff] %v6166_v21 }
 0x8e4   : > { %v6120_v16 = vpop.f32.mrf.mxu3 }
 0x8e6   : > { %v6111_v40 = vpop.f32.mrf.mxu1 }
 0x8e7   : > { %4224 = vmatmul.msk.f32.gmra.mxu0 %vm880_vm11, %v3222_v20  ;;  %v3420_v20 = vld [vmem:[%s6630_s10] sm:$0xff] }
 0x8e8   : > { %3467 = vmatpush.msrb.mxu3 %v3420_v20 }
 0x8ec   : > { %v6131_v46 = vpop.f32.mrf.mxu3 }
 0x8ee   : > { %v6118_v31 = vpop.f32.mrf.mxu1 }
 0x8ef   : > { %4225 = vmatmul.msk.f32.gmra.mxu0 %vm880_vm11, %v3223_v36  ;;  %v3177_v36 = vpop.f32.mrf.mxu2 }
 0x8f4   : > { %v6137_v41 = vpop.f32.mrf.mxu3 }
 0x8f6   : > { %v6129_v58 = vpop.f32.mrf.mxu1 }
 0x8f7   : > { %4226 = vmatmul.msk.f32.gmra.mxu0 %vm880_vm11, %v3224_v39  ;;  %v2755_v39 = vadd.f32 %v2747_v0, %v2664_v34  ;;  %v6198_v34 = vperm.slane %v2588_v60, 5  ;;  %v2756_v0 = vadd.f32 %v2748_v37, %v2665_v22 }
 0x8f9   : > { %v2847_v22 = vadd.f32 %v2839_v29, %v2756_v0  ;;  %v2840_v29 = vmul.f32 %v6179_v17, %v6115_v27  ;;  %v2750_v27 = vmul.f32 %v6170_v10, %v6120_v16  ;;  %v2562_v16 = vsel %vm938_vm12, %v5378_v1, %v2475_v24 }
 0x8fc   : > { %v6148_v18 = vpop.f32.mrf.mxu3 }
 0x8fe   : > { %v6135_v47 = vpop.f32.mrf.mxu1 }
 0x8ff   : > { %4227 = vmatmul.msk.f32.gmra.mxu0 %vm880_vm11, %v3225_v33  ;;  %v2838_v33 = vmul.f32 %v6179_v17, %v2813_v50 }
 0x901   : > { %v2846_v61 = vadd.f32 %v2838_v33, %v2755_v39  ;;  %v6203_v33 = vperm.slane %v2588_v60, 6 }
 0x904   : > { %v2463_v14 = vpop.f32.mrf.mxu0  ;;  %v6159_v30 = vpop.f32.mrf.mxu3 }
 0x905   : > { %2552 = vrot.lane.b32.xlu2 %v2463_v14, %s4663_s1 }
 0x906   : > { %v6146_v53 = vpop.f32.mrf.mxu1 }
 0x907   : > { %4228 = vmatmul.msk.f32.gmra.mxu0 %vm880_vm11, %v3226_v13  ;;  %v6188_v13 = vperm.slane %v2588_v60, 4 }
 0x909   : > { %v3020_v50 = vmul.f32 %v6188_v13, %v6106_v3  ;;  %v2749_v3 = vmul.f32 %v6170_v10, %v6113_v49 }
 0x90c   : > { %v2904_v42 = vpop.f32.mrf.mxu0  ;;  %v3086_v6 = vpop.f32.mrf.mxu3 }
 0x90d   : > { %v2929_v14 = vmul.f32 %v6184_v15, %v2904_v42  ;;  %v3180_v42 = vpop.f32.mrf.mxu2  ;;  %v3111_v39 = vmul.f32 %v6198_v34, %v3086_v6  ;;  %v2477_v6 = vpop.permute.xlu2 %2476 }
 0x90f   : > { %v6157_v8 = vpop.f32.mrf.mxu1  ;;  %v2937_v20 = vadd.f32 %v2929_v14, %v2846_v61  ;;  %v2666_v14 = vmul.f32 %v6168_v28, %v6075_v4  ;;  %v6220_v4 = vld [vmem:[%s6628_s8 + $0x8] ss:$0 sm:$0xff] }
 0x910   : > { %6657 = vst [vmem:[#allocation9_spill] sm:$0xff] %v6157_v8 }
 0x911   : > { %v2757_v49 = vadd.f32 %v2749_v3, %v2666_v14  ;;  %v2667_v14 = vmul.f32 %v6168_v28, %v6082_v55  ;;  %v3203_v55 = vmul.f32 %v6203_v33, %v3180_v42 }
 0x913   : > { %v2848_v8 = vadd.f32 %v2840_v29, %v2757_v49 }
 0x914   : > { %v2907_v51 = vpop.f32.mrf.mxu0  ;;  %v3089_v26 = vpop.f32.mrf.mxu3 }
 0x915   : > { %v2930_v38 = vmul.f32 %v6184_v15, %v2907_v51  ;;  %v6215_v51 = vperm.slane %v2588_v60, 7  ;;  %v3183_v0 = vpop.f32.mrf.mxu2 }
 0x917   : > { %v6172_v2 = vpop.f32.mrf.mxu1  ;;  %v2938_v21 = vadd.f32 %v2930_v38, %v2847_v22 }
 0x918   : > { %6659 = vst [vmem:[#allocation11_spill] sm:$0xff] %v6172_v2  ;;  %v3028_v2 = vadd.f32 %v3020_v50, %v2937_v20  ;;  %v3202_v20 = vmul.f32 %v6203_v33, %v3177_v36  ;;  %v2539_v50 = vpop.permute.xlu1 %2538 }
 0x91a   : > { %v3119_v59 = vadd.f32 %v3111_v39, %v3028_v2 }
 0x91c   : > { %v6144_v52 = vpop.f32.mrf.mxu0  ;;  %v3092_v37 = vpop.f32.mrf.mxu3  ;;  %v3210_v2 = vadd.f32 %v3202_v20, %v3119_v59 }
 0x91d   : > { %v2931_v36 = vmul.f32 %v6184_v15, %v6144_v52  ;;  %v6236_v52 = vld [vmem:[%s6629_s9] ss:$0 sm:$0xff]  ;;  %v2541_v59 = vpop.permute.xlu2 %2540  ;;  %v3113_v42 = vmul.f32 %v6198_v34, %v3092_v37  ;;  %v2751_v37 = vmul.f32 %v6170_v10, %v6131_v46 }
 0x91f   : > { %v3359_v23 = vpop.f32.mrf.mxu1 }
 0x920   : > { %v3384_v22 = vmul.f32 %v6220_v4, %v3359_v23 }
 0x924   : > { %v6150_v7 = vpop.f32.mrf.mxu0  ;;  %v3095_v49 = vpop.f32.mrf.mxu3 }
 0x925   : > { %v2543_v46 = vpop.permute.xlu2 %2542 }
 0x92b   : > { %v3362_v61 = vpop.f32.mrf.mxu1 }
 0x92c   : > { %v6161_v63 = vpop.f32.mrf.mxu0 }
 0x933   : > { %v3365_v23 = vpop.f32.mrf.mxu1 }
 0x934   : > { %v6174_v25 = vpop.f32.mrf.mxu0 }
 0x93c   : > { %v6190_v48 = vpop.f32.mrf.mxu0 }
 0x944   : > { %v6205_v12 = vpop.f32.mrf.mxu0 }
 0x945   : > { %6660 = vst [vmem:[#allocation12_spill] sm:$0xff] %v6205_v12  ;;  %v3021_v12 = vmul.f32 %v6188_v13, %v6111_v40  ;;  %v3112_v40 = vmul.f32 %v6198_v34, %v3089_v26  ;;  %v2939_v26 = vadd.f32 %v2931_v36, %v2848_v8  ;;  %v2479_v8 = vpop.permute.xlu1 %2478 }
 0x947   : > { %v3029_v38 = vadd.f32 %v3021_v12, %v2938_v21  ;;  %v2509_v21 = vpop.permute.xlu0 %2508  ;;  %v3022_v12 = vmul.f32 %v6188_v13, %v6118_v31 }
 0x949   : > { %v3120_v20 = vadd.f32 %v3112_v40, %v3029_v38  ;;  %v3030_v38 = vadd.f32 %v3022_v12, %v2939_v26  ;;  %v2932_v40 = vmul.f32 %v6184_v15, %v6150_v7 }
 0x94b   : > { %v3211_v1 = vadd.f32 %v3203_v55, %v3120_v20  ;;  %v3121_v12 = vadd.f32 %v3113_v42, %v3030_v38  ;;  %v3204_v20 = vmul.f32 %v6203_v33, %v3183_v0 }
 0x94c   : > { %v3268_v39 = vpop.f32.mrf.mxu0 }
 0x94d   : > { %v3293_v60 = vmul.f32 %v6215_v51, %v3268_v39  ;;  %v2841_v39 = vmul.f32 %v6179_v17, %v6127_v43  ;;  %v3385_v43 = vmul.f32 %v6220_v4, %v3362_v61  ;;  %v3023_v61 = vmul.f32 %v6188_v13, %v6129_v58  ;;  %v2481_v58 = vpop.permute.xlu1 %2480 }
 0x94f   : > { %v3301_v3 = vadd.f32 %v3293_v60, %v3210_v2  ;;  %v2758_v2 = vadd.f32 %v2750_v27, %v2667_v14  ;;  %v2571_v60 = vsel %vm2570_vm1, %v2562_v16, %v2507_v11  ;;  %v3186_v27 = vpop.f32.mrf.mxu2  ;;  %v2511_v7 = vpop.permute.xlu0 %2510 }
 0x950   : > { %v2580_v36 = vsel %vm2579_vm2, %v2571_v60, %v2539_v50  ;;  %v2668_v50 = vmul.f32 %v6168_v28, %v6087_v62  ;;  %v2842_v62 = vmul.f32 %v6179_v17, %v6133_v35  ;;  %v3386_v35 = vmul.f32 %v6220_v4, %v3365_v23 }
 0x951   : > { %v3392_v29 = vadd.f32 %v3384_v22, %v3301_v3  ;;  %v2849_v11 = vadd.f32 %v2841_v39, %v2758_v2  ;;  %v2563_v3 = vsel %vm938_vm12, %v5383_v9, %v2477_v6  ;;  %v3368_v6 = vpop.f32.mrf.mxu1  ;;  %v3098_v2 = vpop.f32.mrf.mxu3 }
 0x952   : > { %v2759_v16 = vadd.f32 %v2751_v37, %v2668_v50 }
 0x953   : > { %v3404_v31 = vadd.f32 %v6236_v52, %v3392_v29  ;;  %v2940_v55 = vadd.f32 %v2932_v40, %v2849_v11  ;;  %v2572_v29 = vsel %vm2570_vm1, %v2563_v3, %v2509_v21  ;;  %v2933_v21 = vmul.f32 %v6184_v15, %v6161_v63 }
 0x954   : > { %v3271_v22 = vpop.f32.mrf.mxu0  ;;  %v2581_v60 = vsel %vm2579_vm2, %v2572_v29, %v2541_v59  ;;  %v2752_v59 = vmul.f32 %v6170_v10, %v6137_v41  ;;  %v3205_v63 = vmul.f32 %v6203_v33, %v3186_v27  ;;  %v2843_v41 = vmul.f32 %v6179_v17, %v6142_v5 }
 0x955   : > { %v3412_v24 = vadd.f32 %v3404_v31, %v2580_v36  ;;  %v3294_v14 = vmul.f32 %v6215_v51, %v3271_v22  ;;  %v3212_v31 = vadd.f32 %v3204_v20, %v3121_v12  ;;  %v3031_v0 = vadd.f32 %v3023_v61, %v2940_v55  ;;  %v2545_v55 = vpop.permute.xlu2 %2544 }
 0x956   : > { %v3114_v36 = vmul.f32 %v6198_v34, %v3095_v49  ;;  %v2669_v22 = vmul.f32 %v6168_v28, %v6091_v54  ;;  %v2850_v49 = vadd.f32 %v2842_v62, %v2759_v16  ;;  %v3024_v54 = vmul.f32 %v6188_v13, %v6135_v47 }
 0x957   : > { %v3302_v26 = vadd.f32 %v3294_v14, %v3211_v1  ;;  %4237 = vmatmul.msk.f32.vlgmr.msrb.gmra.mxu3 %vm603_vm0, %v3412_v24  ;;  %v2564_v1 = vsel %vm938_vm12, %v5386_v57, %v2479_v8  ;;  %v2513_v57 = vpop.permute.xlu0 %2512  ;;  %v3115_v27 = vmul.f32 %v6198_v34, %v3098_v2  ;;  %v3387_v5 = vmul.f32 %v6220_v4, %v3368_v6  ;;  %v2483_v2 = vpop.permute.xlu1 %2482 }
 0x958   : > { %v3122_v14 = vadd.f32 %v3114_v36, %v3031_v0  ;;  %v2573_v11 = vsel %vm2570_vm1, %v2564_v1, %v2511_v7  ;;  %v2941_v23 = vadd.f32 %v2933_v21, %v2850_v49  ;;  %v2760_v50 = vadd.f32 %v2752_v59, %v2669_v22 }
 0x959   : > { %v3393_v9 = vadd.f32 %v3385_v43, %v3302_v26  ;;  %v3189_v43 = vpop.f32.mrf.mxu2  ;;  %v2582_v37 = vsel %vm2579_vm2, %v2573_v11, %v2543_v46  ;;  %v2934_v7 = vmul.f32 %v6184_v15, %v6174_v25  ;;  %v3371_v20 = vpop.f32.mrf.mxu1  ;;  %v2670_v62 = vmul.f32 %v6168_v28, %v6096_v45 }
 0x95a   : > { %v3213_v26 = vadd.f32 %v3205_v63, %v3122_v14  ;;  %v3032_v47 = vadd.f32 %v3024_v54, %v2941_v23  ;;  %v3101_v61 = vpop.f32.mrf.mxu3  ;;  %v2851_v16 = vadd.f32 %v2843_v41, %v2760_v50  ;;  %v2753_v46 = vmul.f32 %v6170_v10, %v6148_v18 }
 0x95b   : > { %v3405_v39 = vadd.f32 %v6236_v52, %v3393_v9  ;;  %v2565_v25 = vsel %vm938_vm12, %v5389_v56, %v2481_v58  ;;  %v3206_v36 = vmul.f32 %v6203_v33, %v3189_v43  ;;  %v2844_v18 = vmul.f32 %v6179_v17, %v6152_v32 }
 0x95c   : > { %v3274_v38 = vpop.f32.mrf.mxu0  ;;  %v2574_v6 = vsel %vm2570_vm1, %v2565_v25, %v2513_v57  ;;  %v3123_v0 = vadd.f32 %v3115_v27, %v3032_v47  ;;  %v3388_v32 = vmul.f32 %v6220_v4, %v3371_v20  ;;  %v2566_v63 = vsel %vm938_vm12, %v5392_v44, %v2483_v2  ;;  %v6661_v57 = vld [vmem:[#allocation9_spill] sm:$0xff] }
 0x95d   : > { %v3413_v42 = vadd.f32 %v3405_v39, %v2581_v60  ;;  %v3295_v40 = vmul.f32 %v6215_v51, %v3274_v38  ;;  %v2942_v60 = vadd.f32 %v2934_v7, %v2851_v16  ;;  %v2761_v38 = vadd.f32 %v2753_v46, %v2670_v62  ;;  %v2547_v59 = vpop.permute.xlu2 %2546 }
 0x95e   : > { %v2583_v58 = vsel %vm2579_vm2, %v2574_v6, %v2545_v55  ;;  %v3214_v1 = vadd.f32 %v3206_v36, %v3123_v0  ;;  %v2671_v11 = vmul.f32 %v6168_v28, %v6100_v19  ;;  %v2754_v23 = vmul.f32 %v6170_v10, %v6159_v30  ;;  %v6662_v19 = vld [vmem:[#allocation10_spill] sm:$0xff]  ;;  %v6665_v36 = vld [vmem:[#allocation11_spill] sm:$0xff] }
 0x95f   : > { %v3303_v24 = vadd.f32 %v3295_v40, %v3212_v31  ;;  %4238 = vmatmul.msk.f32.gmra.mxu3 %vm603_vm0, %v3413_v42  ;;  %v3025_v31 = vmul.f32 %v6188_v13, %v6146_v53  ;;  %v2515_v42 = vpop.permute.xlu0 %2514  ;;  %v2935_v53 = vmul.f32 %v6184_v15, %v6190_v48  ;;  %v2852_v14 = vadd.f32 %v2844_v18, %v2761_v38 }
 0x960   : > { %v2575_v44 = vsel %vm2570_vm1, %v2566_v63, %v2515_v42  ;;  %v2762_v27 = vadd.f32 %v2754_v23, %v2671_v11  ;;  %v2845_v28 = vmul.f32 %v6179_v17, %v6662_v19  ;;  %v6664_v17 = vld [vmem:[#allocation6_spill] sm:$0xff] }
 0x961   : > { %v3394_v3 = vadd.f32 %v3386_v35, %v3303_v24  ;;  %v3192_v21 = vpop.f32.mrf.mxu2  ;;  %v3033_v40 = vadd.f32 %v3025_v31, %v2942_v60  ;;  %v3116_v35 = vmul.f32 %v6198_v34, %v3101_v61  ;;  %v3374_v43 = vpop.f32.mrf.mxu1  ;;  %v2943_v41 = vadd.f32 %v2935_v53, %v2852_v14  ;;  %v6663_v61 = vld [vmem:[#allocation12_spill] sm:$0xff] }
 0x962   : > { %v3104_v48 = vpop.f32.mrf.mxu3  ;;  %v3207_v50 = vmul.f32 %v6203_v33, %v3192_v21  ;;  %v2584_v10 = vsel %vm2579_vm2, %v2575_v44, %v2547_v59  ;;  %v3389_v16 = vmul.f32 %v6220_v4, %v3374_v43  ;;  %v2853_v25 = vadd.f32 %v2845_v28, %v2762_v27  ;;  %v6667_v28 = vld [vmem:[#allocation8_spill] sm:$0xff] }
 0x963   : > { %v3406_v8 = vadd.f32 %v6236_v52, %v3394_v3  ;;  %v3124_v3 = vadd.f32 %v3116_v35, %v3033_v40  ;;  %v3117_v20 = vmul.f32 %v6198_v34, %v3104_v48 }
 0x964   : > { %v3277_v12 = vpop.f32.mrf.mxu0 }
 0x965   : > { %v3414_v29 = vadd.f32 %v3406_v8, %v2582_v37  ;;  %v3296_v9 = vmul.f32 %v6215_v51, %v3277_v12  ;;  %v3026_v8 = vmul.f32 %v6188_v13, %v6661_v57  ;;  %v2485_v37 = vpop.permute.xlu1 %2484  ;;  %v3215_v7 = vadd.f32 %v3207_v50, %v3124_v3  ;;  %v2549_v2 = vpop.permute.xlu2 %2548 }
 0x966   : > { %v2567_v46 = vsel %vm938_vm12, %v6664_v17, %v2485_v37 }
 0x967   : > { %v3304_v39 = vadd.f32 %v3296_v9, %v3213_v26  ;;  %4239 = vmatmul.msk.f32.gmra.mxu3 %vm603_vm0, %v3414_v29  ;;  %v3034_v12 = vadd.f32 %v3026_v8, %v2943_v41  ;;  %v2936_v29 = vmul.f32 %v6184_v15, %v6663_v61  ;;  %v2517_v62 = vpop.permute.xlu0 %2516 }
 0x968   : > { %v2576_v15 = vsel %vm2570_vm1, %v2567_v46, %v2517_v62 }
 0x969   : > { %v3395_v45 = vadd.f32 %v3387_v5, %v3304_v39  ;;  %v3195_v55 = vpop.f32.mrf.mxu2  ;;  %v3125_v60 = vadd.f32 %v3117_v20, %v3034_v12  ;;  %v3377_v6 = vpop.f32.mrf.mxu1  ;;  %v2944_v0 = vadd.f32 %v2936_v29, %v2853_v25  ;;  %v4598_v25 = vld [vmem:[%s4778_s25 + $0x10] sm:$0xff] }
 0x96a   : > { %v3208_v31 = vmul.f32 %v6203_v33, %v3195_v55  ;;  %v3107_v38 = vpop.f32.mrf.mxu3 }
 0x96b   : > { %v3407_v56 = vadd.f32 %v6236_v52, %v3395_v45  ;;  %v3027_v45 = vmul.f32 %v6188_v13, %v6665_v36  ;;  %v3118_v40 = vmul.f32 %v6198_v34, %v3107_v38  ;;  %v4600_v38 = vld [vmem:[%s4778_s25 + $0x20] sm:$0xff] }
 0x96c   : > { %v3280_v22 = vpop.f32.mrf.mxu0  ;;  %v3216_v42 = vadd.f32 %v3208_v31, %v3125_v60 }
 0x96d   : > { %v3415_v49 = vadd.f32 %v3407_v56, %v2583_v58  ;;  %v3297_v24 = vmul.f32 %v6215_v51, %v3280_v22  ;;  %v2487_v21 = vpop.permute.xlu1 %2486  ;;  %v2585_v58 = vsel %vm2579_vm2, %v2576_v15, %v2549_v2  ;;  %v3035_v53 = vadd.f32 %v3027_v45, %v2944_v0  ;;  %v2551_v63 = vpop.permute.xlu2 %2550 }
 0x96f   : > { %v3305_v54 = vadd.f32 %v3297_v24, %v3214_v1  ;;  %4240 = vmatmul.msk.f32.gmra.mxu3 %vm603_vm0, %v3415_v49  ;;  %v3390_v1 = vmul.f32 %v6220_v4, %v3377_v6  ;;  %v6666_v49 = vld [vmem:[#allocation7_spill] sm:$0xff]  ;;  %v2519_v14 = vpop.permute.xlu0 %2518  ;;  %v3126_v11 = vadd.f32 %v3118_v40, %v3035_v53  ;;  %v4599_v6 = vld [vmem:[%s4778_s25 + $0x18] sm:$0xff] }
 0x970   : > { %v2568_v13 = vsel %vm938_vm12, %v6666_v49, %v2487_v21 }
 0x971   : > { %v3396_v26 = vadd.f32 %v3388_v32, %v3305_v54  ;;  %v3198_v24 = vpop.f32.mrf.mxu2  ;;  %v2577_v43 = vsel %vm2570_vm1, %v2568_v13, %v2519_v14  ;;  %v3380_v48 = vpop.f32.mrf.mxu1 }
 0x972   : > { %v3209_v34 = vmul.f32 %v6203_v33, %v3198_v24  ;;  %v2586_v3 = vsel %vm2579_vm2, %v2577_v43, %v2551_v63  ;;  %v3391_v44 = vmul.f32 %v6220_v4, %v3380_v48  ;;  %v4381_v4 = vld [vmem:[%s6631_s11] ss:$0 sm:$0xff] }
 0x973   : > { %v3408_v30 = vadd.f32 %v6236_v52, %v3396_v26  ;;  %v6668_v24 = vld [vmem:[#allocation5_spill] sm:$0xff] }
 0x974   : > { %v3283_v47 = vpop.f32.mrf.mxu0  ;;  %v3217_v41 = vadd.f32 %v3209_v34, %v3126_v11 }
 0x975   : > { %v3416_v9 = vadd.f32 %v3408_v30, %v2584_v10  ;;  %v3298_v5 = vmul.f32 %v6215_v51, %v3283_v47  ;;  %v2489_v37 = vpop.permute.xlu1 %2488  ;;  %v2553_v33 = vpop.permute.xlu2 %2552  ;;  %v4596_v47 = vld [vmem:[%s4778_s25] sm:$0xff] }
 0x976   : > { %v2569_v30 = vsel %vm938_vm12, %v6667_v28, %v2489_v37 }
 0x977   : > { %v3306_v39 = vadd.f32 %v3298_v5, %v3215_v7  ;;  %4241 = vmatmul.msk.f32.gmra.mxu3 %vm603_vm0, %v3416_v9  ;;  %v2521_v27 = vpop.permute.xlu0 %2520  ;;  %v4597_v5 = vld [vmem:[%s4778_s25 + $0x8] sm:$0xff] }
 0x978   : > { %v2578_v10 = vsel %vm2570_vm1, %v2569_v30, %v2521_v27 }
 0x979   : > { %v3397_v18 = vadd.f32 %v3389_v16, %v3306_v39 }
 0x97b   : > { %v3409_v56 = vadd.f32 %v6236_v52, %v3397_v18 }
 0x97c   : > { %v3286_v35 = vpop.f32.mrf.mxu0 }
 0x97d   : > { %v3417_v22 = vadd.f32 %v3409_v56, %v2585_v58  ;;  %v3299_v59 = vmul.f32 %v6215_v51, %v3286_v35 }
 0x97f   : > { %v3307_v32 = vadd.f32 %v3299_v59, %v3216_v42  ;;  %4242 = vmatmul.msk.f32.gmra.mxu3 %vm603_vm0, %v3417_v22  ;;  %v4601_v42 = vld [vmem:[%s4778_s25 + $0x28] sm:$0xff]  ;;  %v4602_v59 = vld [vmem:[%s4778_s25 + $0x30] sm:$0xff] }
 0x981   : > { %v3398_v23 = vadd.f32 %v3390_v1, %v3307_v32 }
 0x983   : > { %v3410_v54 = vadd.f32 %v6236_v52, %v3398_v23 }
 0x984   : > { %v3289_v50 = vpop.f32.mrf.mxu0 }
 0x985   : > { %v3418_v57 = vadd.f32 %v3410_v54, %v2586_v3  ;;  %v3300_v8 = vmul.f32 %v6215_v51, %v3289_v50  ;;  %v2587_v51 = vsel %vm2579_vm2, %v2578_v10, %v2553_v33  ;;  %v4603_v54 = vld [vmem:[%s4778_s25 + $0x38] sm:$0xff] }
 0x987   : > { %v3308_v26 = vadd.f32 %v3300_v8, %v3217_v41  ;;  %4243 = vmatmul.msk.f32.gmra.mxu3 %vm603_vm0, %v3418_v57 }
 0x989   : > { %v3399_v19 = vadd.f32 %v3391_v44, %v3308_v26 }
 0x98b   : > { %v3411_v7 = vadd.f32 %v6236_v52, %v3399_v19 }
 0x98d   : > { %v3419_v12 = vadd.f32 %v3411_v7, %v2587_v51 }
 0x98f   : > { %4244 = vmatmul.msk.f32.gmra.mxu3 %vm603_vm0, %v3419_v12 }
 0x9da   : > { %v3469_v20 = vpop.f32.mrf.mxu3 }
 0x9db   : > { %v3470_v55 = vadd.f32 %v4381_v4, %v3469_v20 }
 0x9dd   : > { %v6365_v61 = vadd.f32 %v4596_v47, %v3470_v55 }
 0x9df   : > { %v3503_v29 = vsel %vm603_vm0, %v6365_v61, 0.0 }
 0x9e0   : > { %3504 = vadd.xlane.f32.xlu1 %v3503_v29 }
 0x9e2   : > { %v3472_v52 = vpop.f32.mrf.mxu3 }
 0x9e3   : > { %v3473_v9 = vadd.f32 %v4381_v4, %v3472_v52 }
 0x9e5   : > { %v6370_v16 = vadd.f32 %v4597_v5, %v3473_v9 }
 0x9e7   : > { %v3506_v62 = vsel %vm603_vm0, %v6370_v16, 0.0 }
 0x9e8   : > { %3507 = vadd.xlane.f32.xlu0 %v3506_v62 }
 0x9ea   : > { %v3475_v17 = vpop.f32.mrf.mxu3 }
 0x9eb   : > { %v3476_v46 = vadd.f32 %v4381_v4, %v3475_v17 }
 0x9ed   : > { %v6375_v2 = vadd.f32 %v4598_v25, %v3476_v46 }
 0x9ef   : > { %v3509_v39 = vsel %vm603_vm0, %v6375_v2, 0.0 }
 0x9f0   : > { %3510 = vadd.xlane.f32.xlu2 %v3509_v39 }
 0x9f2   : > { %v3478_v60 = vpop.f32.mrf.mxu3 }
 0x9f3   : > { %v3479_v31 = vadd.f32 %v4381_v4, %v3478_v60  ;;  %v3704_v60 = vld [vmem:[%s6634_s14 + $0x18] sm:$0xff] }
 0x9f4   : > { %3745 = vmatpush.msra.mxu2 %v3704_v60 }
 0x9f5   : > { %v6380_v15 = vadd.f32 %v4599_v6, %v3479_v31  ;;  %v3703_v31 = vld [vmem:[%s6634_s14 + $0x10] sm:$0xff]  ;;  %v3702_v6 = vld [vmem:[%s6634_s14 + $0x8] sm:$0xff] }
 0x9f6   : > { %3746 = vmatpush.msra.mxu2 %v3703_v31 }
 0x9f7   : > { %v3512_v0 = vsel %vm603_vm0, %v6380_v15, 0.0 }
 0x9f8   : > { %3513 = vadd.xlane.f32.xlu1 %v3512_v0  ;;  %3747 = vmatpush.msra.mxu2 %v3702_v6  ;;  %v3701_v0 = vld [vmem:[%s6634_s14] sm:$0xff] }
 0x9fa   : > { %v3481_v36 = vpop.f32.mrf.mxu3  ;;  %3748 = vmatpush.msra.mxu2 %v3701_v0 }
 0x9fb   : > { %v3482_v45 = vadd.f32 %v4381_v4, %v3481_v36 }
 0x9fd   : > { %v6385_v18 = vadd.f32 %v4600_v38, %v3482_v45 }
 0x9ff   : > { %v3515_v21 = vsel %vm603_vm0, %v6385_v18, 0.0 }
 0xa00   : > { %3516 = vadd.xlane.f32.xlu0 %v3515_v21 }
 0xa02   : > { %v3484_v56 = vpop.f32.mrf.mxu3 }
 0xa03   : > { %v3485_v58 = vadd.f32 %v4381_v4, %v3484_v56 }
 0xa05   : > { %v6390_v40 = vadd.f32 %v4601_v42, %v3485_v58 }
 0xa07   : > { %v3518_v35 = vsel %vm603_vm0, %v6390_v40, 0.0 }
 0xa08   : > { %3519 = vadd.xlane.f32.xlu2 %v3518_v35 }
 0xa0a   : > { %v3487_v53 = vpop.f32.mrf.mxu3 }
 0xa0b   : > { %v3488_v22 = vadd.f32 %v4381_v4, %v3487_v53 }
 0xa0d   : > { %v6395_v1 = vadd.f32 %v4602_v59, %v3488_v22 }
 0xa0f   : > { %v3521_v49 = vsel %vm603_vm0, %v6395_v1, 0.0 }
 0xa10   : > { %3522 = vadd.xlane.f32.xlu0 %v3521_v49 }
 0xa12   : > { %v3490_v63 = vpop.f32.mrf.mxu3 }
 0xa13   : > { %v3491_v11 = vadd.f32 %v4381_v4, %v3490_v63 }
 0xa15   : > { %v6408_v3 = vadd.f32 %v4603_v54, %v3491_v11 }
 0xa17   : > { %v3524_v8 = vsel %vm603_vm0, %v6408_v3, 0.0 }
 0xa53   : > { %v3505_v13 = vpop.xlane.xlu1 %3504 }
 0xa54   : > { %v3527_v32 = vmul.f32 %v3505_v13, %v6668_v24 }
 0xa56   : > { %v6401_v14 = vsub.f32 %v6365_v61, %v3527_v32 }
 0xa58   : > { %v3543_v43 = vmul.f32 %v6401_v14, %v6401_v14 }
 0xa5a   : > { %v3551_v34 = vsel %vm603_vm0, %v3543_v43, 0.0 }
 0xa5b   : > { %v3508_v23 = vpop.xlane.xlu0 %3507  ;;  %3552 = vadd.xlane.f32.xlu1 %v3551_v34 }
 0xa5c   : > { %v3528_v48 = vmul.f32 %v3508_v23, %v6668_v24 }
 0xa5e   : > { %v6411_v50 = vsub.f32 %v6370_v16, %v3528_v48 }
 0xa60   : > { %v3544_v41 = vmul.f32 %v6411_v50, %v6411_v50 }
 0xa62   : > { %v3554_v57 = vsel %vm603_vm0, %v3544_v41, 0.0 }
 0xa63   : > { %v3511_v44 = vpop.xlane.xlu2 %3510  ;;  %3555 = vadd.xlane.f32.xlu2 %v3554_v57  ;;  %3525 = vadd.xlane.f32.xlu1 %v3524_v8  ;;  %v6478_v57 = vld [vmem:[%s6632_s12] ss:$0 sm:$0xff] }
 0xa64   : > { %v3529_v37 = vmul.f32 %v3511_v44, %v6668_v24 }
 0xa66   : > { %v6420_v26 = vsub.f32 %v6375_v2, %v3529_v37  ;;  %v6483_v37 = vld [vmem:[%s6633_s13] ss:$0 sm:$0xff] }
 0xa68   : > { %v3545_v27 = vmul.f32 %v6420_v26, %v6420_v26 }
 0xa6a   : > { %v3557_v33 = vsel %vm603_vm0, %v3545_v27, 0.0 }
 0xa6b   : > { %3558 = vadd.xlane.f32.xlu0 %v3557_v33  ;;  %v3514_v19 = vpop.xlane.xlu1 %3513 }
 0xa6c   : > { %v3530_v28 = vmul.f32 %v3514_v19, %v6668_v24 }
 0xa6e   : > { %v6427_v30 = vsub.f32 %v6380_v15, %v3530_v28 }
 0xa70   : > { %v3546_v10 = vmul.f32 %v6427_v30, %v6427_v30 }
 0xa72   : > { %v3560_v7 = vsel %vm603_vm0, %v3546_v10, 0.0 }
 0xa73   : > { %v3517_v51 = vpop.xlane.xlu0 %3516  ;;  %3561 = vadd.xlane.f32.xlu2 %v3560_v7 }
 0xa74   : > { %v3531_v12 = vmul.f32 %v3517_v51, %v6668_v24 }
 0xa76   : > { %v6434_v4 = vsub.f32 %v6385_v18, %v3531_v12 }
 0xa78   : > { %v3547_v20 = vmul.f32 %v6434_v4, %v6434_v4 }
 0xa7a   : > { %v3563_v55 = vsel %vm603_vm0, %v3547_v20, 0.0 }
 0xa7b   : > { %v3520_v47 = vpop.xlane.xlu2 %3519  ;;  %3564 = vadd.xlane.f32.xlu1 %v3563_v55 }
 0xa7c   : > { %v3532_v29 = vmul.f32 %v3520_v47, %v6668_v24 }
 0xa7e   : > { %v6441_v52 = vsub.f32 %v6390_v40, %v3532_v29 }
 0xa80   : > { %v3548_v9 = vmul.f32 %v6441_v52, %v6441_v52 }
 0xa82   : > { %v3566_v5 = vsel %vm603_vm0, %v3548_v9, 0.0 }
 0xa83   : > { %3567 = vadd.xlane.f32.xlu0 %v3566_v5  ;;  %v3523_v62 = vpop.xlane.xlu0 %3522 }
 0xa84   : > { %v3533_v17 = vmul.f32 %v3523_v62, %v6668_v24 }
 0xa86   : > { %v6448_v46 = vsub.f32 %v6395_v1, %v3533_v17 }
 0xa88   : > { %v3549_v25 = vmul.f32 %v6448_v46, %v6448_v46 }
 0xa8a   : > { %v3569_v39 = vsel %vm603_vm0, %v3549_v25, 0.0 }
 0xa8b   : > { %3570 = vadd.xlane.f32.xlu2 %v3569_v39 }
 0xace   : > { %v3553_v36 = vpop.xlane.xlu1 %3552 }
 0xacf   : > { %v3575_v45 = vmul.f32 %v3553_v36, %v6668_v24 }
 0xad1   : > { %v3583_v38 = vadd.f32 1e-05, %v3575_v45 }
 0xad3   : > { %4564 = vrsqrt.f32 %v3583_v38  ;;  %vm3597_vm4 = vweird.f32 %v3583_v38 }
 0xad6   : > { %v3556_v21 = vpop.xlane.xlu2 %3555  ;;  %v3526_v56 = vpop.xlane.xlu1 %3525 }
 0xad7   : > { %v3576_v58 = vmul.f32 %v3556_v21, %v6668_v24  ;;  %v3534_v42 = vmul.f32 %v3526_v56, %v6668_v24 }
 0xad9   : > { %v4565_v35 = vpop.eup %4564  ;;  %v3584_v53 = vadd.f32 1e-05, %v3576_v58  ;;  %v6469_v22 = vsub.f32 %v6408_v3, %v3534_v42 }
 0xada   : > { %v3592_v59 = vmul.f32 %v4565_v35, %v3583_v38  ;;  %vm3598_vm3 = vweird.f32 %v4565_v35 }
 0xadb   : > { %4566 = vrsqrt.f32 %v3584_v53  ;;  %v3550_v49 = vmul.f32 %v6469_v22, %v6469_v22  ;;  %vm3599_vm5 = vmor %vm3597_vm4, %vm3598_vm3  ;;  %vm3607_vm7 = vweird.f32 %v3584_v53 }
 0xadc   : > { %v3593_v13 = vmul.f32 %v4565_v35, %v3592_v59 }
 0xadd   : > { %v3572_v32 = vsel %vm603_vm0, %v3550_v49, 0.0 }
 0xade   : > { %v3594_v63 = vmul.f32 0.5, %v3593_v13  ;;  %v3559_v43 = vpop.xlane.xlu0 %3558  ;;  %3573 = vadd.xlane.f32.xlu1 %v3572_v32 }
 0xadf   : > { %v3577_v11 = vmul.f32 %v3559_v43, %v6668_v24 }
 0xae0   : > { %v3595_v34 = vsub.f32 1.5, %v3594_v63 }
 0xae1   : > { %v4567_v23 = vpop.eup %4566  ;;  %v3585_v48 = vadd.f32 1e-05, %v3577_v11 }
 0xae2   : > { %v3596_v54 = vmul.f32 %v4565_v35, %v3595_v34  ;;  %v3602_v41 = vmul.f32 %v4567_v23, %v3584_v53  ;;  %vm3608_vm6 = vweird.f32 %v4567_v23 }
 0xae3   : > { %4568 = vrsqrt.f32 %v3585_v48  ;;  %vm3609_vm8 = vmor %vm3607_vm7, %vm3608_vm6  ;;  %vm3617_vm10 = vweird.f32 %v3585_v48 }
 0xae4   : > { %v3600_v8 = vsel %vm3599_vm5, %v4565_v35, %v3596_v54  ;;  %v3603_v44 = vmul.f32 %v4567_v23, %v3602_v41 }
 0xae5   : > { %v3671_v27 = vmul.f32 %v3600_v8, %v6401_v14 }
 0xae6   : > { %v3604_v33 = vmul.f32 0.5, %v3603_v44  ;;  %v3562_v19 = vpop.xlane.xlu2 %3561 }
 0xae7   : > { %v3682_v28 = vmul.f32 %v6478_v57, %v3671_v27  ;;  %v3578_v10 = vmul.f32 %v3562_v19, %v6668_v24 }
 0xae8   : > { %v3605_v7 = vsub.f32 1.5, %v3604_v33 }
 0xae9   : > { %v4569_v51 = vpop.eup %4568  ;;  %v3693_v12 = vadd.f32 %v6483_v37, %v3682_v28  ;;  %v3586_v20 = vadd.f32 1e-05, %v3578_v10 }
 0xaea   : > { %v3606_v55 = vmul.f32 %v4567_v23, %v3605_v7  ;;  %v3612_v47 = vmul.f32 %v4569_v51, %v3585_v48  ;;  %vm3618_vm9 = vweird.f32 %v4569_v51 }
 0xaeb   : > { %4570 = vrsqrt.f32 %v3586_v20  ;;  %4245 = vmatmul.msk.f32.vlgmr.msra.gmra.mxu2 %vm603_vm0, %v3693_v12  ;;  %vm3619_vm11 = vmor %vm3617_vm10, %vm3618_vm9  ;;  %vm3627_vm13 = vweird.f32 %v3586_v20 }
 0xaec   : > { %v3610_v14 = vsel %vm3609_vm8, %v4567_v23, %v3606_v55  ;;  %v3613_v29 = vmul.f32 %v4569_v51, %v3612_v47 }
 0xaed   : > { %v3672_v9 = vmul.f32 %v3610_v14, %v6411_v50 }
 0xaee   : > { %v3614_v5 = vmul.f32 0.5, %v3613_v29  ;;  %v3565_v62 = vpop.xlane.xlu1 %3564 }
 0xaef   : > { %v3579_v17 = vmul.f32 %v3565_v62, %v6668_v24  ;;  %v3683_v25 = vmul.f32 %v6478_v57, %v3672_v9 }
 0xaf0   : > { %v3615_v39 = vsub.f32 1.5, %v3614_v5 }
 0xaf1   : > { %v4571_v60 = vpop.eup %4570  ;;  %v3587_v31 = vadd.f32 1e-05, %v3579_v17  ;;  %v3694_v6 = vadd.f32 %v6483_v37, %v3683_v25 }
 0xaf2   : > { %v3616_v0 = vmul.f32 %v4569_v51, %v3615_v39  ;;  %v3622_v36 = vmul.f32 %v4571_v60, %v3586_v20  ;;  %vm3628_vm12 = vweird.f32 %v4571_v60 }
 0xaf3   : > { %4572 = vrsqrt.f32 %v3587_v31  ;;  %4246 = vmatmul.msk.f32.gmra.mxu2 %vm603_vm0, %v3694_v6  ;;  %vm3629_vm14 = vmor %vm3627_vm13, %vm3628_vm12  ;;  %vm3637_vm1 = vweird.f32 %v3587_v31 }
 0xaf4   : > { %v3620_v50 = vsel %vm3619_vm11, %v4569_v51, %v3616_v0  ;;  %v3623_v45 = vmul.f32 %v4571_v60, %v3622_v36  ;;  %v3860_v0 = vld [vmem:[%s6636_s16 + $0x70] sm:$0xff]  ;;  %v3859_v36 = vld [vmem:[%s6636_s16 + $0x68] sm:$0xff] }
 0xaf5   : > { %v3673_v38 = vmul.f32 %v3620_v50, %v6420_v26  ;;  %v3857_v50 = vld [vmem:[%s6636_s16 + $0x58] sm:$0xff] }
 0xaf6   : > { %v3624_v21 = vmul.f32 0.5, %v3623_v45  ;;  %v3568_v56 = vpop.xlane.xlu0 %3567 }
 0xaf7   : > { %v3580_v58 = vmul.f32 %v3568_v56, %v6668_v24  ;;  %v3684_v42 = vmul.f32 %v6478_v57, %v3673_v38 }
 0xaf8   : > { %v3625_v35 = vsub.f32 1.5, %v3624_v21  ;;  %v3856_v21 = vld [vmem:[%s6636_s16 + $0x50] sm:$0xff] }
 0xaf9   : > { %v4573_v53 = vpop.eup %4572  ;;  %v3588_v59 = vadd.f32 1e-05, %v3580_v58  ;;  %v3695_v49 = vadd.f32 %v6483_v37, %v3684_v42  ;;  %v3855_v58 = vld [vmem:[%s6636_s16 + $0x48] sm:$0xff]  ;;  %v3854_v42 = vld [vmem:[%s6636_s16 + $0x40] sm:$0xff] }
 0xafa   : > { %v3626_v13 = vmul.f32 %v4571_v60, %v3625_v35  ;;  %v3632_v32 = vmul.f32 %v4573_v53, %v3587_v31  ;;  %vm3638_vm15 = vweird.f32 %v4573_v53  ;;  %v3852_v35 = vld [vmem:[%s6636_s16 + $0x30] sm:$0xff] }
 0xafb   : > { %4574 = vrsqrt.f32 %v3588_v59  ;;  %4247 = vmatmul.msk.f32.gmra.mxu2 %vm603_vm0, %v3695_v49  ;;  %vm3639_vm2 = vmor %vm3637_vm1, %vm3638_vm15  ;;  %vm3647_vm4 = vweird.f32 %v3588_v59 }
 0xafc   : > { %v3630_v26 = vsel %vm3629_vm14, %v4571_v60, %v3626_v13  ;;  %v3633_v63 = vmul.f32 %v4573_v53, %v3632_v32  ;;  %v3850_v13 = vld [vmem:[%s6636_s16 + $0x20] sm:$0xff] }
 0xafd   : > { %v3674_v43 = vmul.f32 %v3630_v26, %v6427_v30  ;;  %v3849_v26 = vld [vmem:[%s6636_s16 + $0x18] sm:$0xff] }
 0xafe   : > { %v3634_v11 = vmul.f32 0.5, %v3633_v63  ;;  %v3571_v34 = vpop.xlane.xlu2 %3570 }
 0xaff   : > { %v3581_v23 = vmul.f32 %v3571_v34, %v6668_v24  ;;  %v3685_v48 = vmul.f32 %v6478_v57, %v3674_v43  ;;  %v3848_v43 = vld [vmem:[%s6636_s16 + $0x10] sm:$0xff]  ;;  %v3847_v34 = vld [vmem:[%s6636_s16 + $0x8] sm:$0xff] }
 0xb00   : > { %v3635_v54 = vsub.f32 1.5, %v3634_v11 }
 0xb01   : > { %v4575_v41 = vpop.eup %4574  ;;  %v3589_v8 = vadd.f32 1e-05, %v3581_v23  ;;  %v3696_v44 = vadd.f32 %v6483_v37, %v3685_v48  ;;  %v3846_v48 = vld [vmem:[%s6636_s16] sm:$0xff] }
 0xb02   : > { %v3636_v27 = vmul.f32 %v4573_v53, %v3635_v54  ;;  %v3642_v33 = vmul.f32 %v4575_v41, %v3588_v59  ;;  %vm3648_vm3 = vweird.f32 %v4575_v41  ;;  %v3851_v59 = vld [vmem:[%s6636_s16 + $0x28] sm:$0xff] }
 0xb03   : > { %4576 = vrsqrt.f32 %v3589_v8  ;;  %4248 = vmatmul.msk.f32.gmra.mxu2 %vm603_vm0, %v3696_v44  ;;  %vm3649_vm5 = vmor %vm3647_vm4, %vm3648_vm3  ;;  %vm3657_vm7 = vweird.f32 %v3589_v8  ;;  %v6571_v44 = vld [vmem:[%s6635_s15] ss:$0 sm:$0xff] }
 0xb04   : > { %v3640_v30 = vsel %vm3639_vm2, %v4573_v53, %v3636_v27  ;;  %v3643_v19 = vmul.f32 %v4575_v41, %v3642_v33 }
 0xb05   : > { %v3675_v28 = vmul.f32 %v3640_v30, %v6434_v4 }
 0xb06   : > { %v3644_v10 = vmul.f32 0.5, %v3643_v19 }
 0xb07   : > { %v3686_v7 = vmul.f32 %v6478_v57, %v3675_v28 }
 0xb08   : > { %v3645_v51 = vsub.f32 1.5, %v3644_v10 }
 0xb09   : > { %v4577_v12 = vpop.eup %4576  ;;  %v3697_v20 = vadd.f32 %v6483_v37, %v3686_v7 }
 0xb0a   : > { %v3646_v55 = vmul.f32 %v4575_v41, %v3645_v51  ;;  %v3652_v47 = vmul.f32 %v4577_v12, %v3589_v8  ;;  %vm3658_vm6 = vweird.f32 %v4577_v12 }
 0xb0b   : > { %4249 = vmatmul.msk.f32.gmra.mxu2 %vm603_vm0, %v3697_v20  ;;  %vm3659_vm8 = vmor %vm3657_vm7, %vm3658_vm6 }
 0xb0c   : > { %v3650_v14 = vsel %vm3649_vm5, %v4575_v41, %v3646_v55  ;;  %v3653_v29 = vmul.f32 %v4577_v12, %v3652_v47 }
 0xb0d   : > { %v3676_v9 = vmul.f32 %v3650_v14, %v6441_v52  ;;  %v3861_v52 = vld [vmem:[%s6636_s16 + $0x78] sm:$0xff] }
 0xb0e   : > { %v3654_v5 = vmul.f32 0.5, %v3653_v29  ;;  %3866 = vmatpush.msrb.mxu0 %v3861_v52 }
 0xb0f   : > { %v3687_v4 = vmul.f32 %v6478_v57, %v3676_v9 }
 0xb10   : > { %v3655_v62 = vsub.f32 1.5, %v3654_v5  ;;  %3867 = vmatpush.msrb.mxu0 %v3860_v0 }
 0xb11   : > { %v3698_v17 = vadd.f32 %v6483_v37, %v3687_v4 }
 0xb12   : > { %v3656_v25 = vmul.f32 %v4577_v12, %v3655_v62  ;;  %3868 = vmatpush.msrb.mxu0 %v3859_v36 }
 0xb13   : > { %4250 = vmatmul.msk.f32.gmra.mxu2 %vm603_vm0, %v3698_v17 }
 0xb14   : > { %v3660_v39 = vsel %vm3659_vm8, %v4577_v12, %v3656_v25 }
 0xb15   : > { %v3677_v60 = vmul.f32 %v3660_v39, %v6448_v46  ;;  %v3858_v46 = vld [vmem:[%s6636_s16 + $0x60] sm:$0xff] }
 0xb16   : > { %3869 = vmatpush.msrb.mxu0 %v3858_v46 }
 0xb17   : > { %v3688_v31 = vmul.f32 %v6478_v57, %v3677_v60 }
 0xb18   : > { %3870 = vmatpush.msrb.mxu0 %v3857_v50 }
 0xb19   : > { %v3699_v6 = vadd.f32 %v6483_v37, %v3688_v31 }
 0xb1a   : > { %3871 = vmatpush.msrb.mxu0 %v3856_v21 }
 0xb1b   : > { %4251 = vmatmul.msk.f32.gmra.mxu2 %vm603_vm0, %v3699_v6 }
 0xb1c   : > { %3872 = vmatpush.msrb.mxu0 %v3855_v58 }
 0xb1e   : > { %3873 = vmatpush.msrb.mxu0 %v3854_v42 }
 0xb51   : > { %v3574_v45 = vpop.xlane.xlu1 %3573 }
 0xb52   : > { %v3582_v38 = vmul.f32 %v3574_v45, %v6668_v24  ;;  %v3853_v24 = vld [vmem:[%s6636_s16 + $0x38] sm:$0xff] }
 0xb53   : > { %3874 = vmatpush.msrb.mxu0 %v3853_v24 }
 0xb54   : > { %v3590_v56 = vadd.f32 1e-05, %v3582_v38 }
 0xb55   : > { %3875 = vmatpush.msrb.mxu0 %v3852_v35 }
 0xb56   : > { %4578 = vrsqrt.f32 %v3590_v56  ;;  %vm3667_vm10 = vweird.f32 %v3590_v56 }
 0xb57   : > { %3876 = vmatpush.msrb.mxu0 %v3851_v59 }
 0xb59   : > { %3877 = vmatpush.msrb.mxu0 %v3850_v13 }
 0xb5b   : > { %3878 = vmatpush.msrb.mxu0 %v3849_v26 }
 0xb5c   : > { %v4579_v53 = vpop.eup %4578 }
 0xb5d   : > { %v3662_v49 = vmul.f32 %v4579_v53, %v3590_v56  ;;  %vm3668_vm9 = vweird.f32 %v4579_v53  ;;  %3879 = vmatpush.msrb.mxu0 %v3848_v43 }
 0xb5e   : > { %vm3669_vm11 = vmor %vm3667_vm10, %vm3668_vm9 }
 0xb5f   : > { %v3663_v32 = vmul.f32 %v4579_v53, %v3662_v49  ;;  %3880 = vmatpush.msrb.mxu0 %v3847_v34 }
 0xb61   : > { %v3664_v63 = vmul.f32 0.5, %v3663_v32  ;;  %3881 = vmatpush.msrb.mxu0 %v3846_v48 }
 0xb63   : > { %v3665_v11 = vsub.f32 1.5, %v3664_v63 }
 0xb65   : > { %v3666_v23 = vmul.f32 %v4579_v53, %v3665_v11 }
 0xb67   : > { %v3670_v54 = vsel %vm3669_vm11, %v4579_v53, %v3666_v23 }
 0xb68   : > { %v3678_v41 = vmul.f32 %v3670_v54, %v6469_v22 }
 0xb6a   : > { %v3689_v8 = vmul.f32 %v6478_v57, %v3678_v41 }
 0xb6c   : > { %v3700_v27 = vadd.f32 %v6483_v37, %v3689_v8 }
 0xb6e   : > { %v3750_v33 = vpop.f32.mrf.mxu2  ;;  %4252 = vmatmul.msk.f32.gmra.mxu2 %vm603_vm0, %v3700_v27 }
 0xb6f   : > { %v3751_v30 = vadd.f32 %v6571_v44, %v3750_v33 }
 0xb71   : > { %v3782_v19 = vmul.f32 %v3751_v30, %v3751_v30  ;;  %v3774_v4 = vmul.f32 0.5, %v3751_v30 }
 0xb73   : > { %v3790_v28 = vmul.f32 %v3782_v19, %v3751_v30 }
 0xb75   : > { %v3798_v10 = vmul.f32 0.044715, %v3790_v28 }
 0xb76   : > { %v3753_v7 = vpop.f32.mrf.mxu2 }
 0xb77   : > { %v3806_v51 = vadd.f32 %v3798_v10, %v3751_v30  ;;  %v3754_v22 = vadd.f32 %v6571_v44, %v3753_v7 }
 0xb79   : > { %v3814_v57 = vmul.f32 0.7978846, %v3806_v51  ;;  %v3783_v12 = vmul.f32 %v3754_v22, %v3754_v22  ;;  %v3775_v46 = vmul.f32 0.5, %v3754_v22 }
 0xb7b   : > { %4580 = vtanh.f32 %v3814_v57  ;;  %v3791_v20 = vmul.f32 %v3783_v12, %v3754_v22 }
 0xb7d   : > { %v3799_v55 = vmul.f32 0.044715, %v3791_v20 }
 0xb7e   : > { %v3756_v47 = vpop.f32.mrf.mxu2 }
 0xb7f   : > { %v3807_v14 = vadd.f32 %v3799_v55, %v3754_v22  ;;  %v3757_v37 = vadd.f32 %v6571_v44, %v3756_v47 }
 0xb81   : > { %v4581_v29 = vpop.eup %4580  ;;  %v3784_v9 = vmul.f32 %v3757_v37, %v3757_v37  ;;  %v3815_v5 = vmul.f32 0.7978846, %v3807_v14  ;;  %v3776_v59 = vmul.f32 0.5, %v3757_v37 }
 0xb82   : > { %v3830_v62 = vadd.f32 1.0, %v4581_v29 }
 0xb83   : > { %v3792_v17 = vmul.f32 %v3784_v9, %v3757_v37  ;;  %4582 = vtanh.f32 %v3815_v5 }
 0xb84   : > { %v3838_v25 = vmul.f32 %v3830_v62, %v3774_v4 }
 0xb85   : > { %v3800_v39 = vmul.f32 0.044715, %v3792_v17 }
 0xb86   : > { %v3759_v60 = vpop.f32.mrf.mxu2  ;;  %3882 = vmatmul.f32.vlgmr.msrb.gmra.mxu0 %v3838_v25 }
 0xb87   : > { %v3808_v31 = vadd.f32 %v3800_v39, %v3757_v37  ;;  %v3760_v6 = vadd.f32 %v6571_v44, %v3759_v60 }
 0xb89   : > { %v4583_v52 = vpop.eup %4582  ;;  %v3785_v0 = vmul.f32 %v3760_v6, %v3760_v6  ;;  %v3816_v36 = vmul.f32 0.7978846, %v3808_v31  ;;  %v3777_v54 = vmul.f32 0.5, %v3760_v6 }
 0xb8a   : > { %v3831_v50 = vadd.f32 1.0, %v4583_v52 }
 0xb8b   : > { %v3793_v45 = vmul.f32 %v3785_v0, %v3760_v6  ;;  %4584 = vtanh.f32 %v3816_v36 }
 0xb8c   : > { %v3839_v38 = vmul.f32 %v3831_v50, %v3775_v46  ;;  %v4385_v46 = vld [vmem:[%s6637_s17] ss:$0 sm:$0xff] }
 0xb8d   : > { %v3801_v21 = vmul.f32 0.044715, %v3793_v45 }
 0xb8e   : > { %v3762_v56 = vpop.f32.mrf.mxu2  ;;  %3885 = vmatmul.f32.gmra.mxu0 %v3839_v38 }
 0xb8f   : > { %v3809_v58 = vadd.f32 %v3801_v21, %v3760_v6  ;;  %v3763_v42 = vadd.f32 %v6571_v44, %v3762_v56 }
 0xb91   : > { %v4585_v24 = vpop.eup %4584  ;;  %v3786_v35 = vmul.f32 %v3763_v42, %v3763_v42  ;;  %v3817_v53 = vmul.f32 0.7978846, %v3809_v58  ;;  %v3778_v22 = vmul.f32 0.5, %v3763_v42 }
 0xb92   : > { %v3832_v49 = vadd.f32 1.0, %v4585_v24 }
 0xb93   : > { %v3794_v13 = vmul.f32 %v3786_v35, %v3763_v42  ;;  %4586 = vtanh.f32 %v3817_v53 }
 0xb94   : > { %v3840_v32 = vmul.f32 %v3832_v49, %v3776_v59 }
 0xb95   : > { %v3802_v26 = vmul.f32 0.044715, %v3794_v13 }
 0xb96   : > { %v3765_v63 = vpop.f32.mrf.mxu2  ;;  %3888 = vmatmul.f32.gmra.mxu0 %v3840_v32 }
 0xb97   : > { %v3810_v43 = vadd.f32 %v3802_v26, %v3763_v42  ;;  %v3766_v11 = vadd.f32 %v6571_v44, %v3765_v63 }
 0xb99   : > { %v4587_v34 = vpop.eup %4586  ;;  %v3787_v23 = vmul.f32 %v3766_v11, %v3766_v11  ;;  %v3818_v48 = vmul.f32 0.7978846, %v3810_v43  ;;  %v3779_v29 = vmul.f32 0.5, %v3766_v11 }
 0xb9a   : > { %v3833_v41 = vadd.f32 1.0, %v4587_v34 }
 0xb9b   : > { %v3795_v8 = vmul.f32 %v3787_v23, %v3766_v11  ;;  %4588 = vtanh.f32 %v3818_v48 }
 0xb9c   : > { %v3841_v27 = vmul.f32 %v3833_v41, %v3777_v54 }
 0xb9d   : > { %v3803_v33 = vmul.f32 0.044715, %v3795_v8 }
 0xb9e   : > { %v3768_v30 = vpop.f32.mrf.mxu2  ;;  %3891 = vmatmul.f32.gmra.mxu0 %v3841_v27 }
 0xb9f   : > { %v3811_v19 = vadd.f32 %v3803_v33, %v3766_v11  ;;  %v3769_v28 = vadd.f32 %v6571_v44, %v3768_v30 }
 0xba1   : > { %v4589_v10 = vpop.eup %4588  ;;  %v3788_v7 = vmul.f32 %v3769_v28, %v3769_v28  ;;  %v3819_v51 = vmul.f32 0.7978846, %v3811_v19  ;;  %v3780_v62 = vmul.f32 0.5, %v3769_v28 }
 0xba2   : > { %v3834_v57 = vadd.f32 1.0, %v4589_v10 }
 0xba3   : > { %v3796_v12 = vmul.f32 %v3788_v7, %v3769_v28  ;;  %4590 = vtanh.f32 %v3819_v51 }
 0xba4   : > { %v3842_v20 = vmul.f32 %v3834_v57, %v3778_v22 }
 0xba5   : > { %v3804_v55 = vmul.f32 0.044715, %v3796_v12 }
 0xba6   : > { %3894 = vmatmul.f32.gmra.mxu0 %v3842_v20 }
 0xba7   : > { %v3812_v47 = vadd.f32 %v3804_v55, %v3769_v28 }
 0xba9   : > { %v4591_v14 = vpop.eup %4590  ;;  %v3820_v37 = vmul.f32 0.7978846, %v3812_v47 }
 0xbaa   : > { %v3835_v9 = vadd.f32 1.0, %v4591_v14 }
 0xbab   : > { %4592 = vtanh.f32 %v3820_v37 }
 0xbac   : > { %v3843_v5 = vmul.f32 %v3835_v9, %v3779_v29 }
 0xbae   : > { %3897 = vmatmul.f32.gmra.mxu0 %v3843_v5 }
 0xbb1   : > { %v4593_v4 = vpop.eup %4592 }
 0xbb2   : > { %v3836_v17 = vadd.f32 1.0, %v4593_v4 }
 0xbb4   : > { %v3844_v25 = vmul.f32 %v3836_v17, %v3780_v62 }
 0xbb6   : > { %3900 = vmatmul.f32.gmra.mxu0 %v3844_v25 }
 0xbf1   : > { %v3771_v39 = vpop.f32.mrf.mxu2 }
 0xbf2   : > { %v3772_v60 = vadd.f32 %v6571_v44, %v3771_v39 }
 0xbf4   : > { %v3789_v31 = vmul.f32 %v3772_v60, %v3772_v60  ;;  %v3781_v44 = vmul.f32 0.5, %v3772_v60 }
 0xbf6   : > { %v3797_v6 = vmul.f32 %v3789_v31, %v3772_v60 }
 0xbf8   : > { %v3805_v52 = vmul.f32 0.044715, %v3797_v6 }
 0xbfa   : > { %v3813_v0 = vadd.f32 %v3805_v52, %v3772_v60 }
 0xbfc   : > { %v3821_v36 = vmul.f32 0.7978846, %v3813_v0 }
 0xbfe   : > { %4594 = vtanh.f32 %v3821_v36 }
 0xc03   : > { %v3883_v50 = vpop.f32.mrf.mxu0 }
 0xc04   : > { %v4595_v45 = vpop.eup %4594  ;;  %v3884_v38 = vadd.f32 %v4385_v46, %v3883_v50 }
 0xc05   : > { %v3837_v21 = vadd.f32 1.0, %v4595_v45 }
 0xc06   : > { %v3907_v56 = vadd.f32 %v3884_v38, %v6365_v61 }
 0xc07   : > { %v3845_v58 = vmul.f32 %v3837_v21, %v3781_v44 }
 0xc08   : > { %3915 = vst.msk [vmem:[%s6591_s26] sm:$0xff] %vm603_vm0, %v3907_v56 }
 0xc09   : > { %3903 = vmatmul.f32.gmra.mxu0 %v3845_v58 }
 0xc0b   : > { %v3886_v42 = vpop.f32.mrf.mxu0 }
 0xc0c   : > { %v3887_v24 = vadd.f32 %v4385_v46, %v3886_v42 }
 0xc0e   : > { %v3908_v35 = vadd.f32 %v3887_v24, %v6370_v16 }
 0xc10   : > { %3916 = vst.msk [vmem:[%s6591_s26 + $0x8] sm:$0xff] %vm603_vm0, %v3908_v35 }
 0xc13   : > { %v3889_v53 = vpop.f32.mrf.mxu0 }
 0xc14   : > { %v3890_v59 = vadd.f32 %v4385_v46, %v3889_v53 }
 0xc16   : > { %v3909_v49 = vadd.f32 %v3890_v59, %v6375_v2 }
 0xc18   : > { %3917 = vst.msk [vmem:[%s6591_s26 + $0x10] sm:$0xff] %vm603_vm0, %v3909_v49 }
 0xc1b   : > { %v3892_v61 = vpop.f32.mrf.mxu0 }
 0xc1c   : > { %v3893_v13 = vadd.f32 %v4385_v46, %v3892_v61 }
 0xc1e   : > { %v3910_v32 = vadd.f32 %v3893_v13, %v6380_v15 }
 0xc20   : > { %3918 = vst.msk [vmem:[%s6591_s26 + $0x18] sm:$0xff] %vm603_vm0, %v3910_v32 }
 0xc23   : > { %v3895_v26 = vpop.f32.mrf.mxu0 }
 0xc24   : > { %v3896_v63 = vadd.f32 %v4385_v46, %v3895_v26 }
 0xc26   : > { %v3911_v16 = vadd.f32 %v3896_v63, %v6385_v18 }
 0xc28   : > { %3919 = vst.msk [vmem:[%s6591_s26 + $0x20] sm:$0xff] %vm603_vm0, %v3911_v16 }
 0xc2b   : > { %v3898_v43 = vpop.f32.mrf.mxu0 }
 0xc2c   : > { %v3899_v11 = vadd.f32 %v4385_v46, %v3898_v43 }
 0xc2e   : > { %v3912_v2 = vadd.f32 %v3899_v11, %v6390_v40 }
 0xc30   : > { %3920 = vst.msk [vmem:[%s6591_s26 + $0x28] sm:$0xff] %vm603_vm0, %v3912_v2 }
 0xc33   : > { %v3901_v34 = vpop.f32.mrf.mxu0 }
 0xc34   : > { %v3902_v23 = vadd.f32 %v4385_v46, %v3901_v34 }
 0xc36   : > { %v3913_v48 = vadd.f32 %v3902_v23, %v6395_v1 }
 0xc38   : > { %3921 = vst.msk [vmem:[%s6591_s26 + $0x30] sm:$0xff] %vm603_vm0, %v3913_v48 }
 0xc86   : > { %v3904_v15 = vpop.f32.mrf.mxu0 }
 0xc87   : > { %v3905_v54 = vadd.f32 %v4385_v46, %v3904_v15 }
 0xc89   : > { %v3914_v41 = vadd.f32 %v3905_v54, %v6408_v3 }
 0xc8b   : > { %3922 = vst.msk [vmem:[%s6591_s26 + $0x38] sm:$0xff] %vm603_vm0, %v3914_v41 }
 0xc8c PF: > { %s29_s27 = sadd.s32 1, %s4644_s27  }
 0xc8d   : > { %p26_p7 = scmp.ge.s32.totalorder %s29_s27, 4  }
 0xc8f   :  { %28 = sbr.rel (!%p26_p7) target bundleno = 5 (0x5), region = 141 }
 0xc94   :  { %3944 = vsyncpa [#allocation3], 1 }
 0xc95   :  { %3946 = vsyncpa [#allocation3 + $0x1], 1 }

</bundles_post_ra>
